<compile_context>
chip_gen: v5e
topology: v5e:2x2
jax: 0.10.0
libtpu: 0.0.40
codegen_flags: <defaults>
</compile_context>

<pallas_src>
import functools

import jax
import jax.numpy as jnp
from jax.experimental import pallas as pl
from jax.experimental.pallas import tpu as pltpu


# ----------------------------------------------------------------------------
# Pallas kernel: full decoder rollout for one batch tile (feature-major).
# ----------------------------------------------------------------------------
def _agent_decoder_kernel(
    xh0_ref,    # (2+H, Bt)   [last_pos_rel ; h0]^T  (batch on lanes)
    c0_ref,     # (H,   Bt)
    w0_ref,     # (4H, 2+H)   stacked/folded step-0 weight (transposed)
    b_in_ref,   # (4H, 1)
    wrec_ref,   # (4H, H)     folded recurrent weight (transposed)
    brec_ref,   # (4H, 1)
    cop_ref,    # (2S, S*H)   fused hidden2pos + lower-triangular time-cumsum
    bias_ref,   # (2S, Bt)    start_pos tiled over time + (t+1)*b_h2p
    traj_ref,   # out (2S, Bt)  absolute trajectory (row = 2*t + coord)
    hout_ref,   # out (H,  Bt)  final hidden state
    h_scr,      # scratch VMEM (S*H, Bt)  per-step hidden states
):
    H, Bt = c0_ref.shape
    S = h_scr.shape[0] // H

    wrec = wrec_ref[...]
    # hoist bias broadcasts out of the unrolled loop (done once)
    b_in = jnp.broadcast_to(b_in_ref[...], (4 * H, Bt))
    b_rec = jnp.broadcast_to(brec_ref[...], (4 * H, Bt))

    def lstm_act(gates, c):
        # feature-major gates, PyTorch row order [i | f | g | o].
        # Contiguous sublane slices; transcendentals only where needed.
        sig_if = jax.nn.sigmoid(gates[0:2 * H, :])
        g_g = jnp.tanh(gates[2 * H:3 * H, :])
        o_g = jax.nn.sigmoid(gates[3 * H:4 * H, :])
        c_new = sig_if[H:2 * H, :] * c + sig_if[0:H, :] * g_g
        h_new = o_g * jnp.tanh(c_new)
        return h_new, c_new

    # ---- step 0: single fused matmul over [last_pos_rel ; h0] ----
    gates = jnp.dot(w0_ref[...], xh0_ref[...],
                    preferred_element_type=jnp.float32) + b_in
    h, c = lstm_act(gates, c0_ref[...])
    h_scr[0:H, :] = h

    # ---- steps 1..S-1: folded recurrence, ONE (4H,H)@(H,Bt) matmul/step ----
    for t in range(1, S):
        gates = jnp.dot(wrec, h, preferred_element_type=jnp.float32) + b_rec
        h, c = lstm_act(gates, c)
        h_scr[t * H:(t + 1) * H, :] = h

    hout_ref[...] = h

    # ---- epilogue (off the recurrent critical path) ----
    # hidden2pos + cumsum over time as one small (2S, S*H)@(S*H, Bt) matmul,
    # single lane-dense store.
    traj_ref[...] = (
        jnp.dot(cop_ref[...], h_scr[...], preferred_element_type=jnp.float32)
        + bias_ref[...]
    )


# ----------------------------------------------------------------------------
# Wrapper: mirrors AgentDecoderLSTM.forward(last_pos_rel, (hh, ch), start_pos)
# Returns (abs_traj (seq_len, B, 2), hh_final (1, B, H)).
# ----------------------------------------------------------------------------
def agent_decoder_forward(last_pos_rel, state_tuple, start_pos, params,
                          seq_len, b_tile=128):
    hh, ch = state_tuple                      # (1, B, H) each (num_layers == 1)
    batch = last_pos_rel.shape[0]
    h_dim = hh.shape[-1]
    four_h = 4 * h_dim

    if start_pos is None:
        start_pos = jnp.zeros_like(last_pos_rel)

    w_emb, b_emb = params["w_emb"], params["b_emb"]
    w_ih, b_ih = params["w_ih"], params["b_ih"]
    w_hh, b_hh = params["w_hh"], params["b_hh"]
    w_h2p, b_h2p = params["w_h2p"], params["b_h2p"]

    # --- one-time algebraic folding (runs in XLA, outside the kernel) ---
    b_gates = b_ih + b_hh                                   # (1, 4H)
    w_in = w_emb @ w_ih                                     # (2, 4H)
    b_in = b_emb @ w_ih + b_gates                           # (1, 4H)
    w_fold = w_h2p @ w_emb                                  # (H, E)
    b_fold = b_h2p @ w_emb + b_emb                          # (1, E)
    w_rec = w_fold @ w_ih + w_hh                            # (H, 4H)
    b_rec = b_fold @ w_ih + b_gates                         # (1, 4H)

    w0_t = jnp.concatenate([w_in, w_hh], axis=0).T          # (4H, 2+H)
    wrec_t = w_rec.T                                        # (4H, H)
    b_in_col = b_in.T                                       # (4H, 1)
    b_rec_col = b_rec.T                                     # (4H, 1)

    # --- fused hidden2pos + lower-triangular time-cumsum operator (2S, S*H) ---
    # (batch-size independent; replaces the old O((S*B)^2) operator)
    t_row = jnp.arange(2 * seq_len) // 2
    s_col = jnp.arange(seq_len * h_dim) // h_dim
    mask = (s_col[None, :] <= t_row[:, None]).astype(jnp.float32)
    cop = mask * jnp.tile(w_h2p.T, (seq_len, seq_len))      # (2S, S*H)

    # --- pad the batch to whole lane-dense tiles ---
    num_tiles = max(1, (batch + b_tile - 1) // b_tile)
    padded_b = num_tiles * b_tile

    def pad_b(x):
        return jnp.pad(x, ((0, padded_b - batch), (0, 0)))

    xh0 = jnp.concatenate([pad_b(last_pos_rel), pad_b(hh[0])], axis=1).T  # (2+H, pB)
    c0 = pad_b(ch[0]).T                                                   # (H, pB)
    sp_t = pad_b(start_pos).T                                             # (2, pB)
    step_bias = (jnp.arange(1, seq_len + 1, dtype=jnp.float32)[:, None]
                 * b_h2p.reshape(1, 2)).reshape(2 * seq_len, 1)           # (2S, 1)
    bias = jnp.tile(sp_t, (seq_len, 1)) + step_bias                       # (2S, pB)

    # --- cost estimate (advisory) ---
    flops_tile = (
        2 * four_h * (2 + h_dim) * b_tile
        + (seq_len - 1) * 2 * four_h * h_dim * b_tile
        + 2 * (2 * seq_len) * (seq_len * h_dim) * b_tile
    )
    transc_tile = seq_len * 5 * h_dim * b_tile
    bytes_tile = 4 * (
        (2 + h_dim) * b_tile + h_dim * b_tile
        + four_h * (2 + h_dim) + four_h + four_h * h_dim + four_h
        + 2 * seq_len * seq_len * h_dim
        + 2 * seq_len * b_tile
        + 2 * seq_len * b_tile + h_dim * b_tile
    )
    cost = pl.CostEstimate(
        flops=num_tiles * flops_tile,
        transcendentals=num_tiles * transc_tile,
        bytes_accessed=num_tiles * bytes_tile,
    )

    full = lambda i: (0, 0)
    tiled = lambda i: (0, i)

    traj_fm, h_fm = pl.pallas_call(
        _agent_decoder_kernel,
        out_shape=(
            jax.ShapeDtypeStruct((2 * seq_len, padded_b), jnp.float32),
            jax.ShapeDtypeStruct((h_dim, padded_b), jnp.float32),
        ),
        grid=(num_tiles,),
        in_specs=[
            pl.BlockSpec((2 + h_dim, b_tile), tiled),            # xh0
            pl.BlockSpec((h_dim, b_tile), tiled),                # c0
            pl.BlockSpec((four_h, 2 + h_dim), full),             # w0_t
            pl.BlockSpec((four_h, 1), full),                     # b_in
            pl.BlockSpec((four_h, h_dim), full),                 # wrec_t
            pl.BlockSpec((four_h, 1), full),                     # b_rec
            pl.BlockSpec((2 * seq_len, seq_len * h_dim), full),  # cop
            pl.BlockSpec((2 * seq_len, b_tile), tiled),          # bias
        ],
        out_specs=(
            pl.BlockSpec((2 * seq_len, b_tile), tiled),
            pl.BlockSpec((h_dim, b_tile), tiled),
        ),
        scratch_shapes=[pltpu.VMEM((seq_len * h_dim, b_tile), jnp.float32)],
        compiler_params=pltpu.CompilerParams(
            dimension_semantics=("parallel",)),
        cost_estimate=cost,
    )(xh0, c0, w0_t, b_in_col, wrec_t, b_rec_col, cop, bias)

    abs_traj = traj_fm.reshape(seq_len, 2, padded_b)[:, :, :batch].transpose(0, 2, 1)
    h_final = h_fm[:, :batch].T.reshape(1, batch, h_dim)
    return abs_traj, h_final


# ----------------------------------------------------------------------------
# Pure-JAX reference (unfolded, mirrors the PyTorch loop exactly).
# ----------------------------------------------------------------------------
def reference_forward(last_pos_rel, state_tuple, start_pos, params, seq_len):
    hh, ch = state_tuple
    h = hh[0]
    c = ch[0]
    H = h.shape[-1]
    if start_pos is None:
        start_pos = jnp.zeros_like(last_pos_rel)

    x_emb = last_pos_rel @ params["w_emb"] + params["b_emb"]
    rels = []
    for _ in range(seq_len):
        gates = (
            x_emb @ params["w_ih"] + params["b_ih"]
            + h @ params["w_hh"] + params["b_hh"]
        )
        i_g = jax.nn.sigmoid(gates[:, 0 * H:1 * H])
        f_g = jax.nn.sigmoid(gates[:, 1 * H:2 * H])
        g_g = jnp.tanh(gates[:, 2 * H:3 * H])
        o_g = jax.nn.sigmoid(gates[:, 3 * H:4 * H])
        c = f_g * c + i_g * g_g
        h = o_g * jnp.tanh(c)
        rel = h @ params["w_h2p"] + params["b_h2p"]
        rels.append(rel)
        x_emb = rel @ params["w_emb"] + params["b_emb"]
    rel_traj = jnp.stack(rels, axis=0)                     # (seq_len, B, 2)
    abs_traj = jnp.cumsum(rel_traj, axis=0) + start_pos[None]
    return abs_traj, h[None]


# ----------------------------------------------------------------------------
# Deterministic parameter init (shapes implied by __init__ defaults).
# Weights stored TRANSPOSED w.r.t. PyTorch, i.e. (in_features, out_features).
# ----------------------------------------------------------------------------
def init_params(key, output_dim=2, embedding_dim=32, h_dim=32):
    ks = jax.random.split(key, 8)
    scale = 0.1
    return {
        "w_emb": scale * jax.random.normal(ks[0], (output_dim, embedding_dim), jnp.float32),
        "b_emb": scale * jax.random.normal(ks[1], (1, embedding_dim), jnp.float32),
        "w_ih": scale * jax.random.normal(ks[2], (embedding_dim, 4 * h_dim), jnp.float32),
        "b_ih": scale * jax.random.normal(ks[3], (1, 4 * h_dim), jnp.float32),
        "w_hh": scale * jax.random.normal(ks[4], (h_dim, 4 * h_dim), jnp.float32),
        "b_hh": scale * jax.random.normal(ks[5], (1, 4 * h_dim), jnp.float32),
        "w_h2p": scale * jax.random.normal(ks[6], (h_dim, output_dim), jnp.float32),
        "b_h2p": scale * jax.random.normal(ks[7], (1, output_dim), jnp.float32),
    }


if __name__ == "__main__":
    SEQ_LEN = 8
    BATCH = 256          # 2 batch tiles of 128 -> exercises the parallel grid axis
    H_DIM = 32
    EMB_DIM = 32

    key = jax.random.PRNGKey(0)
    k_p, k_x, k_h, k_c, k_s = jax.random.split(key, 5)

    params = init_params(k_p, output_dim=2, embedding_dim=EMB_DIM, h_dim=H_DIM)

    last_pos_rel = jax.random.normal(k_x, (BATCH, 2), jnp.float32)
    hh = jax.random.normal(k_h, (1, BATCH, H_DIM), jnp.float32)
    ch = jax.random.normal(k_c, (1, BATCH, H_DIM), jnp.float32)
    start_pos = jax.random.normal(k_s, (BATCH, 2), jnp.float32)

    fwd = jax.jit(functools.partial(agent_decoder_forward,
                                    seq_len=SEQ_LEN, b_tile=128))
    abs_traj, h_final = fwd(last_pos_rel, (hh, ch), start_pos, params)
    jax.block_until_ready((abs_traj, h_final))

    # sanity check against pure-JAX reference (validates the algebraic folding,
    # the feature-major gate slicing and the fused h2p+cumsum epilogue)
    ref_traj, ref_h = reference_forward(last_pos_rel, (hh, ch), start_pos,
                                        params, SEQ_LEN)
    assert abs_traj.shape == (SEQ_LEN, BATCH, 2)
    assert h_final.shape == (1, BATCH, H_DIM)
    assert jnp.allclose(abs_traj, ref_traj, atol=1e-3, rtol=1e-3)
    assert jnp.allclose(h_final, ref_h, atol=1e-3, rtol=1e-3)

    print("KERNEL_OK")
</pallas_src>

<mosaic_0001>
module attributes {stable_mosaic.version = 11 : i64} {
  func.func @_agent_decoder_kernel(%arg0: i32, %arg1: memref<34x128xf32, #tpu.memory_space<vmem>>, %arg2: memref<32x128xf32, #tpu.memory_space<vmem>>, %arg3: memref<128x34xf32, #tpu.memory_space<vmem>>, %arg4: memref<128x1xf32, #tpu.memory_space<vmem>>, %arg5: memref<128x32xf32, #tpu.memory_space<vmem>>, %arg6: memref<128x1xf32, #tpu.memory_space<vmem>>, %arg7: memref<16x256xf32, #tpu.memory_space<vmem>>, %arg8: memref<16x128xf32, #tpu.memory_space<vmem>>, %arg9: memref<16x128xf32, #tpu.memory_space<vmem>>, %arg10: memref<32x128xf32, #tpu.memory_space<vmem>>, %arg11: memref<256x128xf32, #tpu.memory_space<vmem>>) attributes {dimension_semantics = [#tpu.dimension_semantics<parallel>], iteration_bounds = array<i64: 2>, scalar_prefetch = 0 : i64, scratch_operands = 1 : i64, tpu.core_type = #tpu.core_type<tc>, window_params = [{transform_indices = @transform_0, window_bounds = array<i64: 34, 128>}, {transform_indices = @transform_1, window_bounds = array<i64: 32, 128>}, {pipeline_mode = #tpu.pipeline_mode<synchronous>, transform_indices = @transform_2, window_bounds = array<i64: 128, 34>}, {pipeline_mode = #tpu.pipeline_mode<synchronous>, transform_indices = @transform_3, window_bounds = array<i64: 128, 1>}, {pipeline_mode = #tpu.pipeline_mode<synchronous>, transform_indices = @transform_4, window_bounds = array<i64: 128, 32>}, {pipeline_mode = #tpu.pipeline_mode<synchronous>, transform_indices = @transform_5, window_bounds = array<i64: 128, 1>}, {pipeline_mode = #tpu.pipeline_mode<synchronous>, transform_indices = @transform_6, window_bounds = array<i64: 16, 256>}, {transform_indices = @transform_7, window_bounds = array<i64: 16, 128>}, {transform_indices = @transform_8, window_bounds = array<i64: 16, 128>}, {transform_indices = @transform_9, window_bounds = array<i64: 32, 128>}]} {
    %c0 = arith.constant 0 : index
    %c0_0 = arith.constant 0 : index
    %0 = vector.load %arg5[%c0, %c0_0] : memref<128x32xf32, #tpu.memory_space<vmem>>, vector<128x32xf32>
    %c0_1 = arith.constant 0 : index
    %c0_2 = arith.constant 0 : index
    %1 = vector.load %arg4[%c0_1, %c0_2] : memref<128x1xf32, #tpu.memory_space<vmem>>, vector<128x1xf32>
    %2 = vector.shape_cast %1 : vector<128x1xf32> to vector<128x1xf32>
    %3 = vector.broadcast %2 : vector<128x1xf32> to vector<128x128xf32>
    %c0_3 = arith.constant 0 : index
    %c0_4 = arith.constant 0 : index
    %4 = vector.load %arg6[%c0_3, %c0_4] : memref<128x1xf32, #tpu.memory_space<vmem>>, vector<128x1xf32>
    %5 = vector.shape_cast %4 : vector<128x1xf32> to vector<128x1xf32>
    %6 = vector.broadcast %5 : vector<128x1xf32> to vector<128x128xf32>
    %c0_5 = arith.constant 0 : index
    %c0_6 = arith.constant 0 : index
    %7 = vector.load %arg3[%c0_5, %c0_6] : memref<128x34xf32, #tpu.memory_space<vmem>>, vector<128x34xf32>
    %c0_7 = arith.constant 0 : index
    %c0_8 = arith.constant 0 : index
    %8 = vector.load %arg1[%c0_7, %c0_8] : memref<34x128xf32, #tpu.memory_space<vmem>>, vector<34x128xf32>
    %cst = arith.constant dense<0.000000e+00> : vector<128x128xf32>
    %9 = tpu.matmul %7, %8, %cst {dimension_numbers = #tpu.dot_dimension_numbers<[1], [0], [0], [1], [0, 0, 1, 1], [], []>} : vector<128x34xf32>, vector<34x128xf32>, vector<128x128xf32> -> vector<128x128xf32>
    %10 = arith.addf %9, %3 : vector<128x128xf32>
    %c0_9 = arith.constant 0 : index
    %c0_10 = arith.constant 0 : index
    %11 = vector.load %arg2[%c0_9, %c0_10] : memref<32x128xf32, #tpu.memory_space<vmem>>, vector<32x128xf32>
    %12 = vector.extract_strided_slice %10 {offsets = [0, 0], sizes = [64, 128], strides = [1, 1]} : vector<128x128xf32> to vector<64x128xf32>
    %13 = arith.negf %12 : vector<64x128xf32>
    %14 = math.exp %13 : vector<64x128xf32>
    %cst_11 = arith.constant 1.000000e+00 : f32
    %15 = vector.broadcast %cst_11 : f32 to vector<64x128xf32>
    %16 = arith.addf %15, %14 : vector<64x128xf32>
    %17 = arith.divf %15, %16 : vector<64x128xf32>
    %18 = vector.extract_strided_slice %10 {offsets = [64, 0], sizes = [32, 128], strides = [1, 1]} : vector<128x128xf32> to vector<32x128xf32>
    %19 = math.tanh %18 : vector<32x128xf32>
    %20 = vector.extract_strided_slice %10 {offsets = [96, 0], sizes = [32, 128], strides = [1, 1]} : vector<128x128xf32> to vector<32x128xf32>
    %21 = arith.negf %20 : vector<32x128xf32>
    %22 = math.exp %21 : vector<32x128xf32>
    %cst_12 = arith.constant 1.000000e+00 : f32
    %23 = vector.broadcast %cst_12 : f32 to vector<32x128xf32>
    %24 = arith.addf %23, %22 : vector<32x128xf32>
    %25 = arith.divf %23, %24 : vector<32x128xf32>
    %26 = vector.extract_strided_slice %17 {offsets = [32, 0], sizes = [32, 128], strides = [1, 1]} : vector<64x128xf32> to vector<32x128xf32>
    %27 = arith.mulf %26, %11 : vector<32x128xf32>
    %28 = vector.extract_strided_slice %17 {offsets = [0, 0], sizes = [32, 128], strides = [1, 1]} : vector<64x128xf32> to vector<32x128xf32>
    %29 = arith.mulf %28, %19 : vector<32x128xf32>
    %30 = arith.addf %27, %29 : vector<32x128xf32>
    %31 = math.tanh %30 : vector<32x128xf32>
    %32 = arith.mulf %25, %31 : vector<32x128xf32>
    %c0_13 = arith.constant 0 : index
    %c0_14 = arith.constant 0 : index
    %33 = vector.load %arg11[%c0_13, %c0_14] : memref<256x128xf32, #tpu.memory_space<vmem>>, vector<32x128xf32>
    tpu.vector_store %arg11[%c0_13, %c0_14], %32 {strides = array<i32>} : memref<256x128xf32, #tpu.memory_space<vmem>>, vector<32x128xf32>,
    %cst_15 = arith.constant dense<0.000000e+00> : vector<128x128xf32>
    %34 = tpu.matmul %0, %32, %cst_15 {dimension_numbers = #tpu.dot_dimension_numbers<[1], [0], [0], [1], [0, 0, 1, 1], [], []>} : vector<128x32xf32>, vector<32x128xf32>, vector<128x128xf32> -> vector<128x128xf32>
    %35 = arith.addf %34, %6 : vector<128x128xf32>
    %36 = vector.extract_strided_slice %35 {offsets = [0, 0], sizes = [64, 128], strides = [1, 1]} : vector<128x128xf32> to vector<64x128xf32>
    %37 = arith.negf %36 : vector<64x128xf32>
    %38 = math.exp %37 : vector<64x128xf32>
    %cst_16 = arith.constant 1.000000e+00 : f32
    %39 = vector.broadcast %cst_16 : f32 to vector<64x128xf32>
    %40 = arith.addf %39, %38 : vector<64x128xf32>
    %41 = arith.divf %39, %40 : vector<64x128xf32>
    %42 = vector.extract_strided_slice %35 {offsets = [64, 0], sizes = [32, 128], strides = [1, 1]} : vector<128x128xf32> to vector<32x128xf32>
    %43 = math.tanh %42 : vector<32x128xf32>
    %44 = vector.extract_strided_slice %35 {offsets = [96, 0], sizes = [32, 128], strides = [1, 1]} : vector<128x128xf32> to vector<32x128xf32>
    %45 = arith.negf %44 : vector<32x128xf32>
    %46 = math.exp %45 : vector<32x128xf32>
    %cst_17 = arith.constant 1.000000e+00 : f32
    %47 = vector.broadcast %cst_17 : f32 to vector<32x128xf32>
    %48 = arith.addf %47, %46 : vector<32x128xf32>
    %49 = arith.divf %47, %48 : vector<32x128xf32>
    %50 = vector.extract_strided_slice %41 {offsets = [32, 0], sizes = [32, 128], strides = [1, 1]} : vector<64x128xf32> to vector<32x128xf32>
    %51 = arith.mulf %50, %30 : vector<32x128xf32>
    %52 = vector.extract_strided_slice %41 {offsets = [0, 0], sizes = [32, 128], strides = [1, 1]} : vector<64x128xf32> to vector<32x128xf32>
    %53 = arith.mulf %52, %43 : vector<32x128xf32>
    %54 = arith.addf %51, %53 : vector<32x128xf32>
    %55 = math.tanh %54 : vector<32x128xf32>
    %56 = arith.mulf %49, %55 : vector<32x128xf32>
    %c32 = arith.constant 32 : index
    %c0_18 = arith.constant 0 : index
    %57 = vector.load %arg11[%c32, %c0_18] : memref<256x128xf32, #tpu.memory_space<vmem>>, vector<32x128xf32>
    tpu.vector_store %arg11[%c32, %c0_18], %56 {strides = array<i32>} : memref<256x128xf32, #tpu.memory_space<vmem>>, vector<32x128xf32>,
    %cst_19 = arith.constant dense<0.000000e+00> : vector<128x128xf32>
    %58 = tpu.matmul %0, %56, %cst_19 {dimension_numbers = #tpu.dot_dimension_numbers<[1], [0], [0], [1], [0, 0, 1, 1], [], []>} : vector<128x32xf32>, vector<32x128xf32>, vector<128x128xf32> -> vector<128x128xf32>
    %59 = arith.addf %58, %6 : vector<128x128xf32>
    %60 = vector.extract_strided_slice %59 {offsets = [0, 0], sizes = [64, 128], strides = [1, 1]} : vector<128x128xf32> to vector<64x128xf32>
    %61 = arith.negf %60 : vector<64x128xf32>
    %62 = math.exp %61 : vector<64x128xf32>
    %cst_20 = arith.constant 1.000000e+00 : f32
    %63 = vector.broadcast %cst_20 : f32 to vector<64x128xf32>
    %64 = arith.addf %63, %62 : vector<64x128xf32>
    %65 = arith.divf %63, %64 : vector<64x128xf32>
    %66 = vector.extract_strided_slice %59 {offsets = [64, 0], sizes = [32, 128], strides = [1, 1]} : vector<128x128xf32> to vector<32x128xf32>
    %67 = math.tanh %66 : vector<32x128xf32>
    %68 = vector.extract_strided_slice %59 {offsets = [96, 0], sizes = [32, 128], strides = [1, 1]} : vector<128x128xf32> to vector<32x128xf32>
    %69 = arith.negf %68 : vector<32x128xf32>
    %70 = math.exp %69 : vector<32x128xf32>
    %cst_21 = arith.constant 1.000000e+00 : f32
    %71 = vector.broadcast %cst_21 : f32 to vector<32x128xf32>
    %72 = arith.addf %71, %70 : vector<32x128xf32>
    %73 = arith.divf %71, %72 : vector<32x128xf32>
    %74 = vector.extract_strided_slice %65 {offsets = [32, 0], sizes = [32, 128], strides = [1, 1]} : vector<64x128xf32> to vector<32x128xf32>
    %75 = arith.mulf %74, %54 : vector<32x128xf32>
    %76 = vector.extract_strided_slice %65 {offsets = [0, 0], sizes = [32, 128], strides = [1, 1]} : vector<64x128xf32> to vector<32x128xf32>
    %77 = arith.mulf %76, %67 : vector<32x128xf32>
    %78 = arith.addf %75, %77 : vector<32x128xf32>
    %79 = math.tanh %78 : vector<32x128xf32>
    %80 = arith.mulf %73, %79 : vector<32x128xf32>
    %c64 = arith.constant 64 : index
    %c0_22 = arith.constant 0 : index
    %81 = vector.load %arg11[%c64, %c0_22] : memref<256x128xf32, #tpu.memory_space<vmem>>, vector<32x128xf32>
    tpu.vector_store %arg11[%c64, %c0_22], %80 {strides = array<i32>} : memref<256x128xf32, #tpu.memory_space<vmem>>, vector<32x128xf32>,
    %cst_23 = arith.constant dense<0.000000e+00> : vector<128x128xf32>
    %82 = tpu.matmul %0, %80, %cst_23 {dimension_numbers = #tpu.dot_dimension_numbers<[1], [0], [0], [1], [0, 0, 1, 1], [], []>} : vector<128x32xf32>, vector<32x128xf32>, vector<128x128xf32> -> vector<128x128xf32>
    %83 = arith.addf %82, %6 : vector<128x128xf32>
    %84 = vector.extract_strided_slice %83 {offsets = [0, 0], sizes = [64, 128], strides = [1, 1]} : vector<128x128xf32> to vector<64x128xf32>
    %85 = arith.negf %84 : vector<64x128xf32>
    %86 = math.exp %85 : vector<64x128xf32>
    %cst_24 = arith.constant 1.000000e+00 : f32
    %87 = vector.broadcast %cst_24 : f32 to vector<64x128xf32>
    %88 = arith.addf %87, %86 : vector<64x128xf32>
    %89 = arith.divf %87, %88 : vector<64x128xf32>
    %90 = vector.extract_strided_slice %83 {offsets = [64, 0], sizes = [32, 128], strides = [1, 1]} : vector<128x128xf32> to vector<32x128xf32>
    %91 = math.tanh %90 : vector<32x128xf32>
    %92 = vector.extract_strided_slice %83 {offsets = [96, 0], sizes = [32, 128], strides = [1, 1]} : vector<128x128xf32> to vector<32x128xf32>
    %93 = arith.negf %92 : vector<32x128xf32>
    %94 = math.exp %93 : vector<32x128xf32>
    %cst_25 = arith.constant 1.000000e+00 : f32
    %95 = vector.broadcast %cst_25 : f32 to vector<32x128xf32>
    %96 = arith.addf %95, %94 : vector<32x128xf32>
    %97 = arith.divf %95, %96 : vector<32x128xf32>
    %98 = vector.extract_strided_slice %89 {offsets = [32, 0], sizes = [32, 128], strides = [1, 1]} : vector<64x128xf32> to vector<32x128xf32>
    %99 = arith.mulf %98, %78 : vector<32x128xf32>
    %100 = vector.extract_strided_slice %89 {offsets = [0, 0], sizes = [32, 128], strides = [1, 1]} : vector<64x128xf32> to vector<32x128xf32>
    %101 = arith.mulf %100, %91 : vector<32x128xf32>
    %102 = arith.addf %99, %101 : vector<32x128xf32>
    %103 = math.tanh %102 : vector<32x128xf32>
    %104 = arith.mulf %97, %103 : vector<32x128xf32>
    %c96 = arith.constant 96 : index
    %c0_26 = arith.constant 0 : index
    %105 = vector.load %arg11[%c96, %c0_26] : memref<256x128xf32, #tpu.memory_space<vmem>>, vector<32x128xf32>
    tpu.vector_store %arg11[%c96, %c0_26], %104 {strides = array<i32>} : memref<256x128xf32, #tpu.memory_space<vmem>>, vector<32x128xf32>,
    %cst_27 = arith.constant dense<0.000000e+00> : vector<128x128xf32>
    %106 = tpu.matmul %0, %104, %cst_27 {dimension_numbers = #tpu.dot_dimension_numbers<[1], [0], [0], [1], [0, 0, 1, 1], [], []>} : vector<128x32xf32>, vector<32x128xf32>, vector<128x128xf32> -> vector<128x128xf32>
    %107 = arith.addf %106, %6 : vector<128x128xf32>
    %108 = vector.extract_strided_slice %107 {offsets = [0, 0], sizes = [64, 128], strides = [1, 1]} : vector<128x128xf32> to vector<64x128xf32>
    %109 = arith.negf %108 : vector<64x128xf32>
    %110 = math.exp %109 : vector<64x128xf32>
    %cst_28 = arith.constant 1.000000e+00 : f32
    %111 = vector.broadcast %cst_28 : f32 to vector<64x128xf32>
    %112 = arith.addf %111, %110 : vector<64x128xf32>
    %113 = arith.divf %111, %112 : vector<64x128xf32>
    %114 = vector.extract_strided_slice %107 {offsets = [64, 0], sizes = [32, 128], strides = [1, 1]} : vector<128x128xf32> to vector<32x128xf32>
    %115 = math.tanh %114 : vector<32x128xf32>
    %116 = vector.extract_strided_slice %107 {offsets = [96, 0], sizes = [32, 128], strides = [1, 1]} : vector<128x128xf32> to vector<32x128xf32>
    %117 = arith.negf %116 : vector<32x128xf32>
    %118 = math.exp %117 : vector<32x128xf32>
    %cst_29 = arith.constant 1.000000e+00 : f32
    %119 = vector.broadcast %cst_29 : f32 to vector<32x128xf32>
    %120 = arith.addf %119, %118 : vector<32x128xf32>
    %121 = arith.divf %119, %120 : vector<32x128xf32>
    %122 = vector.extract_strided_slice %113 {offsets = [32, 0], sizes = [32, 128], strides = [1, 1]} : vector<64x128xf32> to vector<32x128xf32>
    %123 = arith.mulf %122, %102 : vector<32x128xf32>
    %124 = vector.extract_strided_slice %113 {offsets = [0, 0], sizes = [32, 128], strides = [1, 1]} : vector<64x128xf32> to vector<32x128xf32>
    %125 = arith.mulf %124, %115 : vector<32x128xf32>
    %126 = arith.addf %123, %125 : vector<32x128xf32>
    %127 = math.tanh %126 : vector<32x128xf32>
    %128 = arith.mulf %121, %127 : vector<32x128xf32>
    %c128 = arith.constant 128 : index
    %c0_30 = arith.constant 0 : index
    %129 = vector.load %arg11[%c128, %c0_30] : memref<256x128xf32, #tpu.memory_space<vmem>>, vector<32x128xf32>
    tpu.vector_store %arg11[%c128, %c0_30], %128 {strides = array<i32>} : memref<256x128xf32, #tpu.memory_space<vmem>>, vector<32x128xf32>,
    %cst_31 = arith.constant dense<0.000000e+00> : vector<128x128xf32>
    %130 = tpu.matmul %0, %128, %cst_31 {dimension_numbers = #tpu.dot_dimension_numbers<[1], [0], [0], [1], [0, 0, 1, 1], [], []>} : vector<128x32xf32>, vector<32x128xf32>, vector<128x128xf32> -> vector<128x128xf32>
    %131 = arith.addf %130, %6 : vector<128x128xf32>
    %132 = vector.extract_strided_slice %131 {offsets = [0, 0], sizes = [64, 128], strides = [1, 1]} : vector<128x128xf32> to vector<64x128xf32>
    %133 = arith.negf %132 : vector<64x128xf32>
    %134 = math.exp %133 : vector<64x128xf32>
    %cst_32 = arith.constant 1.000000e+00 : f32
    %135 = vector.broadcast %cst_32 : f32 to vector<64x128xf32>
    %136 = arith.addf %135, %134 : vector<64x128xf32>
    %137 = arith.divf %135, %136 : vector<64x128xf32>
    %138 = vector.extract_strided_slice %131 {offsets = [64, 0], sizes = [32, 128], strides = [1, 1]} : vector<128x128xf32> to vector<32x128xf32>
    %139 = math.tanh %138 : vector<32x128xf32>
    %140 = vector.extract_strided_slice %131 {offsets = [96, 0], sizes = [32, 128], strides = [1, 1]} : vector<128x128xf32> to vector<32x128xf32>
    %141 = arith.negf %140 : vector<32x128xf32>
    %142 = math.exp %141 : vector<32x128xf32>
    %cst_33 = arith.constant 1.000000e+00 : f32
    %143 = vector.broadcast %cst_33 : f32 to vector<32x128xf32>
    %144 = arith.addf %143, %142 : vector<32x128xf32>
    %145 = arith.divf %143, %144 : vector<32x128xf32>
    %146 = vector.extract_strided_slice %137 {offsets = [32, 0], sizes = [32, 128], strides = [1, 1]} : vector<64x128xf32> to vector<32x128xf32>
    %147 = arith.mulf %146, %126 : vector<32x128xf32>
    %148 = vector.extract_strided_slice %137 {offsets = [0, 0], sizes = [32, 128], strides = [1, 1]} : vector<64x128xf32> to vector<32x128xf32>
    %149 = arith.mulf %148, %139 : vector<32x128xf32>
    %150 = arith.addf %147, %149 : vector<32x128xf32>
    %151 = math.tanh %150 : vector<32x128xf32>
    %152 = arith.mulf %145, %151 : vector<32x128xf32>
    %c160 = arith.constant 160 : index
    %c0_34 = arith.constant 0 : index
    %153 = vector.load %arg11[%c160, %c0_34] : memref<256x128xf32, #tpu.memory_space<vmem>>, vector<32x128xf32>
    tpu.vector_store %arg11[%c160, %c0_34], %152 {strides = array<i32>} : memref<256x128xf32, #tpu.memory_space<vmem>>, vector<32x128xf32>,
    %cst_35 = arith.constant dense<0.000000e+00> : vector<128x128xf32>
    %154 = tpu.matmul %0, %152, %cst_35 {dimension_numbers = #tpu.dot_dimension_numbers<[1], [0], [0], [1], [0, 0, 1, 1], [], []>} : vector<128x32xf32>, vector<32x128xf32>, vector<128x128xf32> -> vector<128x128xf32>
    %155 = arith.addf %154, %6 : vector<128x128xf32>
    %156 = vector.extract_strided_slice %155 {offsets = [0, 0], sizes = [64, 128], strides = [1, 1]} : vector<128x128xf32> to vector<64x128xf32>
    %157 = arith.negf %156 : vector<64x128xf32>
    %158 = math.exp %157 : vector<64x128xf32>
    %cst_36 = arith.constant 1.000000e+00 : f32
    %159 = vector.broadcast %cst_36 : f32 to vector<64x128xf32>
    %160 = arith.addf %159, %158 : vector<64x128xf32>
    %161 = arith.divf %159, %160 : vector<64x128xf32>
    %162 = vector.extract_strided_slice %155 {offsets = [64, 0], sizes = [32, 128], strides = [1, 1]} : vector<128x128xf32> to vector<32x128xf32>
    %163 = math.tanh %162 : vector<32x128xf32>
    %164 = vector.extract_strided_slice %155 {offsets = [96, 0], sizes = [32, 128], strides = [1, 1]} : vector<128x128xf32> to vector<32x128xf32>
    %165 = arith.negf %164 : vector<32x128xf32>
    %166 = math.exp %165 : vector<32x128xf32>
    %cst_37 = arith.constant 1.000000e+00 : f32
    %167 = vector.broadcast %cst_37 : f32 to vector<32x128xf32>
    %168 = arith.addf %167, %166 : vector<32x128xf32>
    %169 = arith.divf %167, %168 : vector<32x128xf32>
    %170 = vector.extract_strided_slice %161 {offsets = [32, 0], sizes = [32, 128], strides = [1, 1]} : vector<64x128xf32> to vector<32x128xf32>
    %171 = arith.mulf %170, %150 : vector<32x128xf32>
    %172 = vector.extract_strided_slice %161 {offsets = [0, 0], sizes = [32, 128], strides = [1, 1]} : vector<64x128xf32> to vector<32x128xf32>
    %173 = arith.mulf %172, %163 : vector<32x128xf32>
    %174 = arith.addf %171, %173 : vector<32x128xf32>
    %175 = math.tanh %174 : vector<32x128xf32>
    %176 = arith.mulf %169, %175 : vector<32x128xf32>
    %c192 = arith.constant 192 : index
    %c0_38 = arith.constant 0 : index
    %177 = vector.load %arg11[%c192, %c0_38] : memref<256x128xf32, #tpu.memory_space<vmem>>, vector<32x128xf32>
    tpu.vector_store %arg11[%c192, %c0_38], %176 {strides = array<i32>} : memref<256x128xf32, #tpu.memory_space<vmem>>, vector<32x128xf32>,
    %cst_39 = arith.constant dense<0.000000e+00> : vector<128x128xf32>
    %178 = tpu.matmul %0, %176, %cst_39 {dimension_numbers = #tpu.dot_dimension_numbers<[1], [0], [0], [1], [0, 0, 1, 1], [], []>} : vector<128x32xf32>, vector<32x128xf32>, vector<128x128xf32> -> vector<128x128xf32>
    %179 = arith.addf %178, %6 : vector<128x128xf32>
    %180 = vector.extract_strided_slice %179 {offsets = [0, 0], sizes = [64, 128], strides = [1, 1]} : vector<128x128xf32> to vector<64x128xf32>
    %181 = arith.negf %180 : vector<64x128xf32>
    %182 = math.exp %181 : vector<64x128xf32>
    %cst_40 = arith.constant 1.000000e+00 : f32
    %183 = vector.broadcast %cst_40 : f32 to vector<64x128xf32>
    %184 = arith.addf %183, %182 : vector<64x128xf32>
    %185 = arith.divf %183, %184 : vector<64x128xf32>
    %186 = vector.extract_strided_slice %179 {offsets = [64, 0], sizes = [32, 128], strides = [1, 1]} : vector<128x128xf32> to vector<32x128xf32>
    %187 = math.tanh %186 : vector<32x128xf32>
    %188 = vector.extract_strided_slice %179 {offsets = [96, 0], sizes = [32, 128], strides = [1, 1]} : vector<128x128xf32> to vector<32x128xf32>
    %189 = arith.negf %188 : vector<32x128xf32>
    %190 = math.exp %189 : vector<32x128xf32>
    %cst_41 = arith.constant 1.000000e+00 : f32
    %191 = vector.broadcast %cst_41 : f32 to vector<32x128xf32>
    %192 = arith.addf %191, %190 : vector<32x128xf32>
    %193 = arith.divf %191, %192 : vector<32x128xf32>
    %194 = vector.extract_strided_slice %185 {offsets = [32, 0], sizes = [32, 128], strides = [1, 1]} : vector<64x128xf32> to vector<32x128xf32>
    %195 = arith.mulf %194, %174 : vector<32x128xf32>
    %196 = vector.extract_strided_slice %185 {offsets = [0, 0], sizes = [32, 128], strides = [1, 1]} : vector<64x128xf32> to vector<32x128xf32>
    %197 = arith.mulf %196, %187 : vector<32x128xf32>
    %198 = arith.addf %195, %197 : vector<32x128xf32>
    %199 = math.tanh %198 : vector<32x128xf32>
    %200 = arith.mulf %193, %199 : vector<32x128xf32>
    %c224 = arith.constant 224 : index
    %c0_42 = arith.constant 0 : index
    %201 = vector.load %arg11[%c224, %c0_42] : memref<256x128xf32, #tpu.memory_space<vmem>>, vector<32x128xf32>
    tpu.vector_store %arg11[%c224, %c0_42], %200 {strides = array<i32>} : memref<256x128xf32, #tpu.memory_space<vmem>>, vector<32x128xf32>,
    %c0_43 = arith.constant 0 : index
    %c0_44 = arith.constant 0 : index
    %202 = vector.load %arg10[%c0_43, %c0_44] : memref<32x128xf32, #tpu.memory_space<vmem>>, vector<32x128xf32>
    tpu.vector_store %arg10[%c0_43, %c0_44], %200 {strides = array<i32>} : memref<32x128xf32, #tpu.memory_space<vmem>>, vector<32x128xf32>,
    %c0_45 = arith.constant 0 : index
    %c0_46 = arith.constant 0 : index
    %203 = vector.load %arg7[%c0_45, %c0_46] : memref<16x256xf32, #tpu.memory_space<vmem>>, vector<16x256xf32>
    %c0_47 = arith.constant 0 : index
    %c0_48 = arith.constant 0 : index
    %204 = vector.load %arg11[%c0_47, %c0_48] : memref<256x128xf32, #tpu.memory_space<vmem>>, vector<256x128xf32>
    %cst_49 = arith.constant dense<0.000000e+00> : vector<16x128xf32>
    %205 = tpu.matmul %203, %204, %cst_49 {dimension_numbers = #tpu.dot_dimension_numbers<[1], [0], [0], [1], [0, 0, 1, 1], [], []>} : vector<16x256xf32>, vector<256x128xf32>, vector<16x128xf32> -> vector<16x128xf32>
    %c0_50 = arith.constant 0 : index
    %c0_51 = arith.constant 0 : index
    %206 = vector.load %arg8[%c0_50, %c0_51] : memref<16x128xf32, #tpu.memory_space<vmem>>, vector<16x128xf32>
    %207 = arith.addf %205, %206 : vector<16x128xf32>
    %c0_52 = arith.constant 0 : index
    %c0_53 = arith.constant 0 : index
    %208 = vector.load %arg9[%c0_52, %c0_53] : memref<16x128xf32, #tpu.memory_space<vmem>>, vector<16x128xf32>
    tpu.vector_store %arg9[%c0_52, %c0_53], %207 {strides = array<i32>} : memref<16x128xf32, #tpu.memory_space<vmem>>, vector<16x128xf32>,
    return
  }
  func.func @transform_0(%arg0: i32) -> (i32, i32) {
    %c0_i32 = arith.constant 0 : i32
    %c0_i32_0 = arith.constant 0 : i32
    return %c0_i32, %arg0 : i32, i32
  }
  func.func @transform_1(%arg0: i32) -> (i32, i32) {
    %c0_i32 = arith.constant 0 : i32
    %c0_i32_0 = arith.constant 0 : i32
    return %c0_i32, %arg0 : i32, i32
  }
  func.func @transform_2(%arg0: i32) -> (i32, i32) {
    %c0_i32 = arith.constant 0 : i32
    %c0_i32_0 = arith.constant 0 : i32
    %c0_i32_1 = arith.constant 0 : i32
    return %c0_i32, %c0_i32_0 : i32, i32
  }
  func.func @transform_3(%arg0: i32) -> (i32, i32) {
    %c0_i32 = arith.constant 0 : i32
    %c0_i32_0 = arith.constant 0 : i32
    %c0_i32_1 = arith.constant 0 : i32
    return %c0_i32, %c0_i32_0 : i32, i32
  }
  func.func @transform_4(%arg0: i32) -> (i32, i32) {
    %c0_i32 = arith.constant 0 : i32
    %c0_i32_0 = arith.constant 0 : i32
    %c0_i32_1 = arith.constant 0 : i32
    return %c0_i32, %c0_i32_0 : i32, i32
  }
  func.func @transform_5(%arg0: i32) -> (i32, i32) {
    %c0_i32 = arith.constant 0 : i32
    %c0_i32_0 = arith.constant 0 : i32
    %c0_i32_1 = arith.constant 0 : i32
    return %c0_i32, %c0_i32_0 : i32, i32
  }
  func.func @transform_6(%arg0: i32) -> (i32, i32) {
    %c0_i32 = arith.constant 0 : i32
    %c0_i32_0 = arith.constant 0 : i32
    %c0_i32_1 = arith.constant 0 : i32
    return %c0_i32, %c0_i32_0 : i32, i32
  }
  func.func @transform_7(%arg0: i32) -> (i32, i32) {
    %c0_i32 = arith.constant 0 : i32
    %c0_i32_0 = arith.constant 0 : i32
    return %c0_i32, %arg0 : i32, i32
  }
  func.func @transform_8(%arg0: i32) -> (i32, i32) {
    %c0_i32 = arith.constant 0 : i32
    %c0_i32_0 = arith.constant 0 : i32
    return %c0_i32, %arg0 : i32, i32
  }
  func.func @transform_9(%arg0: i32) -> (i32, i32) {
    %c0_i32 = arith.constant 0 : i32
    %c0_i32_0 = arith.constant 0 : i32
    return %c0_i32, %arg0 : i32, i32
  }
}

</mosaic_0001>

<bundles_post_ra>
// kernel: tile.19
= control target key start
LH: loop header
LB: loop body
LE: loop exit
PB: predicated region body
PF: predicated region fallthrough
CT: control target
= control target key end

     0   :  { %s264_s0 = inlined_call_operand.vmem [shape: f32[8,2,256], index: 0, kind: input, shape index: {}]   ;;  %s265_s1 = inlined_call_operand.vmem [shape: f32[16,256], index: 1, kind: output, shape index: {}]  }
   0x1   :  { %v128_v0 = vld [vmem:[%s264_s0 + $0x1e] sm:$0x3]  ;;  %v129_v1 = vld [vmem:[%s264_s0 + $0x1c] sm:$0x3]  ;;  %v130_v2 = vld [vmem:[%s264_s0 + $0x1a] sm:$0x3] }
   0x2   :  { %7 = vst [vmem:[#allocation0 + $0x48] sm:$0x3] %v128_v0  ;;  %v131_v3 = vld [vmem:[%s264_s0 + $0x18] sm:$0x3]  ;;  %v132_v4 = vld [vmem:[%s264_s0 + $0x16] sm:$0x3] }
   0x3   :  { %11 = vst [vmem:[#allocation0 + $0x78] sm:$0x3] %v129_v1  ;;  %v133_v5 = vld [vmem:[%s264_s0 + $0x14] sm:$0x3]  ;;  %v134_v6 = vld [vmem:[%s264_s0 + $0x12] sm:$0x3] }
   0x4   :  { %15 = vst [vmem:[#allocation0 + $0x20] sm:$0x3] %v130_v2  ;;  %v135_v7 = vld [vmem:[%s264_s0 + $0x10] sm:$0x3]  ;;  %v136_v8 = vld [vmem:[%s264_s0 + $0xe] sm:$0x3] }
   0x5   :  { %19 = vst [vmem:[#allocation0 + $0x60] sm:$0x3] %v131_v3  ;;  %v137_v9 = vld [vmem:[%s264_s0 + $0xc] sm:$0x3]  ;;  %v138_v10 = vld [vmem:[%s264_s0 + $0xa] sm:$0x3] }
   0x6   :  { %23 = vst [vmem:[#allocation0 + $0x28] sm:$0x3] %v132_v4  ;;  %v139_v11 = vld [vmem:[%s264_s0 + $0x8] sm:$0x3]  ;;  %v140_v12 = vld [vmem:[%s264_s0 + $0x6] sm:$0x3] }
   0x7   :  { %27 = vst [vmem:[#allocation0 + $0x10] sm:$0x3] %v133_v5  ;;  %v141_v13 = vld [vmem:[%s264_s0 + $0x4] sm:$0x3]  ;;  %v142_v14 = vld [vmem:[%s264_s0 + $0x2] sm:$0x3] }
   0x8   :  { %31 = vst [vmem:[#allocation0 + $0x70] sm:$0x3] %v134_v6  ;;  %v64_v15 = vld [vmem:[%s264_s0] sm:$0x3] }
   0x9   :  { %35 = vst [vmem:[#allocation0 + $0x30] sm:$0x3] %v135_v7  ;;  %v125_v31 = vld [vmem:[#allocation0 + $0x48] sm:$0x3]  }
   0xa   :  { %39 = vst [vmem:[#allocation0 + $0x38] sm:$0x3] %v136_v8  ;;  %v121_v30 = vld [vmem:[#allocation0 + $0x78] sm:$0x3]  }
   0xb   :  { %43 = vst [vmem:[#allocation0 + $0x58] sm:$0x3] %v137_v9  ;;  %v117_v29 = vld [vmem:[#allocation0 + $0x20] sm:$0x3]  }
   0xc   :  { %47 = vst [vmem:[#allocation0 + $0x68] sm:$0x3] %v138_v10  ;;  %v113_v28 = vld [vmem:[#allocation0 + $0x60] sm:$0x3]  }
   0xd   :  { %51 = vst [vmem:[#allocation0 + $0x40] sm:$0x3] %v139_v11  ;;  %v109_v27 = vld [vmem:[#allocation0 + $0x28] sm:$0x3]  }
   0xe   :  { %55 = vst [vmem:[#allocation0 + $0x18] sm:$0x3] %v140_v12  ;;  %v105_v26 = vld [vmem:[#allocation0 + $0x10] sm:$0x3]  }
   0xf   :  { %59 = vst [vmem:[#allocation0 + $0x8] sm:$0x3] %v141_v13  ;;  %v101_v25 = vld [vmem:[#allocation0 + $0x70] sm:$0x3]  }
  0x10   :  { %63 = vst [vmem:[#allocation0] sm:$0x3] %v142_v14  ;;  %v97_v23 = vld [vmem:[#allocation0 + $0x30] sm:$0x3]  }
  0x11   :  { %65 = vst [vmem:[#allocation0 + $0x50] sm:$0x3] %v64_v15  ;;  %v93_v16 = vld [vmem:[#allocation0 + $0x38] sm:$0x3]  }
  0x12   :  { %v89_v17 = vld [vmem:[#allocation0 + $0x58] sm:$0x3]   ;;  %149 = vst [vmem:[%s265_s1 + $0xe] sm:$0x3] %v93_v16  }
  0x13   :  { %v85_v18 = vld [vmem:[#allocation0 + $0x68] sm:$0x3]   ;;  %148 = vst [vmem:[%s265_s1 + $0x6] sm:$0x3] %v89_v17  }
  0x14   :  { %v81_v19 = vld [vmem:[#allocation0 + $0x40] sm:$0x3]   ;;  %147 = vst [vmem:[%s265_s1 + $0xc] sm:$0x3] %v85_v18  }
  0x15   :  { %v77_v20 = vld [vmem:[#allocation0 + $0x18] sm:$0x3]   ;;  %146 = vst [vmem:[%s265_s1 + $0x4] sm:$0x3] %v81_v19  }
  0x16   :  { %v73_v21 = vld [vmem:[#allocation0 + $0x8] sm:$0x3]   ;;  %145 = vst [vmem:[%s265_s1 + $0xa] sm:$0x3] %v77_v20  }
  0x17   :  { %v69_v22 = vld [vmem:[#allocation0] sm:$0x3]   ;;  %144 = vst [vmem:[%s265_s1 + $0x2] sm:$0x3] %v73_v21  }
  0x18   :  { %v66_v24 = vld [vmem:[#allocation0 + $0x50] sm:$0x3]   ;;  %143 = vst [vmem:[%s265_s1 + $0x8] sm:$0x3] %v69_v22  }
  0x19   :  { %67 = vst [vmem:[%s265_s1] sm:$0x3] %v66_v24  }
  0x1a   :  { %150 = vst [vmem:[%s265_s1 + $0x10] sm:$0x3] %v97_v23  }
  0x1b   :  { %151 = vst [vmem:[%s265_s1 + $0x18] sm:$0x3] %v101_v25  }
  0x1c   :  { %152 = vst [vmem:[%s265_s1 + $0x12] sm:$0x3] %v105_v26  }
  0x1d   :  { %153 = vst [vmem:[%s265_s1 + $0x1a] sm:$0x3] %v109_v27  }
  0x1e   :  { %154 = vst [vmem:[%s265_s1 + $0x14] sm:$0x3] %v113_v28  }
  0x1f   :  { %155 = vst [vmem:[%s265_s1 + $0x1c] sm:$0x3] %v117_v29  }
  0x20   :  { %156 = vst [vmem:[%s265_s1 + $0x16] sm:$0x3] %v121_v30  }
  0x21   :  { %157 = vst [vmem:[%s265_s1 + $0x1e] sm:$0x3] %v125_v31  }

// kernel: tile.13
= control target key start
LH: loop header
LB: loop body
LE: loop exit
PB: predicated region body
PF: predicated region fallthrough
CT: control target
= control target key end

     0   :  { %s118_s0 = inlined_call_operand.vmem [shape: f32[2,32], index: 0, kind: input, shape index: {}]   ;;  %s119_s1 = inlined_call_operand.vmem [shape: f32[8,2,8,32], index: 1, kind: output, shape index: {}]  }
   0x1   :  { %v4_v0 = vld [vmem:[%s118_s0] ss:$0 sm:$0xff]  ;;  %v45_v1 = vld [vmem:[%s118_s0 + $0x1] ss:$0 sm:$0xff] }
   0x2   :  { %5 = vst [vmem:[%s119_s1] sm:$0xff] %v4_v0 }
   0x3   :  { %38 = vst [vmem:[%s119_s1 + $0x10] sm:$0xff] %v4_v0 }
   0x4   :  { %39 = vst [vmem:[%s119_s1 + $0x20] sm:$0xff] %v4_v0 }
   0x5   :  { %40 = vst [vmem:[%s119_s1 + $0x30] sm:$0xff] %v4_v0 }
   0x6   :  { %41 = vst [vmem:[%s119_s1 + $0x40] sm:$0xff] %v4_v0 }
   0x7   :  { %42 = vst [vmem:[%s119_s1 + $0x50] sm:$0xff] %v4_v0 }
   0x8   :  { %43 = vst [vmem:[%s119_s1 + $0x60] sm:$0xff] %v4_v0 }
   0x9   :  { %44 = vst [vmem:[%s119_s1 + $0x70] sm:$0xff] %v4_v0 }
   0xa   :  { %46 = vst [vmem:[%s119_s1 + $0x8] sm:$0xff] %v45_v1 }
   0xb   :  { %47 = vst [vmem:[%s119_s1 + $0x18] sm:$0xff] %v45_v1 }
   0xc   :  { %48 = vst [vmem:[%s119_s1 + $0x28] sm:$0xff] %v45_v1 }
   0xd   :  { %49 = vst [vmem:[%s119_s1 + $0x38] sm:$0xff] %v45_v1 }
   0xe   :  { %50 = vst [vmem:[%s119_s1 + $0x48] sm:$0xff] %v45_v1 }
   0xf   :  { %51 = vst [vmem:[%s119_s1 + $0x58] sm:$0xff] %v45_v1 }
  0x10   :  { %52 = vst [vmem:[%s119_s1 + $0x68] sm:$0xff] %v45_v1 }
  0x11   :  { %53 = vst [vmem:[%s119_s1 + $0x78] sm:$0xff] %v45_v1 }

// kernel: tile.14
= control target key start
LH: loop header
LB: loop body
LE: loop exit
PB: predicated region body
PF: predicated region fallthrough
CT: control target
= control target key end

     0   :  { %vm48_vm0 = vcmask 1047556   ;;  %s227_s14 = smov 96   ;;  %s228_s27 = smov 64   ;;  %vm3_vm1 = vcmask 261120   ;;  %vm52_vm2 = vcmask 1048320   ;;  %vm95_vm3 = vcmask 785920   ;;  %s444_s0 = inlined_call_operand.vmem [shape: f32[8,2,8,32], index: 0, kind: input, shape index: {}]   ;;  %s445_s1 = inlined_call_operand.vmem [shape: f32[16,256], index: 1, kind: output, shape index: {}]  }
   0x1   :  { %v196_v0 = vld [vmem:[%s444_s0 + $0x43] ss:$8 sm:$0xf]   ;;  %v199_v6 = vld [vmem:[%s444_s0 + $0x47] ss:$8 sm:$0xf]  }
   0x2   :  { %v197_v1 = vld [vmem:[%s444_s0 + $0x43] ss:$8 sm:$0xf0]   ;;  %v200_v7 = vld [vmem:[%s444_s0 + $0x47] ss:$8 sm:$0xf0]  }
   0x3   :  { %v70_v2 = vsel %vm48_vm0, %v197_v1, %v196_v0  ;;  %v191_v3 = vld [vmem:[%s444_s0 + $0x3] ss:$8 sm:$0xf]   ;;  %v193_v8 = vld [vmem:[%s444_s0 + $0x7] ss:$8 sm:$0xf]   ;;  %v81_v12 = vsel %vm48_vm0, %v200_v7, %v199_v6 }
   0x4   :  { %v192_v4 = vld [vmem:[%s444_s0 + $0x3] ss:$8 sm:$0xf0]   ;;  %71 = vrot.lane.b32.xlu1 %v70_v2, %s227_s14  ;;  %v194_v9 = vld [vmem:[%s444_s0 + $0x7] ss:$8 sm:$0xf0]  }
   0x5   :  { %v49_v5 = vsel %vm48_vm0, %v192_v4, %v191_v3  ;;  %v202_v10 = vld [vmem:[%s444_s0 + $0x2] ss:$8 sm:$0xf]   ;;  %v59_v14 = vsel %vm48_vm0, %v194_v9, %v193_v8  ;;  %v204_v15 = vld [vmem:[%s444_s0 + $0x6] ss:$8 sm:$0xf]  }
   0x6   :  { %50 = vrot.lane.b32.xlu0 %v49_v5, %s227_s14  ;;  %v203_v11 = vld [vmem:[%s444_s0 + $0x2] ss:$8 sm:$0xf0]   ;;  %v205_v16 = vld [vmem:[%s444_s0 + $0x6] ss:$8 sm:$0xf0]  }
   0x7   :  { %v92_v13 = vsel %vm48_vm0, %v203_v11, %v202_v10  ;;  %v210_v17 = vld [vmem:[%s444_s0 + $0x46] ss:$8 sm:$0xf]   ;;  %v207_v19 = vld [vmem:[%s444_s0 + $0x42] ss:$8 sm:$0xf]   ;;  %v102_v21 = vsel %vm48_vm0, %v205_v16, %v204_v15 }
   0x8   :  { %93 = vrot.lane.b32.xlu2 %v92_v13, %s228_s27  ;;  %v211_v18 = vld [vmem:[%s444_s0 + $0x46] ss:$8 sm:$0xf0]   ;;  %v208_v20 = vld [vmem:[%s444_s0 + $0x42] ss:$8 sm:$0xf0]  }
   0x9   :  { %v124_v22 = vsel %vm48_vm0, %v211_v18, %v210_v17  ;;  %v113_v23 = vsel %vm48_vm0, %v208_v20, %v207_v19  ;;  %v213_v24 = vld [vmem:[%s444_s0 + $0x1] ss:$8 sm:$0xf]   ;;  %v215_v28 = vld [vmem:[%s444_s0 + $0x5] ss:$8 sm:$0xf]  }
   0xa   :  { %v214_v25 = vld [vmem:[%s444_s0 + $0x1] ss:$8 sm:$0xf0]   ;;  %v216_v29 = vld [vmem:[%s444_s0 + $0x5] ss:$8 sm:$0xf0]  }
   0xb   :  { %v218_v26 = vld [vmem:[%s444_s0 + $0x41] ss:$8 sm:$0xf]   ;;  %v135_v30 = vsel %vm48_vm0, %v214_v25, %v213_v24  ;;  %v145_v32 = vsel %vm48_vm0, %v216_v29, %v215_v28  ;;  %s229_s23 = smov 32   ;;  %v2_v36 = vld [vmem:[%s444_s0] ss:$4 sm:$0xff]  }
   0xc   :  { %82 = vrot.lane.b32.xlu1 %v81_v12, %s227_s14  ;;  %v219_v27 = vld [vmem:[%s444_s0 + $0x41] ss:$8 sm:$0xf0]   ;;  %v221_v33 = vld [vmem:[%s444_s0 + $0x45] ss:$8 sm:$0xf]  }
   0xd   :  { %v156_v31 = vsel %vm48_vm0, %v219_v27, %v218_v26  ;;  %v222_v34 = vld [vmem:[%s444_s0 + $0x45] ss:$8 sm:$0xf0]   ;;  %4 = vst.msk [vmem:[%s445_s1] ss:$8 sm:$0x3] %vm3_vm1, %v2_v36  }
   0xe   :  { %60 = vrot.lane.b32.xlu0 %v59_v14, %s227_s14  ;;  %v167_v35 = vsel %vm48_vm0, %v222_v34, %v221_v33  ;;  %173 = vst.msk [vmem:[%s445_s1 - $0xf] ss:$8 sm:$0xc] %vm3_vm1, %v2_v36   ;;  %v176_v37 = vld [vmem:[%s444_s0 + $0x20] ss:$4 sm:$0xff]   ;;  %vm138_vm4 = vcmask 523520  }
   0xf   :  { %174 = vst.msk [vmem:[%s445_s1 - $0x1e] ss:$8 sm:$0x30] %vm3_vm1, %v2_v36   ;;  %v181_v38 = vld [vmem:[%s444_s0 + $0x40] ss:$4 sm:$0xff]  }
  0x10   :  { %103 = vrot.lane.b32.xlu2 %v102_v21, %s228_s27  ;;  %175 = vst.msk [vmem:[%s445_s1 - $0x2d] ss:$8 sm:$0xc0] %vm3_vm1, %v2_v36   ;;  %v186_v39 = vld [vmem:[%s444_s0 + $0x60] ss:$4 sm:$0xff]  }
  0x11   :  { %177 = vst.msk [vmem:[%s445_s1 + $0x4] ss:$8 sm:$0x3] %vm3_vm1, %v176_v37  }
  0x12   :  { %178 = vst.msk [vmem:[%s445_s1 - $0xb] ss:$8 sm:$0xc] %vm3_vm1, %v176_v37  }
  0x13   :  { %179 = vst.msk [vmem:[%s445_s1 - $0x1a] ss:$8 sm:$0x30] %vm3_vm1, %v176_v37  }
  0x14   :  { %125 = vrot.lane.b32.xlu1 %v124_v22, %s228_s27  ;;  %180 = vst.msk [vmem:[%s445_s1 - $0x29] ss:$8 sm:$0xc0] %vm3_vm1, %v176_v37  }
  0x15   :  { %182 = vst.msk [vmem:[%s445_s1 + $0x10] ss:$8 sm:$0x3] %vm3_vm1, %v181_v38  }
  0x16   :  { %114 = vrot.lane.b32.xlu0 %v113_v23, %s228_s27  ;;  %183 = vst.msk [vmem:[%s445_s1 + $0x1] ss:$8 sm:$0xc] %vm3_vm1, %v181_v38  }
  0x17   :  { %184 = vst.msk [vmem:[%s445_s1 - $0xe] ss:$8 sm:$0x30] %vm3_vm1, %v181_v38  }
  0x18   :  { %136 = vrot.lane.b32.xlu2 %v135_v30, %s229_s23  ;;  %185 = vst.msk [vmem:[%s445_s1 - $0x1d] ss:$8 sm:$0xc0] %vm3_vm1, %v181_v38  }
  0x19   :  { %187 = vst.msk [vmem:[%s445_s1 + $0x14] ss:$8 sm:$0x3] %vm3_vm1, %v186_v39  }
  0x1a   :  { %188 = vst.msk [vmem:[%s445_s1 + $0x5] ss:$8 sm:$0xc] %vm3_vm1, %v186_v39  }
  0x1b   :  { %189 = vst.msk [vmem:[%s445_s1 - $0xa] ss:$8 sm:$0x30] %vm3_vm1, %v186_v39  }
  0x1c   :  { %157 = vrot.lane.b32.xlu1 %v156_v31, %s229_s23  ;;  %190 = vst.msk [vmem:[%s445_s1 - $0x19] ss:$8 sm:$0xc0] %vm3_vm1, %v186_v39  }
  0x1e   :  { %146 = vrot.lane.b32.xlu0 %v145_v32, %s229_s23 }
  0x20   :  { %168 = vrot.lane.b32.xlu2 %v167_v35, %s229_s23 }
  0x62   :  { %v94_v40 = vpop.permute.xlu2 %93  }
  0x6a   :  { %v104_v41 = vpop.permute.xlu2 %103  }
  0x72   :  { %v137_v42 = vpop.permute.xlu2 %136  }
  0x76   :  { %v72_v43 = vpop.permute.xlu1 %71  }
  0x77   :  { %198 = vst.msk [vmem:[%s445_s1 + $0x10] sm:$0xff] %vm52_vm2, %v72_v43  }
  0x78   :  { %v51_v44 = vpop.permute.xlu0 %50  }
  0x79   :  { %53 = vst.msk [vmem:[%s445_s1] sm:$0xff] %vm52_vm2, %v51_v44  }
  0x7a   :  { %96 = vst.msk [vmem:[%s445_s1] sm:$0xff] %vm95_vm3, %v94_v40   ;;  %v169_v45 = vpop.permute.xlu2 %168  }
  0x7b   :  { %139 = vst.msk [vmem:[%s445_s1] sm:$0xff] %vm138_vm4, %v137_v42  }
  0x7e   :  { %v83_v46 = vpop.permute.xlu1 %82  }
  0x7f   :  { %201 = vst.msk [vmem:[%s445_s1 + $0x18] sm:$0xff] %vm52_vm2, %v83_v46  }
  0x80   :  { %v61_v47 = vpop.permute.xlu0 %60  }
  0x81   :  { %195 = vst.msk [vmem:[%s445_s1 + $0x8] sm:$0xff] %vm52_vm2, %v61_v47  }
  0x82   :  { %206 = vst.msk [vmem:[%s445_s1 + $0x8] sm:$0xff] %vm95_vm3, %v104_v41  }
  0x86   :  { %v126_v48 = vpop.permute.xlu1 %125  }
  0x87   :  { %212 = vst.msk [vmem:[%s445_s1 + $0x18] sm:$0xff] %vm95_vm3, %v126_v48  }
  0x88   :  { %v115_v49 = vpop.permute.xlu0 %114   ;;  %223 = vst.msk [vmem:[%s445_s1 + $0x18] sm:$0xff] %vm138_vm4, %v169_v45  }
  0x89   :  { %209 = vst.msk [vmem:[%s445_s1 + $0x10] sm:$0xff] %vm95_vm3, %v115_v49  }
  0x8e   :  { %v158_v50 = vpop.permute.xlu1 %157  }
  0x8f   :  { %220 = vst.msk [vmem:[%s445_s1 + $0x10] sm:$0xff] %vm138_vm4, %v158_v50  }
  0x90   :  { %v147_v51 = vpop.permute.xlu0 %146  }
  0x91   :  { %217 = vst.msk [vmem:[%s445_s1 + $0x8] sm:$0xff] %vm138_vm4, %v147_v51  }

// kernel: agent_decoder_forward.1
= control target key start
LH: loop header
LB: loop body
LE: loop exit
PB: predicated region body
PF: predicated region fallthrough
CT: control target
= control target key end

     0   :  { %s7842_s0 = inlined_call_operand.vmem [shape: f32[34,256], index: 0, kind: input, shape index: {}]   ;;  %s7843_s1 = inlined_call_operand.vmem [shape: f32[32,256], index: 1, kind: input, shape index: {}]   ;;  %s7844_s2 = inlined_call_operand.vmem [shape: f32[128,34], index: 2, kind: input, shape index: {}]   ;;  %s7845_s3 = inlined_call_operand.vmem [shape: f32[128,1], index: 3, kind: input, shape index: {}]   ;;  %s7846_s4 = inlined_call_operand.vmem [shape: f32[128,32], index: 4, kind: input, shape index: {}]   ;;  %s7847_s5 = inlined_call_operand.vmem [shape: f32[128,1], index: 5, kind: input, shape index: {}]   ;;  %s7848_s6 = inlined_call_operand.vmem [shape: f32[16,256], index: 6, kind: input, shape index: {}]   ;;  %s7849_s7 = inlined_call_operand.vmem [shape: f32[16,256], index: 7, kind: input, shape index: {}]   ;;  %s7850_s8 = inlined_call_operand.vmem [shape: f32[16,256], index: 8, kind: output, shape index: {0}]   ;;  %s7851_s9 = inlined_call_operand.hbm [shape: f32[32,256], index: 9, kind: output, shape index: {1}]  }
   0x1   :  { %7913 = sst [smem:[#allocation39_spill]] %s7842_s0 }
   0x2   :  { %7914 = sst [smem:[#allocation40_spill]] %s7843_s1 }
   0x3   :  { %15 = vsyncpa [#allocation8], 0 }
   0x4   :  { %17 = vsyncpa [#allocation8 + $0x1], 0  ;;  %s4679_s30 = smov 0   ;;  %s4681_s10 = smov 0  }
   0x5   :  { %s4683_s11 = smov 0   ;;  %s4685_s12 = smov 0  }
   0x6 LB: > { %s4700_s13 = sadd.s32 4294967295, %s4623_s12   ;;  %s3701_s14 = sadd.s32 4294967294, %s4623_s12   ;;  %s4623_s12 = sphi %s4685_s12, %s8174_s12   ;;  %s4619_s11 = sphi %s4683_s11, %s8173_s11   ;;  %s4615_s10 = sphi %s4681_s10, %s8172_s10   ;;  %s4611_s30 = sphi %s4679_s30, %s8171_s30  }
   0x7   : > { %s4704_s15 = sadd.s32 1, %s4623_s12   ;;  %s30_s16 = sadd.s32 1, %s4619_s11 }
   0x8   : > { %s27_s17 = ssub.s32 %s4623_s12, %s4704_s15  ;;  %p37_p0 = scmp.ne.s32.totalorder %s4619_s11, %s4615_s10 }
   0x9   : > { %p28_p1 = scmp.eq.s32.totalorder %s27_s17, 0  ;;  %p38_p2 = scmp.eq.s32.totalorder %s4623_s12, 0 }
   0xa   : > { %p224_p3 = scmp.eq.s32.totalorder %s4700_s13, 1  ;;  %p255_p4 = scmp.ne.s32.totalorder %s4615_s10, %s4611_s30 }
   0xb   : > { %s4716_s18 = scalar_select %p28_p1, %s4619_s11, %s30_s16  }
   0xc   : > { %p4718_p5 = por %p38_p2, %p37_p0  ;;  %p4722_p6 = por %p224_p3, %p37_p0 }
   0xd   : > { %p256_p7 = scmp.eq.s32.totalorder %s3701_s14, 1  ;;  %p3703_p9 = scmp.ge.s32.totalorder %s4623_s12, 2 }
   0xf   : > { %p4726_p8 = por %p256_p7, %p255_p4  ;;  %287 = sbr.rel (%p3703_p9) target bundleno = 55 (0x37), region = 36 }
  0x14   : > { %290 = sbr.rel (!%p4718_p5) target bundleno = 35 (0x23), region = 40  ;;  %s292_s22 = sand.u32 (%p4718_p5), 1, %s4619_s11  }
  0x15   : > { %s3704_s23 = sshll.u32 (%p4718_p5), %s4623_s12, 3  ;;  %s3953_s24 = smul.u32 (%p4718_p5), 40, %s292_s22 }
  0x16   : > { %s7918_s0 = sld [smem:[#allocation39_spill]] (%p4718_p5) }
  0x17   : > { %s294_s28 = scalar_lea.vmem (%p4718_p5), [#allocation3], %s3953_s24 }
  0x1c   : > { %s296_s27 = scalar_lea.vmem %s7918_s0, %s3704_s23 }
  0x1d   : > { %v333_v0 = vld [vmem:[%s296_s27] sm:$0xff]  ;;  %v335_v1 = vld [vmem:[%s296_s27 + $0x10] sm:$0xff] }
  0x1e   : > { %v337_v2 = vld [vmem:[%s296_s27 + $0x20] sm:$0xff]  ;;  %334 = vst [vmem:[%s294_s28] sm:$0xff] %v333_v0  ;;  %v339_v3 = vld [vmem:[%s296_s27 + $0x30] sm:$0xff] }
  0x1f   : > { %336 = vst [vmem:[%s294_s28 + $0x8] sm:$0xff] %v335_v1  ;;  %v341_v4 = vld [vmem:[%s296_s27 + $0x40] sm:$0xff] }
  0x20   : > { %338 = vst [vmem:[%s294_s28 + $0x10] sm:$0xff] %v337_v2 }
  0x21   : > { %340 = vst [vmem:[%s294_s28 + $0x18] sm:$0xff] %v339_v3 }
  0x22   : > { %342 = vst [vmem:[%s294_s28 + $0x20] sm:$0xff] %v341_v4 }
  0x23 PF: > { %348 = sbr.rel (!%p4718_p5) target bundleno = 49 (0x31), region = 78  ;;  %s350_s29 = sand.u32 (%p4718_p5), 1, %s4619_s11  }
  0x24   : > { %s3706_s14 = sshll.u32 (%p4718_p5), %s4623_s12, 3  ;;  %s3705_s16 = sshll.u32 (%p4718_p5), %s350_s29, 5 }
  0x25   : > { %s7919_s1 = sld [smem:[#allocation40_spill]] (%p4718_p5)  ;;  %s352_s24 = scalar_lea.vmem (%p4718_p5), [#allocation4], %s3705_s16 }
  0x2b   : > { %s354_s23 = scalar_lea.vmem %s7919_s1, %s3706_s14 }
  0x2c   : > { %v389_v5 = vld [vmem:[%s354_s23] sm:$0xff]  ;;  %v391_v6 = vld [vmem:[%s354_s23 + $0x10] sm:$0xff] }
  0x2d   : > { %v393_v7 = vld [vmem:[%s354_s23 + $0x20] sm:$0xff]  ;;  %390 = vst [vmem:[%s352_s24] sm:$0xff] %v389_v5  ;;  %v395_v8 = vld [vmem:[%s354_s23 + $0x30] sm:$0xff] }
  0x2e   : > { %392 = vst [vmem:[%s352_s24 + $0x8] sm:$0xff] %v391_v6 }
  0x2f   : > { %394 = vst [vmem:[%s352_s24 + $0x10] sm:$0xff] %v393_v7 }
  0x30   : > { %396 = vst [vmem:[%s352_s24 + $0x18] sm:$0xff] %v395_v8 }
  0x31 PF: > { %402 = sbr.rel (!%p4718_p5) target bundleno = 55 (0x37), region = 116  ;;  %s404_s25 = sand.u32 (%p4718_p5), 1, %s4619_s11  }
  0x32   : > { %s3708_s26 = sshll.u32 (%p4718_p5), %s4623_s12, 3  ;;  %s3707_s27 = sshll.u32 (%p4718_p5), %s404_s25, 4 }
  0x33   : > { %s408_s14 = scalar_lea.vmem (%p4718_p5), %s7849_s7, %s3708_s26  ;;  %s406_s16 = scalar_lea.vmem (%p4718_p5), [#allocation5], %s3707_s27 }
  0x34   : > { %v439_v9 = vld [vmem:[%s408_s14] sm:$0xff] (%p4718_p5)  ;;  %v441_v10 = vld [vmem:[%s408_s14 + $0x10] sm:$0xff] (%p4718_p5) }
  0x35   : > { %440 = vst [vmem:[%s406_s16] sm:$0xff] (%p4718_p5), %v439_v9 }
  0x36   : > { %442 = vst [vmem:[%s406_s16 + $0x8] sm:$0xff] %v441_v10 }
  0x37 PF: > { %p3709_p10 = scmp.ge.s32.totalorder %s4623_s12, 1  ;;  %p447_p11 = scmp.lt.s32.totalorder %s4623_s12, 3 }
  0x39   : > { %p448_p12 = pnand %p3709_p10, %p447_p11 }
  0x3b   : > { %451 = sbr.rel (%p448_p12) target bundleno = 2556 (0x9fc), region = 154 }
  0x40   : > { %s4757_s19 = sand.u32 1, %s4615_s10   ;;  %v534_v11 = vld [vmem:[%s7845_s3 + $0x18] sm:$0xff]  ;;  %v4625_v12 = vmov 0   ;;  %vm793_vm0 = vcmask 1041408   ;;  %v533_v16 = vld [vmem:[%s7845_s3 + $0x10] sm:$0xff]  ;;  %v723_v20 = vld [vmem:[%s7844_s2] sm:$0xff] }
  0x41   : > { %s3954_s23 = smul.u32 40, %s4757_s19  ;;  %3998 = vset.pattern.permute.xlu0 %v4625_v12  ;;  %3999 = vset.pattern.permute.xlu1 %v4625_v12  ;;  %v538_v17 = vld [vmem:[%s7845_s3 + $0x38] sm:$0xff]  ;;  %vm744_vm1 = vcmask 277504   ;;  %v537_v21 = vld [vmem:[%s7845_s3 + $0x30] sm:$0xff]  ;;  %v531_v22 = vld [vmem:[%s7845_s3] sm:$0xff]  ;;  %s3710_s16 = sshll.u32 %s4757_s19, 5 }
  0x42   : > { %564 = vperm.xlu0 %3998, %v534_v11   ;;  %4000 = vset.pattern.permute.xlu2 %v4625_v12  ;;  %v724_v23 = vld [vmem:[%s7844_s2 + $0x8] sm:$0xff]  ;;  %v535_v24 = vld [vmem:[%s7845_s3 + $0x20] sm:$0xff]  ;;  %v725_v26 = vld [vmem:[%s7844_s2 + $0x10] sm:$0xff]  ;;  %s463_s17 = scalar_lea.vmem [#allocation4], %s3710_s16  ;;  %s7743_s14 = scalar_lea.vmem [#allocation7], %s3710_s16 }
  0x43   : > { %s456_s24 = scalar_lea.vmem [#allocation3], %s3954_s23  ;;  %559 = vperm.xlu1 %3999, %v533_v16   ;;  %v532_v25 = vld [vmem:[%s7845_s3 + $0x8] sm:$0xff]  ;;  %v545_v27 = vld [vmem:[%s7845_s3 + $0x70] sm:$0xff]  ;;  %v726_v29 = vld [vmem:[%s7844_s2 + $0x18] sm:$0xff]  ;;  %s3711_s28 = sshll.u32 %s4757_s19, 4 }
  0x44   : > { %v743_v13 = vld [vmem:[%s456_s24 + $0x20] sm:$0x3]  ;;  %v742_v14 = vld [vmem:[%s456_s24 + $0x18] sm:$0xff]  ;;  %v741_v15 = vld [vmem:[%s456_s24 + $0x10] sm:$0xff]  ;;  %554 = vperm.xlu2 %4000, %v532_v25   ;;  %s470_s29 = scalar_lea.vmem [#allocation5], %s3711_s28  ;;  %s507_s16 = scalar_lea.vmem [#allocation6], %s3711_s28 }
  0x45   : > { %3714 = vmatpush.msk.msra.mxu0 %vm793_vm0, %v743_v13  ;;  %v740_v18 = vld [vmem:[%s456_s24 + $0x8] sm:$0xff]  ;;  %v739_v19 = vld [vmem:[%s456_s24] sm:$0xff]  ;;  %v542_v30 = vld [vmem:[%s7845_s3 + $0x58] sm:$0xff]  ;;  %s3941_s22 = sshll.u32 (%p4722_p6), %s4700_s13, 3 }
  0x46   : > { %v544_v28 = vld [vmem:[%s7845_s3 + $0x68] sm:$0xff]  ;;  %v541_v31 = vld [vmem:[%s7845_s3 + $0x50] sm:$0xff]  ;;  %v727_v32 = vld [vmem:[%s7844_s2 + $0x20] sm:$0xff]  ;;  %s3521_s25 = scalar_lea.vmem (%p4722_p6), %s7850_s8, %s3941_s22 }
  0x47   : > { %809 = vmatpush.msra.mxu0 %v742_v14  ;;  %v539_v33 = vld [vmem:[%s7845_s3 + $0x40] sm:$0xff]  ;;  %v630_v34 = vld [vmem:[%s7847_s5 + $0x18] sm:$0xff]  ;;  %v728_v35 = vld [vmem:[%s7844_s2 + $0x28] sm:$0xff] }
  0x48   : > { %v536_v36 = vld [vmem:[%s7845_s3 + $0x28] sm:$0xff]  ;;  %v629_v37 = vld [vmem:[%s7847_s5 + $0x10] sm:$0xff]  ;;  %v546_v40 = vld [vmem:[%s7845_s3 + $0x78] sm:$0xff] }
  0x49   : > { %810 = vmatpush.msra.mxu0 %v741_v15  ;;  %v633_v38 = vld [vmem:[%s7847_s5 + $0x30] sm:$0xff]  ;;  %v632_v41 = vld [vmem:[%s7847_s5 + $0x28] sm:$0xff]  ;;  %v627_v42 = vld [vmem:[%s7847_s5] sm:$0xff] }
  0x4a   : > { %584 = vperm.xlu0 %3998, %v538_v17   ;;  %v729_v39 = vld [vmem:[%s7844_s2 + $0x30] sm:$0xff]  ;;  %v730_v43 = vld [vmem:[%s7844_s2 + $0x38] sm:$0xff]  ;;  %v543_v44 = vld [vmem:[%s7845_s3 + $0x60] sm:$0xff] }
  0x4b   : > { %811 = vmatpush.msra.mxu0 %v740_v18  ;;  %579 = vperm.xlu1 %3999, %v537_v21   ;;  %v642_v45 = vld [vmem:[%s7847_s5 + $0x78] sm:$0xff]  ;;  %v641_v46 = vld [vmem:[%s7847_s5 + $0x70] sm:$0xff]  ;;  %v731_v47 = vld [vmem:[%s7844_s2 + $0x40] sm:$0xff] }
  0x4c   : > { %574 = vperm.xlu2 %4000, %v536_v36   ;;  %v540_v48 = vld [vmem:[%s7845_s3 + $0x48] sm:$0xff]  ;;  %v639_v49 = vld [vmem:[%s7847_s5 + $0x60] sm:$0xff]  ;;  %v638_v50 = vld [vmem:[%s7847_s5 + $0x58] sm:$0xff] }
  0x4d   : > { %812 = vmatpush.msra.mxu0 %v739_v19  ;;  %v732_v51 = vld [vmem:[%s7844_s2 + $0x48] sm:$0xff]  ;;  %v634_v52 = vld [vmem:[%s7847_s5 + $0x38] sm:$0xff]  ;;  %v635_v54 = vld [vmem:[%s7847_s5 + $0x40] sm:$0xff] }
  0x4e   : > { %3715 = vmatmul.msk.f32.vlgmr.msra.gmra.mxu0 %vm744_vm1, %v723_v20  ;;  %v636_v53 = vld [vmem:[%s7847_s5 + $0x48] sm:$0xff]  ;;  %v733_v55 = vld [vmem:[%s7844_s2 + $0x50] sm:$0xff]  ;;  %v734_v57 = vld [vmem:[%s7844_s2 + $0x58] sm:$0xff] }
  0x4f   : > { %v628_v56 = vld [vmem:[%s7847_s5 + $0x8] sm:$0xff]  ;;  %v631_v58 = vld [vmem:[%s7847_s5 + $0x20] sm:$0xff]  ;;  %v637_v62 = vld [vmem:[%s7847_s5 + $0x50] sm:$0xff] }
  0x50   : > { %v735_v59 = vld [vmem:[%s7844_s2 + $0x60] sm:$0xff]  ;;  %v640_v60 = vld [vmem:[%s7847_s5 + $0x68] sm:$0xff]  ;;  %v737_v63 = vld [vmem:[%s7844_s2 + $0x70] sm:$0xff] }
  0x51   : > { %v736_v61 = vld [vmem:[%s7844_s2 + $0x68] sm:$0xff]  ;;  %v738_v0 = vld [vmem:[%s7844_s2 + $0x78] sm:$0xff] }
  0x52   : > { %549 = vperm.xlu0 %3998, %v531_v22  }
  0x53   : > { %569 = vperm.xlu1 %3999, %v535_v24  }
  0x54   : > { %624 = vperm.xlu2 %4000, %v546_v40  }
  0x56   : > { %3716 = vmatmul.msk.f32.gmra.mxu0 %vm744_vm1, %v724_v23 }
  0x5a   : > { %619 = vperm.xlu0 %3998, %v545_v27  }
  0x5b   : > { %614 = vperm.xlu1 %3999, %v544_v28  }
  0x5c   : > { %609 = vperm.xlu2 %4000, %v543_v44  }
  0x5e   : > { %3717 = vmatmul.msk.f32.gmra.mxu0 %vm744_vm1, %v725_v26 }
  0x62   : > { %604 = vperm.xlu0 %3998, %v542_v30  }
  0x63   : > { %599 = vperm.xlu1 %3999, %v541_v31  }
  0x64   : > { %594 = vperm.xlu2 %4000, %v540_v48  }
  0x66   : > { %3718 = vmatmul.msk.f32.gmra.mxu0 %vm744_vm1, %v726_v29 }
  0x6a   : > { %589 = vperm.xlu0 %3998, %v539_v33  }
  0x6b   : > { %660 = vperm.xlu1 %3999, %v630_v34  }
  0x6c   : > { %680 = vperm.xlu2 %4000, %v634_v52  }
  0x6e   : > { %3719 = vmatmul.msk.f32.gmra.mxu0 %vm744_vm1, %v727_v32 }
  0x72   : > { %655 = vperm.xlu0 %3998, %v629_v37  }
  0x73   : > { %675 = vperm.xlu1 %3999, %v633_v38  }
  0x74   : > { %650 = vperm.xlu2 %4000, %v628_v56  }
  0x76   : > { %3720 = vmatmul.msk.f32.gmra.mxu0 %vm744_vm1, %v728_v35 }
  0x7a   : > { %670 = vperm.xlu0 %3998, %v632_v41  }
  0x7b   : > { %645 = vperm.xlu1 %3999, %v627_v42  }
  0x7c   : > { %665 = vperm.xlu2 %4000, %v631_v58  }
  0x7e   : > { %3721 = vmatmul.msk.f32.gmra.mxu0 %vm744_vm1, %v729_v39 }
  0x82   : > { %720 = vperm.xlu0 %3998, %v642_v45  }
  0x83   : > { %715 = vperm.xlu1 %3999, %v641_v46  }
  0x84   : > { %710 = vperm.xlu2 %4000, %v640_v60  }
  0x86   : > { %3722 = vmatmul.msk.f32.gmra.mxu0 %vm744_vm1, %v730_v43 }
  0x8a   : > { %705 = vperm.xlu0 %3998, %v639_v49  }
  0x8b   : > { %700 = vperm.xlu1 %3999, %v638_v50  }
  0x8c   : > { %695 = vperm.xlu2 %4000, %v637_v62  }
  0x8e   : > { %3723 = vmatmul.msk.f32.gmra.mxu0 %vm744_vm1, %v731_v47 }
  0x92   : > { %690 = vperm.xlu0 %3998, %v636_v53  }
  0x93   : > { %685 = vperm.xlu1 %3999, %v635_v54  }
  0x96   : > { %3724 = vmatmul.msk.f32.gmra.mxu0 %vm744_vm1, %v732_v51 }
  0x9e   : > { %3725 = vmatmul.msk.f32.gmra.mxu0 %vm744_vm1, %v733_v55  ;;  %v555_v13 = vpop.permute.xlu2 %554 }
  0xa6   : > { %3726 = vmatmul.msk.f32.gmra.mxu0 %vm744_vm1, %v734_v57  ;;  %v575_v28 = vpop.permute.xlu2 %574 }
  0xae   : > { %3727 = vmatmul.msk.f32.gmra.mxu0 %vm744_vm1, %v735_v59  ;;  %v4936_v44 = vpop.permute.xlu2 %624 }
  0xb4   : > { %v565_v7 = vpop.permute.xlu0 %564 }
  0xb5   : > { %v560_v12 = vpop.permute.xlu1 %559 }
  0xb6   : > { %3728 = vmatmul.msk.f32.gmra.mxu0 %vm744_vm1, %v736_v61  ;;  %v610_v60 = vpop.permute.xlu2 %609 }
  0xbc   : > { %v585_v9 = vpop.permute.xlu0 %584 }
  0xbd   : > { %v580_v19 = vpop.permute.xlu1 %579 }
  0xbe   : > { %3729 = vmatmul.msk.f32.gmra.mxu0 %vm744_vm1, %v737_v63 }
  0xc4   : > { %v550_v11 = vpop.permute.xlu0 %549 }
  0xc5   : > { %v570_v30 = vpop.permute.xlu1 %569 }
  0xc6   : > { %3730 = vmatmul.msk.f32.gmra.mxu0 %vm744_vm1, %v738_v0 }
  0xcb   : > { %v814_v1 = vpop.f32.mrf.mxu0 }
  0xcc   : > { %v815_v15 = vadd.f32 %v814_v1, %v550_v11 }
  0xce   : > { %v3731_v17 = vmul.f32 -1.442695, %v815_v15 }
  0xd0   : > { %4001 = vpow2.f32 %v3731_v17 }
  0xd3   : > { %v817_v2 = vpop.f32.mrf.mxu0 }
  0xd4   : > { %v818_v16 = vadd.f32 %v817_v2, %v555_v13  ;;  %v620_v2 = vpop.permute.xlu0 %619 }
  0xd6   : > { %v3732_v18 = vmul.f32 -1.442695, %v818_v16  ;;  %v4002_v24 = vpop.eup %4001 }
  0xd7   : > { %v4926_v29 = vadd.f32 1.0, %v4002_v24 }
  0xd8   : > { %4003 = vpow2.f32 %v3732_v18 }
  0xd9   : > { %vm903_vm4 = vweird.f32 %v4926_v29 }
  0xdb   : > { %v820_v3 = vpop.f32.mrf.mxu0 }
  0xdc   : > { %v821_v21 = vadd.f32 %v820_v3, %v560_v12  ;;  %v615_v3 = vpop.permute.xlu1 %614 }
  0xde   : > { %v3733_v23 = vmul.f32 -1.442695, %v821_v21  ;;  %v4004_v26 = vpop.eup %4003 }
  0xdf   : > { %v4928_v32 = vadd.f32 1.0, %v4004_v26 }
  0xe0   : > { %4005 = vpow2.f32 %v3733_v23  ;;  %v909_v23 = vand.u32 2147483648, %v4926_v29 }
  0xe1   : > { %v922_v11 = vand.u32 2147483647, %v4928_v32  ;;  %v924_v12 = vand.u32 2147483648, %v4928_v32  ;;  %vm918_vm6 = vweird.f32 %v4928_v32 }
  0xe3   : > { %v823_v4 = vpop.f32.mrf.mxu0  ;;  %vm4999_vm8 = vcmp.eq.f32.partialorder %v922_v11, 8.507059e+37 }
  0xe4   : > { %v824_v22 = vadd.f32 %v823_v4, %v565_v7 }
  0xe6   : > { %v3734_v25 = vmul.f32 -1.442695, %v824_v22  ;;  %v4006_v37 = vpop.eup %4005 }
  0xe7   : > { %v4934_v43 = vadd.f32 1.0, %v4006_v37 }
  0xe8   : > { %4007 = vpow2.f32 %v3734_v25 }
  0xe9   : > { %4009 = vrcp.f32 %v4926_v29  ;;  %v939_v24 = vand.u32 2147483648, %v4934_v43  ;;  %vm933_vm9 = vweird.f32 %v4934_v43 }
  0xea   : > { %4011 = vrcp.f32 %v4928_v32 }
  0xeb   : > { %v826_v5 = vpop.f32.mrf.mxu0 }
  0xec   : > { %v827_v35 = vadd.f32 %v826_v5, %v570_v30  ;;  %v925_v30 = vor.u32 1.1754944e-38, %v924_v12 }
  0xee   : > { %v4008_v41 = vpop.eup %4007  ;;  %v3735_v42 = vmul.f32 -1.442695, %v827_v35 }
  0xef   : > { %v4938_v45 = vpop.eup %4009  ;;  %v4940_v46 = vadd.f32 1.0, %v4008_v41 }
  0xf0   : > { %v4942_v47 = vpop.eup %4011  ;;  %v899_v49 = vmul.f32 %v4938_v45, %v4926_v29  ;;  %vm904_vm2 = vweird.f32 %v4938_v45 }
  0xf1   : > { %v914_v50 = vmul.f32 %v4942_v47, %v4928_v32  ;;  %vm919_vm3 = vweird.f32 %v4942_v47  ;;  %vm4986_vm5 = vmor %vm903_vm4, %vm904_vm2  ;;  %vm948_vm13 = vweird.f32 %v4940_v46 }
  0xf2   : > { %v900_v57 = vsub.f32 1.0, %v899_v49  ;;  %vm4995_vm7 = vmor %vm918_vm6, %vm919_vm3  ;;  %v5023_v49 = vor.u32 1.1754944e-38, %v939_v24 }
  0xf3   : > { %v829_v6 = vpop.f32.mrf.mxu0  ;;  %v915_v58 = vsub.f32 1.0, %v914_v50 }
  0xf4   : > { %v830_v31 = vadd.f32 %v829_v6, %v575_v28  ;;  %v901_v4 = vmul.f32 %v4938_v45, %v900_v57 }
  0xf5   : > { %v916_v5 = vmul.f32 %v4942_v47, %v915_v58 }
  0xf6   : > { %v3736_v36 = vmul.f32 -1.442695, %v830_v31  ;;  %v4976_v15 = vadd.f32 %v4938_v45, %v901_v4 }
  0xf7   : > { %v917_v16 = vadd.f32 %v4942_v47, %v916_v5 }
  0xf8   : > { %4013 = vpow2.f32 %v3736_v36 }
  0xf9   : > { %v921_v35 = vsel %vm4995_vm7, %v4942_v47, %v917_v16  ;;  %v954_v47 = vand.u32 2147483648, %v4940_v46 }
  0xfb   : > { %v832_v8 = vpop.f32.mrf.mxu0 }
  0xfc   : > { %v833_v33 = vadd.f32 %v832_v8, %v580_v19  ;;  %v907_v19 = vand.u32 2147483647, %v4926_v29 }
  0xfe   : > { %v3737_v38 = vmul.f32 -1.442695, %v833_v33  ;;  %v4014_v48 = vpop.eup %4013 }
  0xff   : > { %v4950_v55 = vadd.f32 1.0, %v4014_v48 }
 0x100   : > { %4015 = vpow2.f32 %v3737_v38  ;;  %v937_v38 = vand.u32 2147483647, %v4934_v43 }
 0x101   : > { %vm978_vm3 = vweird.f32 %v4950_v55  ;;  %v984_v26 = vand.u32 2147483648, %v4950_v55 }
 0x102   : > { %vm5063_vm15 = vcmp.eq.f32.partialorder %v937_v38, 8.507059e+37 }
 0x103   : > { %v835_v10 = vpop.f32.mrf.mxu0 }
 0x104   : > { %v836_v34 = vadd.f32 %v835_v10, %v585_v9 }
 0x106   : > { %v3738_v39 = vmul.f32 -1.442695, %v836_v34  ;;  %v4016_v52 = vpop.eup %4015  ;;  %v906_v34 = vsel %vm4986_vm5, %v4938_v45, %v4976_v15 }
 0x107   : > { %v4954_v59 = vadd.f32 1.0, %v4016_v52  ;;  %v5030_v52 = vsel %vm4999_vm8, %v925_v30, %v921_v35 }
 0x108   : > { %4017 = vpow2.f32 %v3738_v39 }
 0x109   : > { %4019 = vpow2.f32 %v3735_v42  ;;  %v605_v42 = vpop.permute.xlu0 %604  ;;  %vm993_vm8 = vweird.f32 %v4954_v59 }
 0x10a   : > { %4021 = vrcp.f32 %v4934_v43 }
 0x10b   : > { %v4920_v14 = vpop.f32.mrf.mxu0  ;;  %4023 = vrcp.f32 %v4940_v46 }
 0x10c   : > { %4025 = vrcp.f32 %v4950_v55 }
 0x10d   : > { %4027 = vrcp.f32 %v4954_v59 }
 0x10e   : > { %v4018_v53 = vpop.eup %4017 }
 0x10f   : > { %v4020_v54 = vpop.eup %4019  ;;  %v4956_v61 = vadd.f32 1.0, %v4018_v53 }
 0x110   : > { %v4952_v56 = vpop.eup %4021  ;;  %v4960_v63 = vadd.f32 1.0, %v4020_v54 }
 0x111   : > { %v4958_v62 = vpop.eup %4023  ;;  %v929_v1 = vmul.f32 %v4952_v56, %v4934_v43  ;;  %4029 = vrcp.f32 %v4956_v61  ;;  %vm934_vm10 = vweird.f32 %v4952_v56  ;;  %v590_v35 = vpop.permute.xlu0 %589 }
 0x112   : > { %v944_v7 = vmul.f32 %v4958_v62, %v4940_v46  ;;  %4031 = vrcp.f32 %v4960_v63  ;;  %v4980_v17 = vpop.eup %4025  ;;  %vm949_vm11 = vweird.f32 %v4958_v62  ;;  %vm5046_vm12 = vmor %vm933_vm9, %vm934_vm10  ;;  %vm963_vm1 = vweird.f32 %v4960_v63 }
 0x113   : > { %v4922_v20 = vpop.f32.mrf.mxu0  ;;  %v930_v10 = vsub.f32 1.0, %v929_v1  ;;  %v4984_v21 = vpop.eup %4027  ;;  %v974_v32 = vmul.f32 %v4980_v17, %v4950_v55  ;;  %v952_v1 = vand.u32 2147483647, %v4940_v46  ;;  %vm5069_vm0 = vmor %vm948_vm13, %vm949_vm11  ;;  %vm979_vm4 = vweird.f32 %v4980_v17  ;;  %v865_v46 = vld [vmem:[%s463_s17 + $0x18] sm:$0xff] }
 0x114   : > { %v945_v18 = vsub.f32 1.0, %v944_v7  ;;  %v989_v37 = vmul.f32 %v4984_v21, %v4954_v59  ;;  %vm994_vm6 = vweird.f32 %v4984_v21  ;;  %vm5112_vm9 = vmor %vm978_vm3, %vm979_vm4  ;;  %vm1008_vm10 = vweird.f32 %v4956_v61 }
 0x115   : > { %v931_v31 = vmul.f32 %v4952_v56, %v930_v10  ;;  %v975_v58 = vsub.f32 1.0, %v974_v32  ;;  %vm5081_vm2 = vcmp.eq.f32.partialorder %v952_v1, 8.507059e+37  ;;  %v982_v32 = vand.u32 2147483647, %v4950_v55  ;;  %vm5124_vm11 = vmor %vm993_vm8, %vm994_vm6 }
 0x116   : > { %v946_v39 = vmul.f32 %v4958_v62, %v945_v18  ;;  %v1012_v55 = vand.u32 2147483647, %v4956_v61 }
 0x117   : > { %v4993_v25 = vpop.eup %4029  ;;  %v5033_v53 = vadd.f32 %v4952_v56, %v931_v31  ;;  %v976_v43 = vmul.f32 %v4980_v17, %v975_v58 }
 0x118   : > { %v5004_v33 = vpop.eup %4031  ;;  %v1004_v48 = vmul.f32 %v4993_v25, %v4956_v61  ;;  %v5040_v5 = vadd.f32 %v4958_v62, %v946_v39  ;;  %vm1009_vm7 = vweird.f32 %v4993_v25 }
 0x119   : > { %v959_v50 = vmul.f32 %v5004_v33, %v4960_v63  ;;  %v936_v10 = vsel %vm5046_vm12, %v4952_v56, %v5033_v53  ;;  %vm964_vm14 = vweird.f32 %v5004_v33  ;;  %vm5139_vm12 = vmor %vm1008_vm10, %vm1009_vm7 }
 0x11a   : > { %v951_v16 = vsel %vm5069_vm0, %v4958_v62, %v5040_v5  ;;  %vm5149_vm13 = vmor %vm963_vm1, %vm964_vm14  ;;  %vm1013_vm0 = vcmp.eq.f32.partialorder %v1012_v55, 8.507059e+37  ;;  %vm908_vm1 = vcmp.eq.f32.partialorder %v907_v19, 8.507059e+37 }
 0x11b   : > { %v4924_v27 = vpop.f32.mrf.mxu0 }
 0x123   : > { %v4932_v40 = vpop.f32.mrf.mxu0 }
 0x12b   : > { %v850_v51 = vpop.f32.mrf.mxu0 }
 0x12c   : > { %v851_v0 = vadd.f32 %v850_v51, %v610_v60  ;;  %v595_v51 = vpop.permute.xlu2 %594  ;;  %v600_v60 = vpop.permute.xlu1 %599 }
 0x12d   : > { %v845_v4 = vadd.f32 %v4924_v27, %v600_v60  ;;  %v960_v27 = vsub.f32 1.0, %v959_v50 }
 0x12e   : > { %v3739_v9 = vmul.f32 -1.442695, %v851_v0  ;;  %v842_v0 = vadd.f32 %v4922_v20, %v595_v51  ;;  %v848_v20 = vadd.f32 %v4932_v40, %v605_v42  ;;  %v997_v51 = vand.u32 2147483647, %v4954_v59 }
 0x12f   : > { %v961_v31 = vmul.f32 %v5004_v33, %v960_v27 }
 0x130   : > { %4033 = vpow2.f32 %v3739_v9  ;;  %v969_v9 = vand.u32 2147483648, %v4960_v63  ;;  %vm998_vm14 = vcmp.eq.f32.partialorder %v997_v51, 8.507059e+37 }
 0x133   : > { %v853_v6 = vpop.f32.mrf.mxu0 }
 0x134   : > { %v854_v8 = vadd.f32 %v853_v6, %v615_v3  ;;  %v990_v3 = vsub.f32 1.0, %v989_v37  ;;  %v1005_v6 = vsub.f32 1.0, %v1004_v48  ;;  %v839_v37 = vadd.f32 %v4920_v14, %v590_v35  ;;  %v862_v35 = vld [vmem:[%s463_s17] sm:$0xff] }
 0x135   : > { %v1014_v14 = vand.u32 2147483648, %v4956_v61 }
 0x136   : > { %v3740_v13 = vmul.f32 -1.442695, %v854_v8  ;;  %v4034_v57 = vpop.eup %4033  ;;  %v5052_v8 = vor.u32 1.1754944e-38, %v954_v47  ;;  %v1006_v28 = vmul.f32 %v4993_v25, %v1005_v6  ;;  %v962_v47 = vadd.f32 %v5004_v33, %v961_v31  ;;  %v863_v6 = vld [vmem:[%s463_s17 + $0x8] sm:$0xff] }
 0x137   : > { %v5059_v11 = vadd.f32 1.0, %v4034_v57 }
 0x138   : > { %4035 = vpow2.f32 %v3740_v13  ;;  %v991_v13 = vmul.f32 %v4984_v21, %v990_v3  ;;  %v1007_v42 = vadd.f32 %v4993_v25, %v1006_v28  ;;  %v966_v5 = vsel %vm5149_vm13, %v5004_v33, %v962_v47 }
 0x139   : > { %v910_v28 = vor.u32 1.1754944e-38, %v909_v23  ;;  %vm1043_vm5 = vweird.f32 %v5059_v11 }
 0x13a   : > { %v992_v38 = vadd.f32 %v4984_v21, %v991_v13  ;;  %v1011_v3 = vsel %vm5139_vm12, %v4993_v25, %v1007_v42 }
 0x13b   : > { %v856_v36 = vpop.f32.mrf.mxu0 }
 0x13c   : > { %v857_v41 = vadd.f32 %v856_v36, %v620_v2  ;;  %v977_v36 = vadd.f32 %v4980_v17, %v976_v43 }
 0x13e   : > { %v3741_v54 = vmul.f32 -1.442695, %v857_v41  ;;  %v4036_v2 = vpop.eup %4035  ;;  %v999_v41 = vand.u32 2147483648, %v4954_v59  ;;  %v981_v57 = vsel %vm5112_vm9, %v4980_v17, %v977_v36  ;;  %v985_v59 = vor.u32 1.1754944e-38, %v984_v26 }
 0x13f   : > { %v5073_v12 = vadd.f32 1.0, %v4036_v2  ;;  %v996_v17 = vsel %vm5124_vm11, %v4984_v21, %v992_v38  ;;  %v956_v21 = vsel %vm5081_vm2, %v5052_v8, %v951_v16  ;;  %v864_v8 = vld [vmem:[%s463_s17 + $0x10] sm:$0xff]  ;;  %v970_v26 = vor.u32 1.1754944e-38, %v969_v9 }
 0x140   : > { %4037 = vpow2.f32 %v3741_v54  ;;  %v967_v54 = vand.u32 2147483647, %v4960_v63  ;;  %v911_v63 = vsel %vm908_vm1, %v910_v28, %v906_v34  ;;  %v5318_v28 = vld [vmem:[%s7846_s4 + $0x38] sm:$0xff] }
 0x141   : > { %4039 = vtanh.f32 %v842_v0  ;;  %v941_v0 = vsel %vm5063_vm15, %v5023_v49, %v936_v10  ;;  %vm983_vm15 = vcmp.eq.f32.partialorder %v982_v32, 8.507059e+37  ;;  %v1000_v49 = vor.u32 1.1754944e-38, %v999_v41 }
 0x142   : > { %4041 = vtanh.f32 %v845_v4  ;;  %v986_v7 = vsel %vm983_vm15, %v985_v59, %v981_v57  ;;  %vm968_vm2 = vcmp.eq.f32.partialorder %v967_v54, 8.507059e+37  ;;  %vm1058_vm9 = vweird.f32 %v5073_v12 }
 0x143   : > { %v859_v56 = vpop.f32.mrf.mxu0  ;;  %4043 = vtanh.f32 %v848_v20  ;;  %v1015_v20 = vor.u32 1.1754944e-38, %v1014_v14  ;;  %v1001_v43 = vsel %vm998_vm14, %v1000_v49, %v996_v17  ;;  %v1099_v16 = vmul.f32 %v986_v7, %v863_v6 }
 0x144   : > { %v860_v24 = vadd.f32 %v859_v56, %v4936_v44  ;;  %4045 = vrcp.f32 %v5059_v11  ;;  %v971_v9 = vsel %vm968_vm2, %v970_v26, %v966_v5  ;;  %v1062_v55 = vand.u32 2147483647, %v5073_v12  ;;  %v5311_v26 = vld [vmem:[%s7846_s4 + $0x30] sm:$0xff] }
 0x145   : > { %4047 = vrcp.f32 %v5073_v12  ;;  %v1016_v56 = vsel %vm1013_vm0, %v1015_v20, %v1011_v3  ;;  %v1098_v41 = vmul.f32 %v971_v9, %v862_v35  ;;  %v1064_v59 = vand.u32 2147483648, %v5073_v12  ;;  %v5346_v35 = vld [vmem:[%s7846_s4 + $0x58] sm:$0xff]  ;;  %v5360_v9 = vld [vmem:[%s7846_s4 + $0x68] sm:$0xff] }
 0x146   : > { %v4038_v30 = vpop.eup %4037  ;;  %v3742_v62 = vmul.f32 -1.442695, %v860_v24  ;;  %v1047_v3 = vand.u32 2147483647, %v5059_v11  ;;  %vm1063_vm1 = vcmp.eq.f32.partialorder %v1062_v55, 8.507059e+37 }
 0x147   : > { %v5095_v44 = vadd.f32 1.0, %v4038_v30  ;;  %v4040_v39 = vpop.eup %4039  ;;  %v1100_v30 = vmul.f32 %v1001_v43, %v864_v8 }
 0x148   : > { %4049 = vpow2.f32 %v3742_v62  ;;  %v4042_v48 = vpop.eup %4041  ;;  %v1103_v10 = vmul.f32 %v4040_v39, %v5030_v52  ;;  %v1101_v62 = vmul.f32 %v1016_v56, %v865_v46  ;;  %vm1048_vm2 = vcmp.eq.f32.partialorder %v1047_v3, 8.507059e+37  ;;  %v5260_v56 = vld [vmem:[%s7846_s4] sm:$0xff] }
 0x149   : > { %4051 = vrcp.f32 %v5095_v44  ;;  %v4044_v53 = vpop.eup %4043  ;;  %v1104_v25 = vmul.f32 %v4042_v48, %v941_v0  ;;  %vm1073_vm6 = vweird.f32 %v5095_v44  ;;  %v1077_v47 = vand.u32 2147483647, %v5095_v44 }
 0x14a   : > { %v5129_v60 = vpop.eup %4045  ;;  %4053 = vtanh.f32 %v839_v37  ;;  %v1105_v18 = vmul.f32 %v4044_v53, %v956_v21  ;;  %v5182_v32 = vadd.f32 %v1103_v10, %v1099_v16  ;;  %v1079_v50 = vand.u32 2147483648, %v5095_v44  ;;  %v5283_v16 = vld [vmem:[%s7846_s4 + $0x10] sm:$0xff] }
 0x14b   : > { %v5143_v2 = vpop.eup %4047  ;;  %v1039_v24 = vmul.f32 %v5129_v60, %v5059_v11  ;;  %v5189_v36 = vadd.f32 %v1104_v25, %v1100_v30  ;;  %vm1044_vm10 = vweird.f32 %v5129_v60  ;;  %vm1078_vm14 = vcmp.eq.f32.partialorder %v1077_v47, 8.507059e+37  ;;  %v5325_v30 = vld [vmem:[%s7846_s4 + $0x40] sm:$0xff] }
 0x14c   : > { %v1054_v33 = vmul.f32 %v5143_v2, %v5073_v12  ;;  %v5191_v38 = vadd.f32 %v1105_v18, %v1101_v62  ;;  %vm1059_vm4 = vweird.f32 %v5143_v2  ;;  %v1080_v21 = vor.u32 1.1754944e-38, %v1079_v50  ;;  %vm1045_vm0 = vmor %vm1043_vm5, %vm1044_vm10  ;;  %v5290_v18 = vld [vmem:[%s7846_s4 + $0x18] sm:$0xff]  ;;  %v5339_v62 = vld [vmem:[%s7846_s4 + $0x50] sm:$0xff] }
 0x14d   : > { %v1040_v29 = vsub.f32 1.0, %v1039_v24  ;;  %vm5226_vm12 = vmor %vm1058_vm9, %vm1059_vm4  ;;  %vm1122_vm5 = vcmask 261120   ;;  %v5297_v24 = vld [vmem:[%s7846_s4 + $0x20] sm:$0xff] }
 0x14e   : > { %v4050_v4 = vpop.eup %4049  ;;  %v1055_v23 = vsub.f32 1.0, %v1054_v33  ;;  %v5265_v33 = vld [vmem:[%s7846_s4 + $0x78] sm:$0xff] }
 0x14f   : > { %v5164_v27 = vpop.eup %4051  ;;  %v5167_v40 = vadd.f32 1.0, %v4050_v4  ;;  %v1041_v34 = vmul.f32 %v5129_v60, %v1040_v29  ;;  %v1049_v4 = vand.u32 2147483648, %v5059_v11 }
 0x150   : > { %v1069_v13 = vmul.f32 %v5164_v27, %v5095_v44  ;;  %v4054_v52 = vpop.eup %4053  ;;  %v1056_v45 = vmul.f32 %v5143_v2, %v1055_v23  ;;  %vm1074_vm3 = vweird.f32 %v5164_v27  ;;  %v5367_v23 = vld [vmem:[%s7846_s4 + $0x70] sm:$0xff] }
 0x151   : > { %4055 = vrcp.f32 %v5167_v40  ;;  %v1102_v37 = vmul.f32 %v4054_v52, %v911_v63  ;;  %v1094_v14 = vand.u32 2147483648, %v5167_v40  ;;  %v1092_v53 = vand.u32 2147483647, %v5167_v40  ;;  %vm5212_vm8 = vmor %vm1073_vm6, %vm1074_vm3  ;;  %v5304_v52 = vld [vmem:[%s7846_s4 + $0x28] sm:$0xff]  ;;  %v5353_v63 = vld [vmem:[%s7846_s4 + $0x60] sm:$0xff] }
 0x152   : > { %v1070_v31 = vsub.f32 1.0, %v1069_v13  ;;  %4057 = vtanh.f32 %v5182_v32  ;;  %v1057_v54 = vadd.f32 %v5143_v2, %v1056_v45  ;;  %vm1088_vm11 = vweird.f32 %v5167_v40  ;;  %v5276_v13 = vld [vmem:[%s7846_s4 + $0x8] sm:$0xff] }
 0x153   : > { %4059 = vtanh.f32 %v5189_v36  ;;  %v5198_v15 = vadd.f32 %v1102_v37, %v1098_v41  ;;  %v1042_v61 = vadd.f32 %v5129_v60, %v1041_v34  ;;  %v1095_v12 = vor.u32 1.1754944e-38, %v1094_v14  ;;  %v5373_v34 = vpop.permute.xlu1 %660 }
 0x154   : > { %v1071_v19 = vmul.f32 %v5164_v27, %v1070_v31  ;;  %4061 = vtanh.f32 %v5191_v38  ;;  %vm1093_vm15 = vcmp.eq.f32.partialorder %v1092_v53, 8.507059e+37  ;;  %v1061_v6 = vsel %vm5226_vm12, %v5143_v2, %v1057_v54  ;;  %v5332_v31 = vld [vmem:[%s7846_s4 + $0x48] sm:$0xff]  ;;  %7951 = vst [vmem:[#allocation15_spill] sm:$0xff] %v5373_v34  ;;  %v5380_v53 = vpop.permute.xlu2 %680 }
 0x155   : > { %4063 = vtanh.f32 %v5198_v15  ;;  %v1046_v8 = vsel %vm1045_vm0, %v5129_v60, %v1042_v61  ;;  %7954 = vst [vmem:[#allocation18_spill] sm:$0xff] %v5380_v53 }
 0x156   : > { %v1072_v48 = vadd.f32 %v5164_v27, %v1071_v19 }
 0x157   : > { %v4056_v39 = vpop.eup %4055 }
 0x158   : > { %v1084_v22 = vmul.f32 %v4056_v39, %v5167_v40  ;;  %vm1089_vm7 = vweird.f32 %v4056_v39  ;;  %v4058_v57 = vpop.eup %4057  ;;  %v1076_v17 = vsel %vm5212_vm8, %v5164_v27, %v1072_v48  ;;  %v1065_v27 = vor.u32 1.1754944e-38, %v1064_v59 }
 0x159   : > { %v4060_v44 = vpop.eup %4059  ;;  %vm1090_vm13 = vmor %vm1088_vm11, %vm1089_vm7  ;;  %v1081_v20 = vsel %vm1078_vm14, %v1080_v21, %v1076_v17  ;;  %v1050_v40 = vor.u32 1.1754944e-38, %v1049_v4 }
 0x15a   : > { %v1085_v42 = vsub.f32 1.0, %v1084_v22  ;;  %v4062_v49 = vpop.eup %4061  ;;  %v1066_v43 = vsel %vm1063_vm1, %v1065_v27, %v1061_v6  ;;  %v5247_v2 = vmul.f32 %v4060_v44, %v1081_v20  ;;  %v5371_v22 = vpop.permute.xlu0 %655 }
 0x15b   : > { %v1051_v25 = vsel %vm1048_vm2, %v1050_v40, %v1046_v8  ;;  %v5251_v11 = vmul.f32 %v4058_v57, %v1066_v43  ;;  %v4064_v46 = vpop.eup %4063  ;;  %7950 = vst [vmem:[#allocation14_spill] sm:$0xff] %v5371_v22  ;;  %v5378_v50 = vpop.permute.xlu1 %675 }
 0x15c   : > { %v1086_v51 = vmul.f32 %v4056_v39, %v1085_v42  ;;  %7947 = vst [vmem:[#allocation11_spill] sm:$0xff] %v5247_v2  ;;  %v5255_v60 = vmul.f32 %v4064_v46, %v1051_v25  ;;  %v5393_v21 = vpop.permute.xlu2 %650 }
 0x15d   : > { %7948 = vst [vmem:[#allocation12_spill] sm:$0xff] %v5251_v11 }
 0x15e   : > { %v1087_v0 = vadd.f32 %v4056_v39, %v1086_v51  ;;  %7949 = vst [vmem:[#allocation13_spill] sm:$0xff] %v5255_v60 }
 0x15f   : > { %7953 = vst [vmem:[#allocation17_spill] sm:$0xff] %v5378_v50 }
 0x160   : > { %v1091_v5 = vsel %vm1090_vm13, %v4056_v39, %v1087_v0  ;;  %7957 = vst [vmem:[#allocation21_spill] sm:$0xff] %v5393_v21 }
 0x161   : > { %v1096_v7 = vsel %vm1093_vm15, %v1095_v12, %v1091_v5 }
 0x162   : > { %v5242_v10 = vmul.f32 %v4062_v49, %v1096_v7  ;;  %v5375_v42 = vpop.permute.xlu0 %670 }
 0x163   : > { %7952 = vst [vmem:[#allocation16_spill] sm:$0xff] %v5375_v42  ;;  %v5386_v17 = vpop.permute.xlu1 %645 }
 0x164   : > { %7946 = vst [vmem:[#allocation10_spill] sm:$0xff] %v5242_v10  ;;  %1183 = vmatpush.msra.mxu1 %v5242_v10  ;;  %3945 = vmatpush.msra.mxu3 %v5242_v10 }
 0x165   : > { %7956 = vst [vmem:[#allocation20_spill] sm:$0xff] %v5386_v17 }
 0x166   : > { %1184 = vmatpush.msra.mxu1 %v5247_v2  ;;  %3946 = vmatpush.msra.mxu3 %v5247_v2 }
 0x168   : > { %1185 = vmatpush.msra.mxu1 %v5251_v11  ;;  %3947 = vmatpush.msra.mxu3 %v5251_v11 }
 0x16a   : > { %1186 = vmatpush.msra.mxu1 %v5255_v60  ;;  %3948 = vmatpush.msra.mxu3 %v5255_v60  ;;  %v5382_v57 = vpop.permute.xlu0 %720 }
 0x16b   : > { %3743 = vmatmul.msk.f32.vlgmr.msra.gmra.mxu1 %vm1122_vm5, %v5260_v56  ;;  %3758 = vmatmul.msk.f32.vlgmr.msra.gmra.mxu3 %vm1122_vm5, %v5265_v33  ;;  %7955 = vst [vmem:[#allocation19_spill] sm:$0xff] %v5382_v57 }
 0x173   : > { %3744 = vmatmul.msk.f32.gmra.mxu1 %vm1122_vm5, %v5276_v13 }
 0x17b   : > { %3745 = vmatmul.msk.f32.gmra.mxu1 %vm1122_vm5, %v5283_v16 }
 0x183   : > { %3746 = vmatmul.msk.f32.gmra.mxu1 %vm1122_vm5, %v5290_v18 }
 0x18b   : > { %3747 = vmatmul.msk.f32.gmra.mxu1 %vm1122_vm5, %v5297_v24 }
 0x193   : > { %3748 = vmatmul.msk.f32.gmra.mxu1 %vm1122_vm5, %v5304_v52 }
 0x19b   : > { %3749 = vmatmul.msk.f32.gmra.mxu1 %vm1122_vm5, %v5311_v26 }
 0x1a3   : > { %3750 = vmatmul.msk.f32.gmra.mxu1 %vm1122_vm5, %v5318_v28 }
 0x1ab   : > { %3751 = vmatmul.msk.f32.gmra.mxu1 %vm1122_vm5, %v5325_v30 }
 0x1b3   : > { %3752 = vmatmul.msk.f32.gmra.mxu1 %vm1122_vm5, %v5332_v31 }
 0x1bb   : > { %3753 = vmatmul.msk.f32.gmra.mxu1 %vm1122_vm5, %v5339_v62 }
 0x1c3   : > { %3754 = vmatmul.msk.f32.gmra.mxu1 %vm1122_vm5, %v5346_v35 }
 0x1cb   : > { %3755 = vmatmul.msk.f32.gmra.mxu1 %vm1122_vm5, %v5353_v63 }
 0x1d3   : > { %3756 = vmatmul.msk.f32.gmra.mxu1 %vm1122_vm5, %v5360_v9 }
 0x1db   : > { %3757 = vmatmul.msk.f32.gmra.mxu1 %vm1122_vm5, %v5367_v23 }
 0x1e8   : > { %v1188_v37 = vpop.f32.mrf.mxu1 }
 0x1e9   : > { %v1189_v61 = vadd.f32 %v1188_v37, %v5386_v17  ;;  %v5412_v37 = vpop.permute.xlu1 %715 }
 0x1ea   : > { %7958 = vst [vmem:[#allocation22_spill] sm:$0xff] %v5412_v37 }
 0x1eb   : > { %v3759_v4 = vmul.f32 -1.442695, %v1189_v61 }
 0x1ee   : > { %v1233_v51 = vpop.f32.mrf.mxu3 }
 0x1ef   : > { %v1234_v55 = vadd.f32 %v1233_v51, %v5382_v57 }
 0x1f0   : > { %v1191_v29 = vpop.f32.mrf.mxu1 }
 0x1f1   : > { %v3770_v0 = vmul.f32 -1.442695, %v1234_v55  ;;  %v1192_v6 = vadd.f32 %v1191_v29, %v5393_v21  ;;  %v5414_v29 = vpop.permute.xlu2 %665 }
 0x1f2   : > { %7959 = vst [vmem:[#allocation23_spill] sm:$0xff] %v5414_v29 }
 0x1f3   : > { %v3760_v40 = vmul.f32 -1.442695, %v1192_v6 }
 0x1f8   : > { %v1194_v19 = vpop.f32.mrf.mxu1 }
 0x1f9   : > { %v1195_v20 = vadd.f32 %v1194_v19, %v5371_v22 }
 0x200   : > { %v1197_v39 = vpop.f32.mrf.mxu1 }
 0x201   : > { %v1198_v48 = vadd.f32 %v1197_v39, %v5373_v34  ;;  %v3761_v39 = vmul.f32 -1.442695, %v1195_v20 }
 0x203   : > { %v3762_v47 = vmul.f32 -1.442695, %v1198_v48 }
 0x205   : > { %4065 = vpow2.f32 %v3762_v47 }
 0x208   : > { %v1200_v41 = vpop.f32.mrf.mxu1 }
 0x209   : > { %v1201_v47 = vadd.f32 %v1200_v41, %v5414_v29 }
 0x20b   : > { %v4066_v44 = vpop.eup %4065 }
 0x20c   : > { %v5391_v49 = vadd.f32 1.0, %v4066_v44  ;;  %v3763_v44 = vmul.f32 -1.442695, %v1201_v47 }
 0x20e   : > { %vm1318_vm8 = vweird.f32 %v5391_v49 }
 0x210   : > { %v1203_v45 = vpop.f32.mrf.mxu1 }
 0x211   : > { %v1204_v51 = vadd.f32 %v1203_v45, %v5375_v42 }
 0x218   : > { %v1206_v14 = vpop.f32.mrf.mxu1 }
 0x219   : > { %v1207_v25 = vadd.f32 %v1206_v14, %v5378_v50 }
 0x21b   : > { %v3765_v14 = vmul.f32 -1.442695, %v1207_v25 }
 0x220   : > { %v1209_v54 = vpop.f32.mrf.mxu1 }
 0x221   : > { %v1210_v58 = vadd.f32 %v1209_v54, %v5380_v53 }
 0x223   : > { %v3766_v59 = vmul.f32 -1.442695, %v1210_v58 }
 0x225   : > { %4067 = vpow2.f32 %v3766_v59 }
 0x226   : > { %4069 = vpow2.f32 %v3770_v0  ;;  %v3764_v0 = vmul.f32 -1.442695, %v1204_v51 }
 0x227   : > { %4071 = vrcp.f32 %v5391_v49 }
 0x228   : > { %v5388_v1 = vpop.f32.mrf.mxu1 }
 0x22b   : > { %v4068_v12 = vpop.eup %4067 }
 0x22c   : > { %v5395_v3 = vadd.f32 1.0, %v4068_v12  ;;  %v4070_v5 = vpop.eup %4069 }
 0x22d   : > { %v5403_v27 = vpop.eup %4071  ;;  %v5405_v8 = vadd.f32 1.0, %v4070_v5  ;;  %v5430_v5 = vpop.permute.xlu1 %700 }
 0x22e   : > { %4073 = vrcp.f32 %v5395_v3  ;;  %v1314_v19 = vmul.f32 %v5403_v27, %v5391_v49  ;;  %7960 = vst [vmem:[#allocation24_spill] sm:$0xff] %v5430_v5  ;;  %vm1378_vm4 = vweird.f32 %v5395_v3  ;;  %vm1319_vm6 = vweird.f32 %v5403_v27 }
 0x22f   : > { %4075 = vpow2.f32 %v3759_v4  ;;  %v1382_v47 = vand.u32 2147483647, %v5395_v3  ;;  %vm5460_vm9 = vmor %vm1318_vm8, %vm1319_vm6  ;;  %vm1458_vm13 = vweird.f32 %v5405_v8 }
 0x230   : > { %v5400_v7 = vpop.f32.mrf.mxu1  ;;  %4077 = vrcp.f32 %v5405_v8  ;;  %v1315_v59 = vsub.f32 1.0, %v1314_v19 }
 0x231   : > { %4079 = vpow2.f32 %v3760_v40  ;;  %vm1383_vm10 = vcmp.eq.f32.partialorder %v1382_v47, 8.507059e+37 }
 0x232   : > { %4081 = vpow2.f32 %v3761_v39  ;;  %v1316_v41 = vmul.f32 %v5403_v27, %v1315_v59 }
 0x233   : > { %4083 = vpow2.f32 %v3765_v14  ;;  %v1324_v14 = vand.u32 2147483648, %v5391_v49 }
 0x234   : > { %v5407_v43 = vpop.eup %4073 }
 0x235   : > { %v1374_v46 = vmul.f32 %v5407_v43, %v5395_v3  ;;  %v4076_v48 = vpop.eup %4075  ;;  %vm1379_vm3 = vweird.f32 %v5407_v43 }
 0x236   : > { %v5423_v55 = vadd.f32 1.0, %v4076_v48  ;;  %v5426_v12 = vpop.eup %4077  ;;  %v1317_v48 = vadd.f32 %v5403_v27, %v1316_v41  ;;  %vm5447_vm7 = vmor %vm1378_vm4, %vm1379_vm3 }
 0x237   : > { %v1375_v54 = vsub.f32 1.0, %v1374_v46  ;;  %v4080_v4 = vpop.eup %4079  ;;  %v1454_v40 = vmul.f32 %v5426_v12, %v5405_v8  ;;  %v1384_v46 = vand.u32 2147483648, %v5395_v3  ;;  %vm1459_vm12 = vweird.f32 %v5426_v12 }
 0x238   : > { %v5421_v58 = vpop.f32.mrf.mxu1  ;;  %4085 = vrcp.f32 %v5423_v55  ;;  %v4082_v45 = vpop.eup %4081  ;;  %v5436_v25 = vadd.f32 1.0, %v4080_v4  ;;  %vm5502_vm15 = vmor %vm1458_vm13, %vm1459_vm12  ;;  %v1279_v2 = vand.u32 2147483648, %v5423_v55  ;;  %vm1273_vm1 = vweird.f32 %v5423_v55 }
 0x239   : > { %v1376_v61 = vmul.f32 %v5407_v43, %v1375_v54  ;;  %4087 = vpow2.f32 %v3763_v44  ;;  %v4084_v19 = vpop.eup %4083  ;;  %v5444_v51 = vadd.f32 1.0, %v4082_v45  ;;  %v1322_v44 = vand.u32 2147483647, %v5391_v49 }
 0x23a   : > { %4089 = vpow2.f32 %v3764_v0  ;;  %v1455_v3 = vsub.f32 1.0, %v1454_v40  ;;  %v5458_v4 = vadd.f32 1.0, %v4084_v19  ;;  %v1385_v45 = vor.u32 1.1754944e-38, %v1384_v46 }
 0x23b   : > { %v1377_v20 = vadd.f32 %v5407_v43, %v1376_v61  ;;  %v1321_v49 = vsel %vm5460_vm9, %v5403_v27, %v1317_v48  ;;  %vm1323_vm11 = vcmp.eq.f32.partialorder %v1322_v44, 8.507059e+37  ;;  %vm1288_vm3 = vweird.f32 %v5436_v25 }
 0x23c   : > { %v1456_v54 = vmul.f32 %v5426_v12, %v1455_v3  ;;  %vm1363_vm12 = vweird.f32 %v5458_v4 }
 0x23d   : > { %v1381_v0 = vsel %vm5447_vm7, %v5407_v43, %v1377_v20  ;;  %v1325_v20 = vor.u32 1.1754944e-38, %v1324_v14 }
 0x23e   : > { %v5451_v59 = vpop.eup %4085  ;;  %v1386_v40 = vsel %vm1383_vm10, %v1385_v45, %v1381_v0  ;;  %v1457_v45 = vadd.f32 %v5426_v12, %v1456_v54  ;;  %vm1303_vm10 = vweird.f32 %v5444_v51 }
 0x23f   : > { %v4088_v61 = vpop.eup %4087  ;;  %v1269_v43 = vmul.f32 %v5451_v59, %v5423_v55  ;;  %v1326_v27 = vsel %vm1323_vm11, %v1325_v20, %v1321_v49  ;;  %v1471_v47 = vmul.f32 %v1386_v40, %v5191_v38  ;;  %v1464_v38 = vand.u32 2147483648, %v5405_v8 }
 0x240   : > { %v1221_v6 = vpop.f32.mrf.mxu1  ;;  %v5473_v19 = vadd.f32 1.0, %v4088_v61  ;;  %v5483_v61 = vpop.permute.xlu2 %710  ;;  %vm1274_vm0 = vweird.f32 %v5451_v59 }
 0x241   : > { %v1222_v39 = vadd.f32 %v1221_v6, %v5430_v5  ;;  %v4090_v6 = vpop.eup %4089  ;;  %7966 = vst [vmem:[#allocation26_spill] sm:$0xff] %v5483_v61  ;;  %v1270_v44 = vsub.f32 1.0, %v1269_v43  ;;  %v1462_v43 = vand.u32 2147483647, %v5405_v8  ;;  %v5533_v5 = vor.u32 1.1754944e-38, %v1279_v2  ;;  %vm5542_vm2 = vmor %vm1273_vm1, %vm1274_vm0 }
 0x242   : > { %v5476_v11 = vadd.f32 1.0, %v4090_v6  ;;  %v1292_v2 = vand.u32 2147483647, %v5436_v25 }
 0x243   : > { %4091 = vtanh.f32 %v1222_v39  ;;  %v5470_v39 = vpop.permute.xlu0 %705  ;;  %v1271_v20 = vmul.f32 %v5451_v59, %v1270_v44  ;;  %vm1463_vm14 = vcmp.eq.f32.partialorder %v1462_v43, 8.507059e+37 }
 0x244   : > { %4093 = vrcp.f32 %v5436_v25  ;;  %7965 = vst [vmem:[#allocation25_spill] sm:$0xff] %v5470_v39  ;;  %vm5605_vm13 = vcmp.eq.f32.partialorder %v1292_v2, 8.507059e+37 }
 0x245   : > { %4095 = vrcp.f32 %v5444_v51 }
 0x246   : > { %4097 = vrcp.f32 %v5458_v4 }
 0x247   : > { %4099 = vrcp.f32 %v5473_v19 }
 0x248   : > { %v1224_v46 = vpop.f32.mrf.mxu1  ;;  %4101 = vrcp.f32 %v5476_v11 }
 0x249   : > { %v4092_v60 = vpop.eup %4091  ;;  %v1225_v48 = vadd.f32 %v1224_v46, %v5470_v39  ;;  %v1309_v39 = vand.u32 2147483648, %v5444_v51 }
 0x24a   : > { %v1475_v14 = vmul.f32 %v4092_v60, %v1326_v27  ;;  %v5481_v41 = vpop.eup %4093 }
 0x24b   : > { %v3767_v0 = vmul.f32 -1.442695, %v1225_v48  ;;  %v5491_v6 = vpop.eup %4095  ;;  %v1284_v49 = vmul.f32 %v5481_v41, %v5436_v25  ;;  %v1461_v48 = vsel %vm5502_vm15, %v5426_v12, %v1457_v45  ;;  %vm1289_vm4 = vweird.f32 %v5481_v41 }
 0x24c   : > { %v5486_v3 = vadd.f32 %v1475_v14, %v1471_v47  ;;  %v5495_v60 = vpop.eup %4097  ;;  %v1299_v54 = vmul.f32 %v5491_v6, %v5444_v51  ;;  %v1465_v14 = vor.u32 1.1754944e-38, %v1464_v38  ;;  %vm1304_vm6 = vweird.f32 %v5491_v6  ;;  %vm5591_vm9 = vmor %vm1288_vm3, %vm1289_vm4 }
 0x24d   : > { %v5512_v47 = vpop.eup %4099  ;;  %v1359_v8 = vmul.f32 %v5495_v60, %v5458_v4  ;;  %v1285_v44 = vsub.f32 1.0, %v1284_v49  ;;  %v5527_v49 = vpop.permute.xlu2 %695  ;;  %vm1364_vm7 = vweird.f32 %v5495_v60  ;;  %vm5611_vm15 = vmor %vm1303_vm10, %vm1304_vm6  ;;  %vm1348_vm6 = vweird.f32 %v5476_v11 }
 0x24e   : > { %7967 = vst [vmem:[#allocation27_spill] sm:$0xff] %v5486_v3  ;;  %4103 = vtanh.f32 %v5486_v3  ;;  %v1466_v12 = vsel %vm1463_vm14, %v1465_v14, %v1461_v48  ;;  %v1300_v46 = vsub.f32 1.0, %v1299_v54  ;;  %v1329_v57 = vmul.f32 %v5512_v47, %v5473_v19  ;;  %vm5623_vm1 = vmor %vm1363_vm12, %vm1364_vm7 }
 0x24f   : > { %4105 = vpow2.f32 %v3767_v0  ;;  %v5516_v0 = vpop.eup %4101  ;;  %7971 = vst [vmem:[#allocation29_spill] sm:$0xff] %v5527_v49  ;;  %v1286_v54 = vmul.f32 %v5481_v41, %v1285_v44  ;;  %v1219_v48 = vadd.f32 %v5421_v58, %v5527_v49  ;;  %vm1333_vm14 = vweird.f32 %v5473_v19 }
 0x250   : > { %v1227_v40 = vpop.f32.mrf.mxu1  ;;  %v1344_v43 = vmul.f32 %v5516_v0, %v5476_v11  ;;  %v1330_v58 = vsub.f32 1.0, %v1329_v57  ;;  %v1301_v44 = vmul.f32 %v5491_v6, %v1300_v46  ;;  %v5566_v46 = vpop.permute.xlu0 %690  ;;  %vm1334_vm0 = vweird.f32 %v5512_v47 }
 0x251   : > { %v1228_v27 = vadd.f32 %v1227_v40, %v5483_v61  ;;  %v5520_v40 = vadd.f32 %v5451_v59, %v1271_v20  ;;  %v1277_v20 = vand.u32 2147483647, %v5423_v55  ;;  %v1307_v55 = vand.u32 2147483647, %v5444_v51  ;;  %v5560_v61 = vpop.permute.xlu1 %685  ;;  %7975 = vst [vmem:[#allocation31_spill] sm:$0xff] %v5566_v46  ;;  %vm5644_vm4 = vmor %vm1333_vm14, %vm1334_vm0 }
 0x252   : > { %7974 = vst [vmem:[#allocation30_spill] sm:$0xff] %v5560_v61  ;;  %v5563_v57 = vadd.f32 %v5481_v41, %v1286_v54  ;;  %v1216_v54 = vadd.f32 %v5400_v7, %v5566_v46  ;;  %vm1349_vm3 = vweird.f32 %v5516_v0 }
 0x253   : > { %v3768_v10 = vmul.f32 -1.442695, %v1228_v27  ;;  %v1360_v27 = vsub.f32 1.0, %v1359_v8  ;;  %vm5583_vm8 = vcmp.eq.f32.partialorder %v1277_v20, 8.507059e+37  ;;  %vm5596_vm11 = vcmp.eq.f32.partialorder %v1307_v55, 8.507059e+37 }
 0x254   : > { %v4104_v3 = vpop.eup %4103  ;;  %v1291_v20 = vsel %vm5591_vm9, %v5481_v41, %v5563_v57  ;;  %vm5652_vm9 = vmor %vm1348_vm6, %vm1349_vm3 }
 0x255   : > { %v4106_v45 = vpop.eup %4105  ;;  %4107 = vpow2.f32 %v3768_v10  ;;  %v5525_v38 = vmul.f32 %v4104_v3, %v1466_v12  ;;  %v1361_v49 = vmul.f32 %v5495_v60, %v1360_v27 }
 0x256   : > { %v5549_v3 = vadd.f32 1.0, %v4106_v45  ;;  %4109 = vtanh.f32 %v1219_v48 }
 0x257   : > { %7970 = vst [vmem:[#allocation28_spill] sm:$0xff] %v5525_v38  ;;  %1504 = vmatpush.msrb.mxu0 %v5525_v38  ;;  %3949 = vmatpush.msra.mxu2 %v5525_v38  ;;  %v1345_v38 = vsub.f32 1.0, %v1344_v43  ;;  %v1213_v43 = vadd.f32 %v5388_v1, %v5560_v61  ;;  %v1369_v1 = vand.u32 2147483648, %v5458_v4 }
 0x258   : > { %v1230_v8 = vpop.f32.mrf.mxu1  ;;  %4111 = vrcp.f32 %v5549_v3  ;;  %vm1413_vm14 = vweird.f32 %v5549_v3 }
 0x259   : > { %v1231_v12 = vadd.f32 %v1230_v8, %v5412_v37  ;;  %v1331_v8 = vmul.f32 %v5512_v47, %v1330_v58  ;;  %v1302_v37 = vadd.f32 %v5491_v6, %v1301_v44  ;;  %v1346_v48 = vmul.f32 %v5516_v0, %v1345_v38 }
 0x25a   : > { %v1370_v7 = vor.u32 1.1754944e-38, %v1369_v1 }
 0x25b   : > { %v4108_v45 = vpop.eup %4107  ;;  %v3769_v14 = vmul.f32 -1.442695, %v1231_v12  ;;  %v1362_v12 = vadd.f32 %v5495_v60, %v1361_v49  ;;  %v1310_v49 = vor.u32 1.1754944e-38, %v1309_v39  ;;  %v1367_v39 = vand.u32 2147483647, %v5458_v4 }
 0x25c   : > { %v5572_v27 = vadd.f32 1.0, %v4108_v45  ;;  %v4110_v55 = vpop.eup %4109  ;;  %v1306_v41 = vsel %vm5611_vm15, %v5491_v6, %v1302_v37  ;;  %v1332_v4 = vadd.f32 %v5512_v47, %v1331_v8  ;;  %v1347_v44 = vadd.f32 %v5516_v0, %v1346_v48 }
 0x25d   : > { %4113 = vpow2.f32 %v3769_v14  ;;  %v1366_v57 = vsel %vm5623_vm1, %v5495_v60, %v1362_v12  ;;  %v1339_v37 = vand.u32 2147483648, %v5473_v19  ;;  %v1354_v6 = vand.u32 2147483648, %v5476_v11 }
 0x25e   : > { %4115 = vrcp.f32 %v5572_v27  ;;  %v5627_v14 = vpop.eup %4111  ;;  %v1352_v60 = vand.u32 2147483647, %v5476_v11  ;;  %vm1368_vm7 = vcmp.eq.f32.partialorder %v1367_v39, 8.507059e+37  ;;  %v1311_v1 = vsel %vm5596_vm11, %v1310_v49, %v1306_v41 }
 0x25f   : > { %4117 = vtanh.f32 %v1213_v43  ;;  %v1371_v2 = vsel %vm1368_vm7, %v1370_v7, %v1366_v57  ;;  %v1336_v11 = vsel %vm5644_vm4, %v5512_v47, %v1332_v4  ;;  %v1351_v39 = vsel %vm5652_vm9, %v5516_v0, %v1347_v44 }
 0x260   : > { %4119 = vtanh.f32 %v1216_v54  ;;  %v1337_v54 = vand.u32 2147483647, %v5473_v19  ;;  %v1409_v19 = vmul.f32 %v5627_v14, %v5549_v3  ;;  %v1340_v49 = vor.u32 1.1754944e-38, %v1339_v37 }
 0x261   : > { %v7992_v41 = vand.u32 2147483648, %v5436_v25  ;;  %v1355_v7 = vor.u32 1.1754944e-38, %v1354_v6  ;;  %v7993_v8 = vsel %vm5542_vm2, %v5451_v59, %v5520_v40  ;;  %vm1353_vm11 = vcmp.eq.f32.partialorder %v1352_v60, 8.507059e+37 }
 0x262   : > { %v1281_v47 = vsel %vm5583_vm8, %v5533_v5, %v7993_v8  ;;  %vm1338_vm10 = vcmp.eq.f32.partialorder %v1337_v54, 8.507059e+37  ;;  %v1470_v0 = vmul.f32 %v1371_v2, %v5189_v36  ;;  %v1410_v44 = vsub.f32 1.0, %v1409_v19 }
 0x263   : > { %v4114_v43 = vpop.eup %4113  ;;  %v1295_v57 = vor.u32 1.1754944e-38, %v7992_v41  ;;  %v1356_v4 = vsel %vm1353_vm11, %v1355_v7, %v1351_v39  ;;  %vm1414_vm8 = vweird.f32 %v5627_v14  ;;  %vm1428_vm12 = vweird.f32 %v5572_v27 }
 0x264   : > { %v5638_v51 = vpop.eup %4115  ;;  %v5650_v48 = vadd.f32 1.0, %v4114_v43  ;;  %v1474_v43 = vmul.f32 %v4110_v55, %v1311_v1  ;;  %v1341_v55 = vsel %vm1338_vm10, %v1340_v49, %v1336_v11  ;;  %v1469_v5 = vmul.f32 %v1356_v4, %v5182_v32  ;;  %vm5716_vm1 = vmor %vm1413_vm14, %vm1414_vm8 }
 0x265   : > { %v1424_v61 = vmul.f32 %v5638_v51, %v5572_v27  ;;  %v4118_v46 = vpop.eup %4117  ;;  %v1296_v25 = vsel %vm5605_vm13, %v1295_v57, %v1291_v20  ;;  %v1468_v45 = vmul.f32 %v1341_v55, %v5198_v15  ;;  %v1411_v36 = vmul.f32 %v5627_v14, %v1410_v44 }
 0x266   : > { %4121 = vrcp.f32 %v5650_v48  ;;  %v4120_v38 = vpop.eup %4119  ;;  %v5682_v10 = vadd.f32 %v1474_v43, %v1470_v0  ;;  %vm1429_vm2 = vweird.f32 %v5638_v51  ;;  %v1449_v15 = vand.u32 2147483648, %v5650_v48 }
 0x267   : > { %v1425_v29 = vsub.f32 1.0, %v1424_v61  ;;  %v1472_v61 = vmul.f32 %v4118_v46, %v1281_v47  ;;  %v1473_v37 = vmul.f32 %v4120_v38, %v1296_v25  ;;  %v1432_v32 = vand.u32 2147483647, %v5572_v27  ;;  %vm5703_vm15 = vmor %vm1428_vm12, %vm1429_vm2 }
 0x268   : > { %4123 = vtanh.f32 %v5682_v10  ;;  %v1447_v12 = vand.u32 2147483647, %v5650_v48  ;;  %v1412_v1 = vadd.f32 %v5627_v14, %v1411_v36  ;;  %v1419_v19 = vand.u32 2147483648, %v5549_v3 }
 0x269   : > { %v1426_v59 = vmul.f32 %v5638_v51, %v1425_v29  ;;  %v5689_v54 = vadd.f32 %v1472_v61, %v1468_v45  ;;  %v5691_v20 = vadd.f32 %v1473_v37, %v1469_v5  ;;  %v1434_v29 = vand.u32 2147483648, %v5572_v27 }
 0x26a   : > { %vm1443_vm0 = vweird.f32 %v5650_v48  ;;  %v1417_v43 = vand.u32 2147483647, %v5549_v3  ;;  %v1450_v49 = vor.u32 1.1754944e-38, %v1449_v15  ;;  %vm1448_vm4 = vcmp.eq.f32.partialorder %v1447_v12, 8.507059e+37 }
 0x26b   : > { %v1427_v58 = vadd.f32 %v5638_v51, %v1426_v59  ;;  %4125 = vtanh.f32 %v5691_v20  ;;  %v1435_v41 = vor.u32 1.1754944e-38, %v1434_v29  ;;  %vm1433_vm6 = vcmp.eq.f32.partialorder %v1432_v32, 8.507059e+37 }
 0x26c   : > { %v4122_v40 = vpop.eup %4121  ;;  %4127 = vtanh.f32 %v5689_v54  ;;  %v1420_v8 = vor.u32 1.1754944e-38, %v1419_v19  ;;  %vm1418_vm7 = vcmp.eq.f32.partialorder %v1417_v43, 8.507059e+37 }
 0x26d   : > { %v1439_v6 = vmul.f32 %v4122_v40, %v5650_v48  ;;  %vm1444_vm13 = vweird.f32 %v4122_v40  ;;  %v1431_v27 = vsel %vm5703_vm15, %v5638_v51, %v1427_v58  ;;  %v1416_v51 = vsel %vm5716_vm1, %v5627_v14, %v1412_v1 }
 0x26e   : > { %v4124_v38 = vpop.eup %4123  ;;  %vm1445_vm3 = vmor %vm1443_vm0, %vm1444_vm13  ;;  %v1436_v7 = vsel %vm1433_vm6, %v1435_v41, %v1431_v27  ;;  %v1421_v0 = vsel %vm1418_vm7, %v1420_v8, %v1416_v51 }
 0x26f   : > { %v1440_v46 = vsub.f32 1.0, %v1439_v6 }
 0x271   : > { %v1441_v60 = vmul.f32 %v4122_v40, %v1440_v46  ;;  %v4126_v3 = vpop.eup %4125  ;;  %v7998_v46 = vld [vmem:[#allocation23_spill] sm:$0xff] }
 0x272   : > { %v5729_v55 = vmul.f32 %v4126_v3, %v1436_v7  ;;  %v4128_v25 = vpop.eup %4127 }
 0x273   : > { %v1442_v11 = vadd.f32 %v4122_v40, %v1441_v60  ;;  %v5733_v14 = vmul.f32 %v4128_v25, %v1421_v0 }
 0x275   : > { %v1446_v57 = vsel %vm1445_vm3, %v4122_v40, %v1442_v11 }
 0x276   : > { %v1451_v48 = vsel %vm1448_vm4, %v1450_v49, %v1446_v57 }
 0x277   : > { %v5725_v47 = vmul.f32 %v4124_v38, %v1451_v48 }
 0x279   : > { %1505 = vmatpush.msrb.mxu0 %v5725_v47  ;;  %3950 = vmatpush.msra.mxu2 %v5725_v47 }
 0x27b   : > { %1506 = vmatpush.msrb.mxu0 %v5729_v55  ;;  %3951 = vmatpush.msra.mxu2 %v5729_v55 }
 0x27d   : > { %1507 = vmatpush.msrb.mxu0 %v5733_v14  ;;  %3952 = vmatpush.msra.mxu2 %v5733_v14 }
 0x27e   : > { %3771 = vmatmul.msk.f32.vlgmr.msrb.gmra.mxu0 %vm1122_vm5, %v5260_v56  ;;  %3772 = vmatmul.msk.f32.vlgmr.msra.gmra.mxu2 %vm1122_vm5, %v5276_v13 }
 0x286   : > { %3773 = vmatmul.msk.f32.gmra.mxu2 %vm1122_vm5, %v5283_v16 }
 0x28e   : > { %3774 = vmatmul.msk.f32.gmra.mxu2 %vm1122_vm5, %v5290_v18 }
 0x296   : > { %3775 = vmatmul.msk.f32.gmra.mxu2 %vm1122_vm5, %v5297_v24 }
 0x29e   : > { %3776 = vmatmul.msk.f32.gmra.mxu2 %vm1122_vm5, %v5304_v52 }
 0x2a6   : > { %3777 = vmatmul.msk.f32.gmra.mxu2 %vm1122_vm5, %v5311_v26 }
 0x2ae   : > { %3778 = vmatmul.msk.f32.gmra.mxu2 %vm1122_vm5, %v5318_v28 }
 0x2b6   : > { %3779 = vmatmul.msk.f32.gmra.mxu2 %vm1122_vm5, %v5325_v30 }
 0x2be   : > { %3780 = vmatmul.msk.f32.gmra.mxu2 %vm1122_vm5, %v5332_v31 }
 0x2c6   : > { %3781 = vmatmul.msk.f32.gmra.mxu2 %vm1122_vm5, %v5339_v62 }
 0x2ce   : > { %3782 = vmatmul.msk.f32.gmra.mxu2 %vm1122_vm5, %v5346_v35 }
 0x2d6   : > { %3783 = vmatmul.msk.f32.gmra.mxu2 %vm1122_vm5, %v5353_v63 }
 0x2de   : > { %3784 = vmatmul.msk.f32.gmra.mxu2 %vm1122_vm5, %v5360_v9 }
 0x2e6   : > { %3785 = vmatmul.msk.f32.gmra.mxu2 %vm1122_vm5, %v5367_v23 }
 0x2ee   : > { %3786 = vmatmul.msk.f32.gmra.mxu2 %vm1122_vm5, %v5265_v33 }
 0x2fb   : > { %v1509_v28 = vpop.f32.mrf.mxu0 }
 0x2fc   : > { %v1510_v62 = vadd.f32 %v1509_v28, %v5386_v17 }
 0x2fe   : > { %v3787_v63 = vmul.f32 -1.442695, %v1510_v62 }
 0x301   : > { %v1512_v56 = vpop.f32.mrf.mxu2 }
 0x302   : > { %v1513_v31 = vadd.f32 %v1512_v56, %v5393_v21 }
 0x304   : > { %v3788_v35 = vmul.f32 -1.442695, %v1513_v31 }
 0x306   : > { %4129 = vpow2.f32 %v3788_v35  ;;  %v8000_v35 = vld [vmem:[#allocation26_spill] sm:$0xff] }
 0x307   : > { %4131 = vpow2.f32 %v3787_v63 }
 0x309   : > { %v1515_v13 = vpop.f32.mrf.mxu2 }
 0x30a   : > { %v1516_v33 = vadd.f32 %v1515_v13, %v5371_v22 }
 0x30c   : > { %v3789_v4 = vmul.f32 -1.442695, %v1516_v33  ;;  %v4130_v61 = vpop.eup %4129 }
 0x30d   : > { %v4132_v59 = vpop.eup %4131  ;;  %v5780_v45 = vadd.f32 1.0, %v4130_v61 }
 0x30e   : > { %4133 = vpow2.f32 %v3789_v4  ;;  %v5783_v6 = vadd.f32 1.0, %v4132_v59 }
 0x30f   : > { %v1613_v4 = vand.u32 2147483647, %v5780_v45  ;;  %vm1609_vm2 = vweird.f32 %v5780_v45 }
 0x310   : > { %vm1594_vm10 = vweird.f32 %v5783_v6 }
 0x311   : > { %v1518_v16 = vpop.f32.mrf.mxu2  ;;  %vm5852_vm12 = vcmp.eq.f32.partialorder %v1613_v4, 8.507059e+37 }
 0x312   : > { %v1519_v23 = vadd.f32 %v1518_v16, %v5373_v34 }
 0x314   : > { %v3790_v44 = vmul.f32 -1.442695, %v1519_v23  ;;  %v4134_v32 = vpop.eup %4133 }
 0x315   : > { %v5791_v19 = vadd.f32 1.0, %v4134_v32  ;;  %v1600_v32 = vand.u32 2147483648, %v5783_v6 }
 0x316   : > { %4135 = vpow2.f32 %v3790_v44  ;;  %v1615_v44 = vand.u32 2147483648, %v5780_v45 }
 0x317   : > { %4137 = vrcp.f32 %v5780_v45  ;;  %vm1624_vm15 = vweird.f32 %v5791_v19 }
 0x318   : > { %4139 = vrcp.f32 %v5783_v6 }
 0x319   : > { %v1521_v18 = vpop.f32.mrf.mxu2 }
 0x31a   : > { %v1522_v58 = vadd.f32 %v1521_v18, %v7998_v46  ;;  %v7999_v18 = vld [vmem:[#allocation25_spill] sm:$0xff] }
 0x31c   : > { %v4136_v60 = vpop.eup %4135  ;;  %v3791_v2 = vmul.f32 -1.442695, %v1522_v58 }
 0x31d   : > { %v5793_v11 = vadd.f32 1.0, %v4136_v60  ;;  %v5795_v27 = vpop.eup %4137 }
 0x31e   : > { %v5797_v39 = vpop.eup %4139  ;;  %v1605_v38 = vmul.f32 %v5795_v27, %v5780_v45  ;;  %vm1610_vm9 = vweird.f32 %v5795_v27 }
 0x31f   : > { %v1590_v57 = vmul.f32 %v5797_v39, %v5783_v6  ;;  %vm1595_vm11 = vweird.f32 %v5797_v39  ;;  %vm5848_vm8 = vmor %vm1609_vm2, %vm1610_vm9  ;;  %vm1639_vm3 = vweird.f32 %v5793_v11 }
 0x320   : > { %v1606_v3 = vsub.f32 1.0, %v1605_v38  ;;  %vm5865_vm13 = vmor %vm1594_vm10, %vm1595_vm11 }
 0x321   : > { %v1524_v24 = vpop.f32.mrf.mxu2  ;;  %v1591_v56 = vsub.f32 1.0, %v1590_v57 }
 0x322   : > { %v1525_v40 = vadd.f32 %v1524_v24, %v5375_v42  ;;  %v1607_v28 = vmul.f32 %v5795_v27, %v1606_v3 }
 0x323   : > { %v1592_v62 = vmul.f32 %v5797_v39, %v1591_v56 }
 0x324   : > { %v3792_v15 = vmul.f32 -1.442695, %v1525_v40  ;;  %v1608_v40 = vadd.f32 %v5795_v27, %v1607_v28 }
 0x326   : > { %4141 = vpow2.f32 %v3792_v15  ;;  %v1612_v57 = vsel %vm5848_vm8, %v5795_v27, %v1608_v40 }
 0x329   : > { %v1527_v52 = vpop.f32.mrf.mxu2 }
 0x32a   : > { %v1528_v5 = vadd.f32 %v1527_v52, %v5378_v50 }
 0x32c   : > { %v3793_v29 = vmul.f32 -1.442695, %v1528_v5  ;;  %v4142_v43 = vpop.eup %4141 }
 0x32d   : > { %v5805_v7 = vadd.f32 1.0, %v4142_v43  ;;  %v1616_v43 = vor.u32 1.1754944e-38, %v1615_v44 }
 0x32e   : > { %4143 = vpow2.f32 %v3793_v29  ;;  %v1630_v29 = vand.u32 2147483648, %v5791_v19 }
 0x32f   : > { %vm1669_vm11 = vweird.f32 %v5805_v7 }
 0x330   : > { %v5885_v28 = vor.u32 1.1754944e-38, %v1630_v29 }
 0x331   : > { %v1530_v26 = vpop.f32.mrf.mxu2 }
 0x332   : > { %v1531_v36 = vadd.f32 %v1530_v26, %v5380_v53 }
 0x334   : > { %v3794_v12 = vmul.f32 -1.442695, %v1531_v36  ;;  %v4144_v41 = vpop.eup %4143  ;;  %v5836_v36 = vadd.f32 %v5797_v39, %v1592_v62 }
 0x335   : > { %v5809_v0 = vadd.f32 1.0, %v4144_v41 }
 0x336   : > { %4145 = vpow2.f32 %v3794_v12 }
 0x337   : > { %4147 = vpow2.f32 %v3791_v2 }
 0x338   : > { %4149 = vrcp.f32 %v5791_v19 }
 0x339   : > { %v5769_v30 = vpop.f32.mrf.mxu2  ;;  %4151 = vrcp.f32 %v5793_v11 }
 0x33a   : > { %4153 = vrcp.f32 %v5805_v7 }
 0x33b   : > { %4155 = vrcp.f32 %v5809_v0 }
 0x33c   : > { %v4146_v51 = vpop.eup %4145 }
 0x33d   : > { %v4148_v48 = vpop.eup %4147  ;;  %v5813_v13 = vadd.f32 1.0, %v4146_v51 }
 0x33e   : > { %v5807_v8 = vpop.eup %4149  ;;  %v5815_v16 = vadd.f32 1.0, %v4148_v48 }
 0x33f   : > { %v5811_v25 = vpop.eup %4151  ;;  %v1620_v52 = vmul.f32 %v5807_v8, %v5791_v19  ;;  %4157 = vrcp.f32 %v5813_v13  ;;  %vm1625_vm14 = vweird.f32 %v5807_v8 }
 0x340   : > { %v1635_v26 = vmul.f32 %v5811_v25, %v5793_v11  ;;  %4159 = vrcp.f32 %v5815_v16  ;;  %v5833_v5 = vpop.eup %4153  ;;  %vm1640_vm0 = vweird.f32 %v5811_v25  ;;  %vm5910_vm1 = vmor %vm1624_vm15, %vm1625_vm14  ;;  %vm1654_vm7 = vweird.f32 %v5815_v16 }
 0x341   : > { %v5773_v9 = vpop.f32.mrf.mxu2  ;;  %v1621_v23 = vsub.f32 1.0, %v1620_v52  ;;  %v5841_v15 = vpop.eup %4155  ;;  %v1665_v45 = vmul.f32 %v5833_v5, %v5805_v7  ;;  %v8007_v52 = vld [vmem:[#allocation22_spill] sm:$0xff]  ;;  %vm5928_vm6 = vmor %vm1639_vm3, %vm1640_vm0  ;;  %vm1670_vm2 = vweird.f32 %v5833_v5  ;;  %vm1684_vm15 = vweird.f32 %v5809_v0 }
 0x342   : > { %v1636_v59 = vsub.f32 1.0, %v1635_v26  ;;  %v1680_v3 = vmul.f32 %v5841_v15, %v5809_v0  ;;  %vm1685_vm8 = vweird.f32 %v5841_v15  ;;  %vm5973_vm14 = vmor %vm1669_vm11, %vm1670_vm2  ;;  %vm1699_vm0 = vweird.f32 %v5813_v13 }
 0x343   : > { %v1622_v38 = vmul.f32 %v5807_v8, %v1621_v23  ;;  %v1666_v44 = vsub.f32 1.0, %v1665_v45  ;;  %v8012_v45 = vld [vmem:[#allocation24_spill] sm:$0xff] }
 0x344   : > { %v1637_v51 = vmul.f32 %v5811_v25, %v1636_v59  ;;  %v1681_v12 = vsub.f32 1.0, %v1680_v3 }
 0x345   : > { %v5846_v60 = vpop.eup %4157 }
 0x346   : > { %v1695_v27 = vmul.f32 %v5846_v60, %v5813_v13  ;;  %v5900_v40 = vadd.f32 %v5811_v25, %v1637_v51 }
 0x349   : > { %v5777_v37 = vpop.f32.mrf.mxu2 }
 0x351   : > { %v5789_v1 = vpop.f32.mrf.mxu2 }
 0x359   : > { %v1545_v49 = vpop.f32.mrf.mxu2 }
 0x35a   : > { %v1546_v24 = vadd.f32 %v1545_v49, %v7999_v18  ;;  %v5857_v49 = vpop.eup %4159 }
 0x35b   : > { %v1650_v62 = vmul.f32 %v5857_v49, %v5815_v16  ;;  %vm1655_vm10 = vweird.f32 %v5857_v49 }
 0x35c   : > { %v3795_v33 = vmul.f32 -1.442695, %v1546_v24  ;;  %v1628_v24 = vand.u32 2147483647, %v5791_v19 }
 0x35d   : > { %v1651_v3 = vsub.f32 1.0, %v1650_v62  ;;  %v1682_v62 = vmul.f32 %v5841_v15, %v1681_v12  ;;  %v1673_v12 = vand.u32 2147483647, %v5805_v7 }
 0x35e   : > { %4161 = vpow2.f32 %v3795_v33  ;;  %v5895_v33 = vadd.f32 %v5807_v8, %v1622_v38  ;;  %v1696_v38 = vsub.f32 1.0, %v1695_v27  ;;  %vm5922_vm4 = vcmp.eq.f32.partialorder %v1628_v24, 8.507059e+37 }
 0x35f   : > { %v1690_v27 = vand.u32 2147483648, %v5809_v0 }
 0x361   : > { %v1548_v31 = vpop.f32.mrf.mxu2 }
 0x362   : > { %v1549_v63 = vadd.f32 %v1548_v31, %v8000_v35  ;;  %v1645_v31 = vand.u32 2147483648, %v5793_v11 }
 0x364   : > { %v3796_v61 = vmul.f32 -1.442695, %v1549_v63  ;;  %v5892_v63 = vsel %vm5852_vm12, %v1616_v43, %v1612_v57  ;;  %v4162_v4 = vpop.eup %4161  ;;  %v1643_v43 = vand.u32 2147483647, %v5793_v11  ;;  %v1543_v57 = vadd.f32 %v5789_v1, %v8012_v45 }
 0x365   : > { %v1646_v51 = vor.u32 1.1754944e-38, %v1645_v31  ;;  %v5932_v1 = vadd.f32 1.0, %v4162_v4  ;;  %v1667_v11 = vmul.f32 %v5833_v5, %v1666_v44  ;;  %v1697_v44 = vmul.f32 %v5846_v60, %v1696_v38 }
 0x366   : > { %4163 = vpow2.f32 %v3796_v61  ;;  %v8008_v61 = vld [vmem:[#allocation31_spill] sm:$0xff]  ;;  %vm5943_vm9 = vcmp.eq.f32.partialorder %v1643_v43, 8.507059e+37  ;;  %vm1700_vm12 = vweird.f32 %v5846_v60 }
 0x367   : > { %v1537_v59 = vadd.f32 %v5773_v9, %v8008_v61  ;;  %v1668_v43 = vadd.f32 %v5833_v5, %v1667_v11  ;;  %v8020_v9 = vld [vmem:[#allocation30_spill] sm:$0xff]  ;;  %vm5999_vm3 = vmor %vm1699_vm0, %vm1700_vm12 }
 0x368   : > { %v1534_v38 = vadd.f32 %v5769_v30, %v8020_v9  ;;  %v1688_v30 = vand.u32 2147483647, %v5809_v0 }
 0x369   : > { %v1551_v48 = vpop.f32.mrf.mxu2  ;;  %v1672_v0 = vsel %vm5973_vm14, %v5833_v5, %v1668_v43 }
 0x36a   : > { %v1552_v26 = vadd.f32 %v1551_v48, %v8007_v52  ;;  %v8009_v48 = vld [vmem:[#allocation29_spill] sm:$0xff]  ;;  %vm1689_vm11 = vcmp.eq.f32.partialorder %v1688_v30, 8.507059e+37 }
 0x36b   : > { %v1540_v2 = vadd.f32 %v5777_v37, %v8009_v48  ;;  %v1660_v37 = vand.u32 2147483648, %v5815_v16 }
 0x36c   : > { %v3797_v23 = vmul.f32 -1.442695, %v1552_v26  ;;  %v4164_v29 = vpop.eup %4163  ;;  %v1627_v26 = vsel %vm5910_vm1, %v5807_v8, %v5895_v33  ;;  %v1642_v8 = vsel %vm5928_vm6, %v5811_v25, %v5900_v40  ;;  %v1675_v25 = vand.u32 2147483648, %v5805_v7  ;;  %vm5984_vm1 = vmor %vm1684_vm15, %vm1685_vm8 }
 0x36d   : > { %v5939_v24 = vadd.f32 1.0, %v4164_v29  ;;  %v1652_v40 = vmul.f32 %v5857_v49, %v1651_v3  ;;  %v1703_v7 = vand.u32 2147483647, %v5813_v13  ;;  %v1647_v5 = vsel %vm5943_vm9, %v1646_v51, %v1642_v8  ;;  %vm6015_vm6 = vmor %vm1654_vm7, %vm1655_vm10 }
 0x36e   : > { %4165 = vpow2.f32 %v3797_v23  ;;  %v8019_v23 = vld [vmem:[#allocation19_spill] sm:$0xff]  ;;  %v1676_v58 = vor.u32 1.1754944e-38, %v1675_v25  ;;  %v1661_v30 = vor.u32 1.1754944e-38, %v1660_v37 }
 0x36f   : > { %4167 = vtanh.f32 %v1537_v59  ;;  %vm1704_vm9 = vcmp.eq.f32.partialorder %v1703_v7, 8.507059e+37  ;;  %v8029_v7 = vand.u32 2147483647, %v5783_v6  ;;  %vm1749_vm0 = vweird.f32 %v5939_v24 }
 0x370   : > { %4169 = vtanh.f32 %v1540_v2 }
 0x371   : > { %v1554_v31 = vpop.f32.mrf.mxu2  ;;  %4171 = vtanh.f32 %v1543_v57  ;;  %v1683_v57 = vadd.f32 %v5841_v15, %v1682_v62  ;;  %v1691_v62 = vor.u32 1.1754944e-38, %v1690_v27  ;;  %vm1599_vm7 = vcmp.eq.f32.partialorder %v8029_v7, 8.507059e+37 }
 0x372   : > { %v1555_v4 = vadd.f32 %v1554_v31, %v8019_v23  ;;  %4173 = vrcp.f32 %v5932_v1  ;;  %v1698_v31 = vadd.f32 %v5846_v60, %v1697_v44 }
 0x373   : > { %4175 = vrcp.f32 %v5939_v24 }
 0x374   : > { %v4166_v59 = vpop.eup %4165  ;;  %v3798_v29 = vmul.f32 -1.442695, %v1555_v4  ;;  %v1705_v4 = vand.u32 2147483648, %v5813_v13  ;;  %v1658_v13 = vand.u32 2147483647, %v5815_v16  ;;  %v1702_v25 = vsel %vm5999_vm3, %v5846_v60, %v1698_v31 }
 0x375   : > { %v5956_v2 = vadd.f32 1.0, %v4166_v59  ;;  %v4168_v3 = vpop.eup %4167  ;;  %v1653_v59 = vadd.f32 %v5857_v49, %v1652_v40 }
 0x376   : > { %4177 = vpow2.f32 %v3798_v29  ;;  %v4170_v11 = vpop.eup %4169  ;;  %v1632_v29 = vsel %vm5922_vm4, %v5885_v28, %v1627_v26  ;;  %v1687_v28 = vsel %vm5984_vm1, %v5841_v15, %v1683_v57  ;;  %vm1674_vm4 = vcmp.eq.f32.partialorder %v1673_v12, 8.507059e+37 }
 0x377   : > { %4179 = vrcp.f32 %v5956_v2  ;;  %v4172_v44 = vpop.eup %4171  ;;  %v1706_v43 = vor.u32 1.1754944e-38, %v1705_v4  ;;  %v1657_v51 = vsel %vm6015_vm6, %v5857_v49, %v1653_v59  ;;  %v1794_v60 = vmul.f32 %v4168_v3, %v5892_v63 }
 0x378   : > { %v5992_v40 = vpop.eup %4173  ;;  %4181 = vtanh.f32 %v1534_v38  ;;  %v1677_v38 = vsel %vm1674_vm4, %v1676_v58, %v1672_v0  ;;  %v1692_v33 = vsel %vm1689_vm11, %v1691_v62, %v1687_v28  ;;  %v1795_v57 = vmul.f32 %v4170_v11, %v1632_v29 }
 0x379   : > { %v6004_v19 = vpop.eup %4175  ;;  %v1707_v27 = vsel %vm1704_vm9, %v1706_v43, %v1702_v25  ;;  %v1796_v4 = vmul.f32 %v4172_v44, %v1647_v5  ;;  %v1790_v49 = vmul.f32 %v1677_v38, %v5691_v20  ;;  %v1730_v63 = vmul.f32 %v5992_v40, %v5932_v1  ;;  %v8030_v44 = vld [vmem:[#allocation27_spill] sm:$0xff] }
 0x37a   : > { %v1745_v58 = vmul.f32 %v6004_v19, %v5939_v24  ;;  %v1601_v11 = vor.u32 1.1754944e-38, %v1600_v32  ;;  %v1791_v59 = vmul.f32 %v1692_v33, %v5682_v10  ;;  %v1792_v0 = vmul.f32 %v1707_v27, %v8030_v44 }
 0x37b   : > { %v6043_v28 = vadd.f32 %v1794_v60, %v1790_v49  ;;  %vm1659_vm10 = vcmp.eq.f32.partialorder %v1658_v13, 8.507059e+37  ;;  %v8031_v20 = vsel %vm5865_vm13, %v5797_v39, %v5836_v36  ;;  %v1731_v6 = vsub.f32 1.0, %v1730_v63 }
 0x37c   : > { %v4178_v56 = vpop.eup %4177  ;;  %v1602_v16 = vsel %vm1599_vm7, %v1601_v11, %v8031_v20  ;;  %v6050_v37 = vadd.f32 %v1795_v57, %v1791_v59  ;;  %v1746_v32 = vsub.f32 1.0, %v1745_v58  ;;  %v1662_v26 = vsel %vm1659_vm10, %v1661_v30, %v1657_v51 }
 0x37d   : > { %v6022_v8 = vpop.eup %4179  ;;  %v6025_v12 = vadd.f32 1.0, %v4178_v56  ;;  %v6052_v62 = vadd.f32 %v1796_v4, %v1792_v0  ;;  %v1789_v13 = vmul.f32 %v1662_v26, %v5689_v54  ;;  %v1732_v36 = vmul.f32 %v5992_v40, %v1731_v6 }
 0x37e   : > { %v1760_v31 = vmul.f32 %v6022_v8, %v5956_v2  ;;  %v4182_v3 = vpop.eup %4181  ;;  %v1747_v39 = vmul.f32 %v6004_v19, %v1746_v32  ;;  %vm1734_vm13 = vweird.f32 %v5932_v1  ;;  %vm1765_vm2 = vweird.f32 %v6022_v8 }
 0x37f   : > { %4183 = vrcp.f32 %v6025_v12  ;;  %v1793_v10 = vmul.f32 %v4182_v3, %v1602_v16  ;;  %vm1750_vm8 = vweird.f32 %v6004_v19  ;;  %v1785_v54 = vand.u32 2147483648, %v6025_v12 }
 0x380   : > { %v1761_v29 = vsub.f32 1.0, %v1760_v31  ;;  %4185 = vtanh.f32 %v6043_v28  ;;  %vm1764_vm12 = vweird.f32 %v5956_v2  ;;  %v1768_v38 = vand.u32 2147483647, %v5956_v2  ;;  %vm6088_vm4 = vmor %vm1749_vm0, %vm1750_vm8  ;;  %v6218_v31 = vld [vmem:[%s7846_s4 + $0x70] sm:$0xff] }
 0x381   : > { %4187 = vtanh.f32 %v6050_v37  ;;  %v6063_v15 = vadd.f32 %v1793_v10, %v1789_v13  ;;  %v1770_v51 = vand.u32 2147483648, %v5956_v2  ;;  %v1783_v33 = vand.u32 2147483647, %v6025_v12  ;;  %vm6074_vm14 = vmor %vm1764_vm12, %vm1765_vm2  ;;  %v6127_v13 = vld [vmem:[%s7846_s4 + $0x8] sm:$0xff]  ;;  %8044 = vst [vmem:[#allocation37_spill] sm:$0xff] %v6218_v31 }
 0x382   : > { %v1762_v5 = vmul.f32 %v6022_v8, %v1761_v29  ;;  %4189 = vtanh.f32 %v6052_v62  ;;  %v1748_v57 = vadd.f32 %v6004_v19, %v1747_v39  ;;  %v1753_v58 = vand.u32 2147483647, %v5939_v24  ;;  %v6141_v39 = vld [vmem:[%s7846_s4 + $0x18] sm:$0xff] }
 0x383   : > { %v1755_v4 = vand.u32 2147483648, %v5939_v24  ;;  %vm1735_vm1 = vweird.f32 %v5992_v40  ;;  %vm1779_vm3 = vweird.f32 %v6025_v12  ;;  %v1733_v30 = vadd.f32 %v5992_v40, %v1732_v36  ;;  %v6148_v36 = vld [vmem:[%s7846_s4 + $0x20] sm:$0xff] }
 0x384   : > { %v1763_v43 = vadd.f32 %v6022_v8, %v1762_v5  ;;  %v1786_v24 = vor.u32 1.1754944e-38, %v1785_v54  ;;  %v1771_v59 = vor.u32 1.1754944e-38, %v1770_v51  ;;  %v1738_v29 = vand.u32 2147483647, %v5932_v1  ;;  %vm1736_vm7 = vmor %vm1734_vm13, %vm1735_vm1  ;;  %v6169_v54 = vld [vmem:[%s7846_s4 + $0x38] sm:$0xff]  ;;  %v6183_v51 = vld [vmem:[%s7846_s4 + $0x48] sm:$0xff] }
 0x385   : > { %v4184_v25 = vpop.eup %4183  ;;  %vm1784_vm11 = vcmp.eq.f32.partialorder %v1783_v33, 8.507059e+37  ;;  %vm1769_vm9 = vcmp.eq.f32.partialorder %v1768_v38, 8.507059e+37  ;;  %v1756_v20 = vor.u32 1.1754944e-38, %v1755_v4  ;;  %4191 = vtanh.f32 %v6063_v15  ;;  %8037 = vst [vmem:[#allocation30_spill] sm:$0xff] %v6169_v54  ;;  %v6176_v38 = vld [vmem:[%s7846_s4 + $0x40] sm:$0xff]  ;;  %v6197_v33 = vld [vmem:[%s7846_s4 + $0x58] sm:$0xff] }
 0x386   : > { %v1775_v41 = vmul.f32 %v4184_v25, %v6025_v12  ;;  %vm1780_vm15 = vweird.f32 %v4184_v25  ;;  %v4186_v27 = vpop.eup %4185  ;;  %v1767_v63 = vsel %vm6074_vm14, %v6022_v8, %v1763_v43  ;;  %v1740_v12 = vand.u32 2147483648, %v5932_v1  ;;  %v6162_v43 = vld [vmem:[%s7846_s4 + $0x30] sm:$0xff]  ;;  %8038 = vst [vmem:[#allocation27_spill] sm:$0xff] %v6176_v38 }
 0x387   : > { %v4188_v2 = vpop.eup %4187  ;;  %vm1781_vm6 = vmor %vm1779_vm3, %vm1780_vm15  ;;  %v1752_v8 = vsel %vm6088_vm4, %v6004_v19, %v1748_v57  ;;  %v1772_v0 = vsel %vm1769_vm9, %v1771_v59, %v1767_v63  ;;  %vm1754_vm10 = vcmp.eq.f32.partialorder %v1753_v58, 8.507059e+37  ;;  %v1737_v32 = vsel %vm1736_vm7, %v5992_v40, %v1733_v30  ;;  %v6120_v40 = vld [vmem:[%s7846_s4] sm:$0xff]  ;;  %8036 = vst [vmem:[#allocation31_spill] sm:$0xff] %v6162_v43  ;;  %v6225_v58 = vld [vmem:[%s7846_s4 + $0x78] sm:$0xff] }
 0x388   : > { %v1776_v56 = vsub.f32 1.0, %v1775_v41  ;;  %v4190_v11 = vpop.eup %4189  ;;  %v1757_v26 = vsel %vm1754_vm10, %v1756_v20, %v1752_v8  ;;  %v1741_v10 = vor.u32 1.1754944e-38, %v1740_v12  ;;  %v6108_v19 = vmul.f32 %v4188_v2, %v1772_v0  ;;  %v6134_v41 = vld [vmem:[%s7846_s4 + $0x10] sm:$0xff]  ;;  %8039 = vst [vmem:[#allocation32_spill] sm:$0xff] %v6183_v51  ;;  %v6204_v57 = vld [vmem:[%s7846_s4 + $0x60] sm:$0xff] }
 0x389   : > { %vm1739_vm2 = vcmp.eq.f32.partialorder %v1738_v29, 8.507059e+37  ;;  %v6111_v5 = vmul.f32 %v4186_v27, %v1757_v26  ;;  %8041 = vst [vmem:[#allocation34_spill] sm:$0xff] %v6197_v33  ;;  %v6211_v27 = vld [vmem:[%s7846_s4 + $0x68] sm:$0xff] }
 0x38a   : > { %v1777_v60 = vmul.f32 %v4184_v25, %v1776_v56  ;;  %v1742_v6 = vsel %vm1739_vm2, %v1741_v10, %v1737_v32  ;;  %v6155_v56 = vld [vmem:[%s7846_s4 + $0x28] sm:$0xff]  ;;  %8042 = vst [vmem:[#allocation35_spill] sm:$0xff] %v6204_v57 }
 0x38b   : > { %v4192_v1 = vpop.eup %4191  ;;  %8043 = vst [vmem:[#allocation36_spill] sm:$0xff] %v6211_v27 }
 0x38c   : > { %v1778_v49 = vadd.f32 %v4184_v25, %v1777_v60  ;;  %v6190_v60 = vld [vmem:[%s7846_s4 + $0x50] sm:$0xff]  ;;  %8045 = vst [vmem:[#allocation38_spill] sm:$0xff] %v6225_v58 }
 0x38d   : > { %8040 = vst [vmem:[#allocation33_spill] sm:$0xff] %v6190_v60 }
 0x38e   : > { %v1782_v7 = vsel %vm1781_vm6, %v4184_v25, %v1778_v49  ;;  %v6114_v25 = vmul.f32 %v4192_v1, %v1742_v6 }
 0x38f   : > { %v1787_v44 = vsel %vm1784_vm11, %v1786_v24, %v1782_v7 }
 0x390   : > { %v6104_v16 = vmul.f32 %v4190_v11, %v1787_v44 }
 0x392   : > { %1825 = vmatpush.msrb.mxu3 %v6104_v16 }
 0x394   : > { %1826 = vmatpush.msrb.mxu3 %v6108_v19 }
 0x396   : > { %1827 = vmatpush.msrb.mxu3 %v6111_v5 }
 0x398   : > { %1828 = vmatpush.msrb.mxu3 %v6114_v25 }
 0x399   : > { %3799 = vmatmul.msk.f32.vlgmr.msrb.gmra.mxu3 %vm1122_vm5, %v6120_v40 }
 0x3a1   : > { %3800 = vmatmul.msk.f32.gmra.mxu3 %vm1122_vm5, %v6127_v13 }
 0x3a9   : > { %3801 = vmatmul.msk.f32.gmra.mxu3 %vm1122_vm5, %v6134_v41 }
 0x3b1   : > { %3802 = vmatmul.msk.f32.gmra.mxu3 %vm1122_vm5, %v6141_v39 }
 0x3b9   : > { %3803 = vmatmul.msk.f32.gmra.mxu3 %vm1122_vm5, %v6148_v36 }
 0x3c1   : > { %3804 = vmatmul.msk.f32.gmra.mxu3 %vm1122_vm5, %v6155_v56 }
 0x3c9   : > { %3805 = vmatmul.msk.f32.gmra.mxu3 %vm1122_vm5, %v6162_v43 }
 0x3d1   : > { %3806 = vmatmul.msk.f32.gmra.mxu3 %vm1122_vm5, %v6169_v54 }
 0x3d9   : > { %3807 = vmatmul.msk.f32.gmra.mxu3 %vm1122_vm5, %v6176_v38 }
 0x3e1   : > { %3808 = vmatmul.msk.f32.gmra.mxu3 %vm1122_vm5, %v6183_v51 }
 0x3e9   : > { %3809 = vmatmul.msk.f32.gmra.mxu3 %vm1122_vm5, %v6190_v60 }
 0x3f1   : > { %3810 = vmatmul.msk.f32.gmra.mxu3 %vm1122_vm5, %v6197_v33 }
 0x3f9   : > { %3811 = vmatmul.msk.f32.gmra.mxu3 %vm1122_vm5, %v6204_v57 }
 0x401   : > { %3812 = vmatmul.msk.f32.gmra.mxu3 %vm1122_vm5, %v6211_v27 }
 0x409   : > { %3813 = vmatmul.msk.f32.gmra.mxu3 %vm1122_vm5, %v6218_v31 }
 0x411   : > { %3814 = vmatmul.msk.f32.gmra.mxu3 %vm1122_vm5, %v6225_v58 }
 0x41c   : > { %v1830_v4 = vpop.f32.mrf.mxu3 }
 0x41d   : > { %v1831_v29 = vadd.f32 %v1830_v4, %v5386_v17 }
 0x41f   : > { %v3815_v7 = vmul.f32 -1.442695, %v1831_v29 }
 0x421   : > { %4193 = vpow2.f32 %v3815_v7 }
 0x424   : > { %v1833_v2 = vpop.f32.mrf.mxu3 }
 0x425   : > { %v1834_v12 = vadd.f32 %v1833_v2, %v5393_v21 }
 0x427   : > { %v3816_v8 = vmul.f32 -1.442695, %v1834_v12  ;;  %v4194_v26 = vpop.eup %4193 }
 0x428   : > { %v6239_v4 = vadd.f32 1.0, %v4194_v26 }
 0x429   : > { %4195 = vpow2.f32 %v3816_v8 }
 0x42a   : > { %vm1915_vm12 = vweird.f32 %v6239_v4 }
 0x42c   : > { %v1836_v49 = vpop.f32.mrf.mxu3 }
 0x42d   : > { %v1837_v0 = vadd.f32 %v1836_v49, %v5371_v22 }
 0x42f   : > { %v3817_v32 = vmul.f32 -1.442695, %v1837_v0  ;;  %v4196_v6 = vpop.eup %4195 }
 0x430   : > { %v6242_v29 = vadd.f32 1.0, %v4196_v6 }
 0x431   : > { %4197 = vpow2.f32 %v3817_v32 }
 0x432   : > { %vm1930_vm14 = vweird.f32 %v6242_v29 }
 0x434   : > { %v1839_v63 = vpop.f32.mrf.mxu3 }
 0x435   : > { %v1840_v20 = vadd.f32 %v1839_v63, %v5373_v34 }
 0x437   : > { %v3818_v10 = vmul.f32 -1.442695, %v1840_v20  ;;  %v4198_v8 = vpop.eup %4197 }
 0x438   : > { %v6251_v6 = vadd.f32 1.0, %v4198_v8 }
 0x439   : > { %4199 = vpow2.f32 %v3818_v10 }
 0x43a   : > { %4201 = vrcp.f32 %v6239_v4  ;;  %vm1945_vm3 = vweird.f32 %v6251_v6 }
 0x43b   : > { %4203 = vrcp.f32 %v6242_v29 }
 0x43c   : > { %v1842_v3 = vpop.f32.mrf.mxu3 }
 0x43d   : > { %v1843_v63 = vadd.f32 %v1842_v3, %v7998_v46 }
 0x43f   : > { %v3819_v26 = vmul.f32 -1.442695, %v1843_v63 }
 0x444   : > { %v1845_v30 = vpop.f32.mrf.mxu3 }
 0x445   : > { %v1846_v2 = vadd.f32 %v1845_v30, %v5375_v42  ;;  %v4200_v30 = vpop.eup %4199 }
 0x447   : > { %v3820_v7 = vmul.f32 -1.442695, %v1846_v2 }
 0x449   : > { %4205 = vpow2.f32 %v3820_v7 }
 0x44c   : > { %v1848_v11 = vpop.f32.mrf.mxu3 }
 0x44d   : > { %v1849_v12 = vadd.f32 %v1848_v11, %v5378_v50  ;;  %v6253_v11 = vpop.eup %4201 }
 0x44e   : > { %v6257_v3 = vpop.eup %4203  ;;  %v1911_v2 = vmul.f32 %v6253_v11, %v6239_v4  ;;  %vm1916_vm13 = vweird.f32 %v6253_v11 }
 0x44f   : > { %v3821_v0 = vmul.f32 -1.442695, %v1849_v12  ;;  %v4206_v10 = vpop.eup %4205  ;;  %v1926_v12 = vmul.f32 %v6257_v3, %v6242_v29  ;;  %vm1931_vm8 = vweird.f32 %v6257_v3  ;;  %vm6303_vm15 = vmor %vm1915_vm12, %vm1916_vm13 }
 0x450   : > { %vm6312_vm0 = vmor %vm1930_vm14, %vm1931_vm8 }
 0x451   : > { %4207 = vpow2.f32 %v3821_v0  ;;  %v6265_v0 = vadd.f32 1.0, %v4206_v10 }
 0x453   : > { %vm1990_vm12 = vweird.f32 %v6265_v0 }
 0x454   : > { %v1851_v24 = vpop.f32.mrf.mxu3 }
 0x455   : > { %v1852_v49 = vadd.f32 %v1851_v24, %v5380_v53  ;;  %v6255_v24 = vadd.f32 1.0, %v4200_v30  ;;  %v1912_v30 = vsub.f32 1.0, %v1911_v2 }
 0x457   : > { %v3822_v20 = vmul.f32 -1.442695, %v1852_v49  ;;  %v4208_v63 = vpop.eup %4207  ;;  %v1913_v10 = vmul.f32 %v6253_v11, %v1912_v30  ;;  %v1936_v30 = vand.u32 2147483648, %v6242_v29  ;;  %vm1960_vm9 = vweird.f32 %v6255_v24 }
 0x458   : > { %v6269_v53 = vadd.f32 1.0, %v4208_v63 }
 0x459   : > { %4209 = vpow2.f32 %v3822_v20  ;;  %v1937_v31 = vor.u32 1.1754944e-38, %v1936_v30 }
 0x45a   : > { %4211 = vpow2.f32 %v3819_v26  ;;  %v1927_v26 = vsub.f32 1.0, %v1926_v12 }
 0x45b   : > { %4213 = vrcp.f32 %v6251_v6 }
 0x45c   : > { %v6229_v59 = vpop.f32.mrf.mxu3  ;;  %4215 = vrcp.f32 %v6255_v24  ;;  %v1928_v2 = vmul.f32 %v6257_v3, %v1927_v26  ;;  %v6293_v26 = vadd.f32 %v6253_v11, %v1913_v10 }
 0x45d   : > { %4217 = vrcp.f32 %v6265_v0 }
 0x45e   : > { %4219 = vrcp.f32 %v6269_v53  ;;  %v1929_v17 = vadd.f32 %v6257_v3, %v1928_v2  ;;  %v1951_v2 = vand.u32 2147483648, %v6251_v6 }
 0x45f   : > { %v4210_v7 = vpop.eup %4209 }
 0x460   : > { %v4212_v8 = vpop.eup %4211  ;;  %v6271_v50 = vadd.f32 1.0, %v4210_v7 }
 0x461   : > { %v6267_v20 = vpop.eup %4213  ;;  %v6275_v22 = vadd.f32 1.0, %v4212_v8 }
 0x462   : > { %v6273_v34 = vpop.eup %4215  ;;  %v1941_v46 = vmul.f32 %v6267_v20, %v6251_v6  ;;  %4221 = vrcp.f32 %v6271_v50  ;;  %vm1946_vm4 = vweird.f32 %v6267_v20 }
 0x463   : > { %v1956_v63 = vmul.f32 %v6273_v34, %v6255_v24  ;;  %4223 = vrcp.f32 %v6275_v22  ;;  %v6297_v58 = vpop.eup %4217  ;;  %vm1961_vm6 = vweird.f32 %v6273_v34  ;;  %vm6366_vm11 = vmor %vm1945_vm3, %vm1946_vm4  ;;  %vm1975_vm13 = vweird.f32 %v6275_v22 }
 0x464   : > { %v6233_v44 = vpop.f32.mrf.mxu3  ;;  %v1942_v8 = vsub.f32 1.0, %v1941_v46  ;;  %v6301_v46 = vpop.eup %4219  ;;  %vm6390_vm2 = vmor %vm1960_vm9, %vm1961_vm6  ;;  %vm1991_vm14 = vweird.f32 %v6297_v58  ;;  %vm2005_vm3 = vweird.f32 %v6269_v53  ;;  %vm2020_vm6 = vweird.f32 %v6271_v50 }
 0x465   : > { %v1858_v38 = vadd.f32 %v6233_v44, %v8008_v61  ;;  %vm6433_vm4 = vmor %vm1990_vm12, %vm1991_vm14 }
 0x466   : > { %v1943_v27 = vmul.f32 %v6267_v20, %v1942_v8  ;;  %v1949_v8 = vand.u32 2147483647, %v6251_v6 }
 0x468   : > { %vm6384_vm10 = vcmp.eq.f32.partialorder %v1949_v8, 8.507059e+37 }
 0x46c   : > { %v6237_v1 = vpop.f32.mrf.mxu3 }
 0x474   : > { %v6249_v32 = vpop.f32.mrf.mxu3 }
 0x475   : > { %v1864_v44 = vadd.f32 %v6249_v32, %v8012_v45 }
 0x47c   : > { %v1866_v49 = vpop.f32.mrf.mxu3 }
 0x47d   : > { %v1867_v42 = vadd.f32 %v1866_v49, %v7999_v18  ;;  %v1934_v18 = vand.u32 2147483647, %v6242_v29  ;;  %v1986_v29 = vmul.f32 %v6297_v58, %v6265_v0 }
 0x47f   : > { %v3823_v49 = vmul.f32 -1.442695, %v1867_v42  ;;  %vm6316_vm1 = vcmp.eq.f32.partialorder %v1934_v18, 8.507059e+37  ;;  %v1933_v18 = vsel %vm6312_vm0, %v6257_v3, %v1929_v17  ;;  %v1966_v17 = vand.u32 2147483648, %v6255_v24 }
 0x480   : > { %v1987_v51 = vsub.f32 1.0, %v1986_v29  ;;  %v1861_v42 = vadd.f32 %v6237_v1, %v8009_v48  ;;  %vm2006_vm0 = vweird.f32 %v6301_v46 }
 0x481   : > { %4225 = vpow2.f32 %v3823_v49  ;;  %v6341_v49 = vor.u32 1.1754944e-38, %v1951_v2  ;;  %v1964_v2 = vand.u32 2147483647, %v6255_v24  ;;  %v6373_v29 = vor.u32 1.1754944e-38, %v1966_v17 }
 0x483   : > { %vm6402_vm8 = vcmp.eq.f32.partialorder %v1964_v2, 8.507059e+37 }
 0x484   : > { %v1869_v12 = vpop.f32.mrf.mxu3 }
 0x485   : > { %v1870_v7 = vadd.f32 %v1869_v12, %v8000_v35  ;;  %v1957_v12 = vsub.f32 1.0, %v1956_v63  ;;  %v6348_v63 = vsel %vm6316_vm1, %v1937_v31, %v1933_v18  ;;  %v1988_v18 = vmul.f32 %v6297_v58, %v1987_v51 }
 0x487   : > { %v3824_v21 = vmul.f32 -1.442695, %v1870_v7  ;;  %v6310_v7 = vpop.eup %4221  ;;  %v1958_v57 = vmul.f32 %v6273_v34, %v1957_v12  ;;  %v6351_v12 = vadd.f32 %v6267_v20, %v1943_v27 }
 0x488   : > { %v6321_v10 = vpop.eup %4223  ;;  %v2016_v60 = vmul.f32 %v6310_v7, %v6271_v50  ;;  %vm2021_vm1 = vweird.f32 %v6310_v7 }
 0x489   : > { %4227 = vpow2.f32 %v3824_v21  ;;  %v2001_v21 = vmul.f32 %v6301_v46, %v6269_v53  ;;  %v1971_v3 = vmul.f32 %v6321_v10, %v6275_v22  ;;  %v6360_v31 = vadd.f32 %v6273_v34, %v1958_v57  ;;  %vm6460_vm9 = vmor %vm2020_vm6, %vm2021_vm1 }
 0x48a   : > { %v2017_v27 = vsub.f32 1.0, %v2016_v60  ;;  %v1981_v57 = vand.u32 2147483648, %v6275_v22  ;;  %v1948_v60 = vsel %vm6366_vm11, %v6267_v20, %v6351_v12  ;;  %vm1976_vm7 = vweird.f32 %v6321_v10  ;;  %vm6445_vm11 = vmor %vm2005_vm3, %vm2006_vm0 }
 0x48b   : > { %v2002_v43 = vsub.f32 1.0, %v2001_v21  ;;  %v1972_v1 = vsub.f32 1.0, %v1971_v3  ;;  %v1994_v12 = vand.u32 2147483647, %v6265_v0 }
 0x48c   : > { %v1872_v30 = vpop.f32.mrf.mxu3  ;;  %v2018_v17 = vmul.f32 %v6310_v7, %v2017_v27 }
 0x48d   : > { %v1873_v33 = vadd.f32 %v1872_v30, %v8007_v52  ;;  %v4226_v52 = vpop.eup %4225  ;;  %v1973_v3 = vmul.f32 %v6321_v10, %v1972_v1 }
 0x48e   : > { %v6380_v6 = vadd.f32 1.0, %v4226_v52  ;;  %v2003_v52 = vmul.f32 %v6301_v46, %v2002_v43 }
 0x48f   : > { %v3825_v30 = vmul.f32 -1.442695, %v1873_v33  ;;  %v4228_v54 = vpop.eup %4227  ;;  %v2011_v33 = vand.u32 2147483648, %v6269_v53 }
 0x490   : > { %v6394_v21 = vadd.f32 1.0, %v4228_v54  ;;  %v1996_v54 = vand.u32 2147483648, %v6265_v0  ;;  %v2024_v0 = vand.u32 2147483647, %v6271_v50 }
 0x491   : > { %4229 = vpow2.f32 %v3825_v30  ;;  %v1989_v30 = vadd.f32 %v6297_v58, %v1988_v18  ;;  %v2026_v18 = vand.u32 2147483648, %v6271_v50 }
 0x492   : > { %4231 = vtanh.f32 %v1858_v38  ;;  %v1963_v38 = vsel %vm6390_vm2, %v6273_v34, %v6360_v31  ;;  %v2004_v31 = vadd.f32 %v6301_v46, %v2003_v52  ;;  %vm6470_vm2 = vmor %vm1975_vm13, %vm1976_vm7  ;;  %vm2025_vm13 = vcmp.eq.f32.partialorder %v2024_v0, 8.507059e+37 }
 0x493   : > { %4233 = vtanh.f32 %v1861_v42  ;;  %v1855_v42 = vadd.f32 %v6229_v59, %v8020_v9  ;;  %v1974_v59 = vadd.f32 %v6321_v10, %v1973_v3  ;;  %vm2070_vm6 = vweird.f32 %v6394_v21 }
 0x494   : > { %v1875_v20 = vpop.f32.mrf.mxu3  ;;  %4235 = vtanh.f32 %v1864_v44  ;;  %v2019_v44 = vadd.f32 %v6310_v7, %v2018_v17  ;;  %v1993_v17 = vsel %vm6433_vm4, %v6297_v58, %v1989_v30  ;;  %v2008_v58 = vsel %vm6445_vm11, %v6301_v46, %v2004_v31 }
 0x495   : > { %v1876_v8 = vadd.f32 %v1875_v20, %v8019_v23  ;;  %4237 = vrcp.f32 %v6380_v6  ;;  %v2009_v20 = vand.u32 2147483647, %v6269_v53  ;;  %v1997_v53 = vor.u32 1.1754944e-38, %v1996_v54 }
 0x496   : > { %4239 = vrcp.f32 %v6394_v21  ;;  %v1968_v46 = vsel %vm6402_vm8, %v6373_v29, %v1963_v38  ;;  %v1978_v54 = vsel %vm6470_vm2, %v6321_v10, %v1974_v59  ;;  %v2027_v31 = vor.u32 1.1754944e-38, %v2026_v18 }
 0x497   : > { %v4230_v43 = vpop.eup %4229  ;;  %v3826_v34 = vmul.f32 -1.442695, %v1876_v8  ;;  %v1979_v8 = vand.u32 2147483647, %v6275_v22  ;;  %vm2010_vm7 = vcmp.eq.f32.partialorder %v2009_v20, 8.507059e+37  ;;  %v8068_v18 = vand.u32 2147483648, %v6239_v4 }
 0x498   : > { %v6416_v2 = vadd.f32 1.0, %v4230_v43  ;;  %v4232_v27 = vpop.eup %4231 }
 0x499   : > { %4241 = vpow2.f32 %v3826_v34  ;;  %v4234_v1 = vpop.eup %4233  ;;  %v1953_v34 = vsel %vm6384_vm10, %v6341_v49, %v1948_v60  ;;  %vm1995_vm10 = vcmp.eq.f32.partialorder %v1994_v12, 8.507059e+37  ;;  %v2012_v49 = vor.u32 1.1754944e-38, %v2011_v33 }
 0x49a   : > { %4243 = vrcp.f32 %v6416_v2  ;;  %v4236_v52 = vpop.eup %4235  ;;  %v2023_v60 = vsel %vm6460_vm9, %v6310_v7, %v2019_v44  ;;  %v2115_v12 = vmul.f32 %v4232_v27, %v6348_v63  ;;  %v2116_v29 = vmul.f32 %v4234_v1, %v1953_v34 }
 0x49b   : > { %v6450_v3 = vpop.eup %4237  ;;  %4245 = vtanh.f32 %v1855_v42  ;;  %v1998_v42 = vsel %vm1995_vm10, %v1997_v53, %v1993_v17  ;;  %v2013_v33 = vsel %vm2010_vm7, %v2012_v49, %v2008_v58  ;;  %v2028_v38 = vsel %vm2025_vm13, %v2027_v31, %v2023_v60 }
 0x49c   : > { %v6464_v24 = vpop.eup %4239  ;;  %v2111_v10 = vmul.f32 %v1998_v42, %v6043_v28  ;;  %v2117_v59 = vmul.f32 %v4236_v52, %v1968_v46  ;;  %v2051_v63 = vmul.f32 %v6450_v3, %v6380_v6  ;;  %v1922_v20 = vor.u32 1.1754944e-38, %v8068_v18 }
 0x49d   : > { %v2066_v44 = vmul.f32 %v6464_v24, %v6394_v21  ;;  %v1982_v1 = vor.u32 1.1754944e-38, %v1981_v57  ;;  %v2112_v17 = vmul.f32 %v2013_v33, %v6050_v37  ;;  %v8069_v53 = vand.u32 2147483647, %v6239_v4 }
 0x49e   : > { %vm1980_vm12 = vcmp.eq.f32.partialorder %v1979_v8, 8.507059e+37  ;;  %v6503_v28 = vadd.f32 %v2115_v12, %v2111_v10  ;;  %v2113_v52 = vmul.f32 %v2028_v38, %v6052_v62  ;;  %v8070_v34 = vsel %vm6303_vm15, %v6253_v11, %v6293_v26 }
 0x49f   : > { %v4242_v32 = vpop.eup %4241  ;;  %vm1920_vm8 = vcmp.eq.f32.partialorder %v8069_v53, 8.507059e+37  ;;  %v1983_v30 = vsel %vm1980_vm12, %v1982_v1, %v1978_v54  ;;  %v6511_v22 = vadd.f32 %v2116_v29, %v2112_v17  ;;  %v2067_v57 = vsub.f32 1.0, %v2066_v44 }
 0x4a0   : > { %v6483_v43 = vpop.eup %4243  ;;  %v6486_v51 = vadd.f32 1.0, %v4242_v32  ;;  %v1923_v58 = vsel %vm1920_vm8, %v1922_v20, %v8070_v34  ;;  %v6513_v50 = vadd.f32 %v2117_v59, %v2113_v52  ;;  %v2052_v4 = vsub.f32 1.0, %v2051_v63 }
 0x4a1   : > { %v2081_v7 = vmul.f32 %v6483_v43, %v6416_v2  ;;  %v4246_v27 = vpop.eup %4245  ;;  %v2110_v46 = vmul.f32 %v1983_v30, %v6063_v15  ;;  %v2068_v62 = vmul.f32 %v6464_v24, %v2067_v57  ;;  %vm2055_vm15 = vweird.f32 %v6380_v6 }
 0x4a2   : > { %4247 = vrcp.f32 %v6486_v51  ;;  %v2114_v37 = vmul.f32 %v4246_v27, %v1923_v58  ;;  %v2053_v26 = vmul.f32 %v6450_v3, %v2052_v4  ;;  %vm2086_vm14 = vweird.f32 %v6483_v43 }
 0x4a3   : > { %v2082_v0 = vsub.f32 1.0, %v2081_v7  ;;  %4249 = vtanh.f32 %v6503_v28  ;;  %vm2071_vm0 = vweird.f32 %v6464_v24  ;;  %v2106_v15 = vand.u32 2147483648, %v6486_v51 }
 0x4a4   : > { %4251 = vtanh.f32 %v6511_v22  ;;  %v6521_v11 = vadd.f32 %v2114_v37, %v2110_v46  ;;  %vm2085_vm1 = vweird.f32 %v6416_v2  ;;  %v2089_v54 = vand.u32 2147483647, %v6416_v2  ;;  %vm6549_vm2 = vmor %vm2070_vm6, %vm2071_vm0 }
 0x4a5   : > { %v2083_v8 = vmul.f32 %v6483_v43, %v2082_v0  ;;  %4253 = vtanh.f32 %v6513_v50  ;;  %v2091_v42 = vand.u32 2147483648, %v6416_v2  ;;  %v2104_v12 = vand.u32 2147483647, %v6486_v51  ;;  %vm6535_vm4 = vmor %vm2085_vm1, %vm2086_vm14 }
 0x4a6   : > { %v2069_v33 = vadd.f32 %v6464_v24, %v2068_v62  ;;  %v2074_v7 = vand.u32 2147483647, %v6394_v21  ;;  %v2076_v44 = vand.u32 2147483648, %v6394_v21  ;;  %vm2056_vm11 = vweird.f32 %v6450_v3 }
 0x4a7   : > { %v2084_v32 = vadd.f32 %v6483_v43, %v2083_v8  ;;  %vm2100_vm9 = vweird.f32 %v6486_v51  ;;  %v2054_v27 = vadd.f32 %v6450_v3, %v2053_v26  ;;  %v2107_v21 = vor.u32 1.1754944e-38, %v2106_v15  ;;  %vm2057_vm8 = vmor %vm2055_vm15, %vm2056_vm11  ;;  %v8090_v26 = vld [vmem:[#allocation20_spill] sm:$0xff] }
 0x4a8   : > { %v4248_v49 = vpop.eup %4247  ;;  %v2092_v20 = vor.u32 1.1754944e-38, %v2091_v42  ;;  %v2059_v1 = vand.u32 2147483647, %v6380_v6  ;;  %vm2105_vm7 = vcmp.eq.f32.partialorder %v2104_v12, 8.507059e+37  ;;  %vm2090_vm13 = vcmp.eq.f32.partialorder %v2089_v54, 8.507059e+37  ;;  %v8091_v54 = vld [vmem:[#allocation21_spill] sm:$0xff] }
 0x4a9   : > { %v2096_v35 = vmul.f32 %v4248_v49, %v6486_v51  ;;  %vm2101_vm3 = vweird.f32 %v4248_v49  ;;  %v4250_v29 = vpop.eup %4249  ;;  %v2088_v59 = vsel %vm6535_vm4, %v6483_v43, %v2084_v32  ;;  %v2061_v51 = vand.u32 2147483648, %v6380_v6  ;;  %v8075_v6 = vld [vmem:[#allocation28_spill] sm:$0xff]  ;;  %v8092_v12 = vld [vmem:[#allocation23_spill] sm:$0xff] }
 0x4aa   : > { %v4252_v2 = vpop.eup %4251  ;;  %vm2102_vm10 = vmor %vm2100_vm9, %vm2101_vm3  ;;  %v2073_v43 = vsel %vm6549_vm2, %v6464_v24, %v2069_v33  ;;  %v2093_v53 = vsel %vm2090_vm13, %v2092_v20, %v2088_v59  ;;  %v2077_v52 = vor.u32 1.1754944e-38, %v2076_v44  ;;  %4255 = vtanh.f32 %v6521_v11 }
 0x4ab   : > { %v2097_v60 = vsub.f32 1.0, %v2096_v35  ;;  %v4254_v18 = vpop.eup %4253  ;;  %vm2075_vm12 = vcmp.eq.f32.partialorder %v2074_v7, 8.507059e+37  ;;  %v2058_v58 = vsel %vm2057_vm8, %v6450_v3, %v2054_v27  ;;  %v2062_v57 = vor.u32 1.1754944e-38, %v2061_v51  ;;  %v8089_v3 = vld [vmem:[#allocation38_spill] sm:$0xff] }
 0x4ac   : > { %v2078_v30 = vsel %vm2075_vm12, %v2077_v52, %v2073_v43  ;;  %v2128_v37 = vmul.f32 %v4252_v2, %v2093_v53  ;;  %vm2060_vm14 = vcmp.eq.f32.partialorder %v2059_v1, 8.507059e+37 }
 0x4ad   : > { %v2098_v31 = vmul.f32 %v4248_v49, %v2097_v60  ;;  %v2063_v24 = vsel %vm2060_vm14, %v2062_v57, %v2058_v58  ;;  %v2127_v4 = vmul.f32 %v4250_v29, %v2078_v30 }
 0x4af   : > { %v2099_v10 = vadd.f32 %v4248_v49, %v2098_v31 }
 0x4b0   : > { %v4256_v8 = vpop.eup %4255 }
 0x4b1   : > { %v2103_v17 = vsel %vm2102_vm10, %v4248_v49, %v2099_v10  ;;  %v2126_v49 = vmul.f32 %v4256_v8, %v2063_v24  ;;  %v8093_v10 = vld [vmem:[#allocation16_spill] sm:$0xff] }
 0x4b2   : > { %v2108_v0 = vsel %vm2105_vm7, %v2107_v21, %v2103_v17 }
 0x4b3   : > { %v2129_v34 = vmul.f32 %v4254_v18, %v2108_v0 }
 0x4b5   : > { %2146 = vmatpush.msrb.mxu1 %v2129_v34 }
 0x4b7   : > { %2147 = vmatpush.msrb.mxu1 %v2128_v37 }
 0x4b9   : > { %2148 = vmatpush.msrb.mxu1 %v2127_v4 }
 0x4bb   : > { %2149 = vmatpush.msrb.mxu1 %v2126_v49 }
 0x4bc   : > { %3827 = vmatmul.msk.f32.vlgmr.msrb.gmra.mxu1 %vm1122_vm5, %v6120_v40  ;;  %v8083_v40 = vld [vmem:[#allocation32_spill] sm:$0xff] }
 0x4bd   : > { %3460 = vmatpush.msra.mxu1 %v2129_v34 }
 0x4bf   : > { %3461 = vmatpush.msra.mxu1 %v2128_v37 }
 0x4c1   : > { %3462 = vmatpush.msra.mxu1 %v2127_v4 }
 0x4c3   : > { %3463 = vmatpush.msra.mxu1 %v2126_v49 }
 0x4c4   : > { %3828 = vmatmul.msk.f32.gmra.mxu1 %vm1122_vm5, %v6127_v13  ;;  %v8084_v13 = vld [vmem:[#allocation33_spill] sm:$0xff] }
 0x4c5   : > { %3464 = vmatpush.msra.mxu1 %v6104_v16  ;;  %v8076_v16 = vld [vmem:[#allocation10_spill] sm:$0xff] }
 0x4c7   : > { %3465 = vmatpush.msra.mxu1 %v6108_v19  ;;  %v8077_v19 = vld [vmem:[#allocation11_spill] sm:$0xff] }
 0x4c9   : > { %3466 = vmatpush.msra.mxu1 %v6111_v5  ;;  %v8078_v5 = vld [vmem:[#allocation12_spill] sm:$0xff] }
 0x4cb   : > { %3467 = vmatpush.msra.mxu1 %v6114_v25  ;;  %v8079_v25 = vld [vmem:[#allocation13_spill] sm:$0xff] }
 0x4cc   : > { %3829 = vmatmul.msk.f32.gmra.mxu1 %vm1122_vm5, %v6134_v41  ;;  %v8085_v41 = vld [vmem:[#allocation34_spill] sm:$0xff] }
 0x4cd   : > { %3468 = vmatpush.msra.mxu1 %v8075_v6 }
 0x4cf   : > { %3469 = vmatpush.msra.mxu1 %v5725_v47  ;;  %v8080_v47 = vld [vmem:[#allocation31_spill] sm:$0xff] }
 0x4d1   : > { %3470 = vmatpush.msra.mxu1 %v5729_v55  ;;  %v8081_v55 = vld [vmem:[#allocation30_spill] sm:$0xff] }
 0x4d3   : > { %3471 = vmatpush.msra.mxu1 %v5733_v14  ;;  %v8082_v14 = vld [vmem:[#allocation27_spill] sm:$0xff] }
 0x4d4   : > { %3830 = vmatmul.msk.f32.gmra.mxu1 %vm1122_vm5, %v6141_v39  ;;  %v8086_v39 = vld [vmem:[#allocation35_spill] sm:$0xff] }
 0x4d5   : > { %3472 = vmatpush.msra.mxu1 %v8076_v16 }
 0x4d7   : > { %3473 = vmatpush.msra.mxu1 %v8077_v19 }
 0x4d9   : > { %3474 = vmatpush.msra.mxu1 %v8078_v5 }
 0x4db   : > { %3475 = vmatpush.msra.mxu1 %v8079_v25 }
 0x4dc   : > { %3831 = vmatmul.msk.f32.gmra.mxu1 %vm1122_vm5, %v6148_v36  ;;  %v8087_v36 = vld [vmem:[#allocation36_spill] sm:$0xff] }
 0x4e4   : > { %3832 = vmatmul.msk.f32.gmra.mxu1 %vm1122_vm5, %v6155_v56  ;;  %v8088_v56 = vld [vmem:[#allocation37_spill] sm:$0xff] }
 0x4ec   : > { %3833 = vmatmul.msk.f32.gmra.mxu1 %vm1122_vm5, %v8080_v47 }
 0x4f4   : > { %3834 = vmatmul.msk.f32.gmra.mxu1 %vm1122_vm5, %v8081_v55 }
 0x4fc   : > { %3835 = vmatmul.msk.f32.gmra.mxu1 %vm1122_vm5, %v8082_v14 }
 0x504   : > { %3836 = vmatmul.msk.f32.gmra.mxu1 %vm1122_vm5, %v8083_v40 }
 0x50c   : > { %3837 = vmatmul.msk.f32.gmra.mxu1 %vm1122_vm5, %v8084_v13 }
 0x514   : > { %3838 = vmatmul.msk.f32.gmra.mxu1 %vm1122_vm5, %v8085_v41 }
 0x51c   : > { %3839 = vmatmul.msk.f32.gmra.mxu1 %vm1122_vm5, %v8086_v39 }
 0x524   : > { %3840 = vmatmul.msk.f32.gmra.mxu1 %vm1122_vm5, %v8087_v36 }
 0x52c   : > { %3841 = vmatmul.msk.f32.gmra.mxu1 %vm1122_vm5, %v8088_v56 }
 0x534   : > { %3842 = vmatmul.msk.f32.gmra.mxu1 %vm1122_vm5, %v8089_v3 }
 0x539   : > { %v2151_v46 = vpop.f32.mrf.mxu1 }
 0x53a   : > { %v2152_v60 = vadd.f32 %v2151_v46, %v8090_v26 }
 0x53c   : > { %v3843_v15 = vmul.f32 -1.442695, %v2152_v60 }
 0x53e   : > { %4257 = vpow2.f32 %v3843_v15 }
 0x541   : > { %v2154_v35 = vpop.f32.mrf.mxu1 }
 0x542   : > { %v2155_v42 = vadd.f32 %v2154_v35, %v8091_v54 }
 0x544   : > { %v3844_v29 = vmul.f32 -1.442695, %v2155_v42  ;;  %v4258_v7 = vpop.eup %4257 }
 0x545   : > { %v2223_v44 = vadd.f32 1.0, %v4258_v7 }
 0x547   : > { %v2242_v40 = vand.u32 2147483648, %v2223_v44  ;;  %vm2236_vm4 = vweird.f32 %v2223_v44  ;;  %v2240_v41 = vand.u32 2147483647, %v2223_v44 }
 0x549   : > { %v6610_v62 = vpop.f32.mrf.mxu1  ;;  %v2243_v46 = vor.u32 1.1754944e-38, %v2242_v40  ;;  %vm2241_vm2 = vcmp.eq.f32.partialorder %v2240_v41, 8.507059e+37  ;;  %v8098_v41 = vld [vmem:[#allocation25_spill] sm:$0xff] }
 0x551   : > { %v6613_v32 = vpop.f32.mrf.mxu1 }
 0x559   : > { %v2163_v31 = vpop.f32.mrf.mxu1 }
 0x55a   : > { %v2164_v33 = vadd.f32 %v2163_v31, %v8092_v12 }
 0x55c   : > { %v3847_v38 = vmul.f32 -1.442695, %v2164_v33 }
 0x55e   : > { %4259 = vpow2.f32 %v3847_v38 }
 0x55f   : > { %4261 = vpow2.f32 %v3844_v29 }
 0x560   : > { %4263 = vrcp.f32 %v2223_v44 }
 0x561   : > { %v2166_v2 = vpop.f32.mrf.mxu1 }
 0x562   : > { %v2167_v59 = vadd.f32 %v2166_v2, %v8093_v10 }
 0x564   : > { %v4260_v63 = vpop.eup %4259  ;;  %v3848_v27 = vmul.f32 -1.442695, %v2167_v59 }
 0x565   : > { %v2227_v18 = vadd.f32 1.0, %v4260_v63  ;;  %v4262_v21 = vpop.eup %4261 }
 0x566   : > { %4265 = vpow2.f32 %v3848_v27  ;;  %v6618_v20 = vadd.f32 1.0, %v4262_v21  ;;  %v4264_v51 = vpop.eup %4263 }
 0x567   : > { %4267 = vrcp.f32 %v2227_v18  ;;  %v2232_v52 = vmul.f32 %v4264_v51, %v2223_v44  ;;  %v2302_v25 = vand.u32 2147483648, %v2227_v18  ;;  %vm2296_vm0 = vweird.f32 %v2227_v18 }
 0x568   : > { %4269 = vrcp.f32 %v6618_v20  ;;  %vm2237_vm1 = vweird.f32 %v4264_v51  ;;  %v2300_v14 = vand.u32 2147483647, %v2227_v18  ;;  %v2257_v59 = vand.u32 2147483648, %v6618_v20 }
 0x569   : > { %v6620_v1 = vpop.f32.mrf.mxu1  ;;  %v2233_v57 = vsub.f32 1.0, %v2232_v52  ;;  %v2303_v36 = vor.u32 1.1754944e-38, %v2302_v25  ;;  %vm2238_vm6 = vmor %vm2236_vm4, %vm2237_vm1  ;;  %vm2251_vm8 = vweird.f32 %v6618_v20  ;;  %v2255_v27 = vand.u32 2147483647, %v6618_v20 }
 0x56a   : > { %vm2301_vm11 = vcmp.eq.f32.partialorder %v2300_v14, 8.507059e+37 }
 0x56b   : > { %v2234_v49 = vmul.f32 %v4264_v51, %v2233_v57  ;;  %v8095_v57 = vld [vmem:[#allocation15_spill] sm:$0xff] }
 0x56c   : > { %v4266_v17 = vpop.eup %4265 }
 0x56d   : > { %v4268_v43 = vpop.eup %4267  ;;  %v6623_v0 = vadd.f32 1.0, %v4266_v17  ;;  %v2235_v55 = vadd.f32 %v4264_v51, %v2234_v49 }
 0x56e   : > { %v2292_v53 = vmul.f32 %v4268_v43, %v2227_v18  ;;  %v6628_v30 = vpop.eup %4269  ;;  %vm2297_vm15 = vweird.f32 %v4268_v43 }
 0x56f   : > { %4271 = vrcp.f32 %v6623_v0  ;;  %v2247_v4 = vmul.f32 %v6628_v30, %v6618_v20  ;;  %vm2298_vm3 = vmor %vm2296_vm0, %vm2297_vm15  ;;  %v2239_v3 = vsel %vm2238_vm6, %v4264_v51, %v2235_v55  ;;  %vm2252_vm10 = vweird.f32 %v6628_v30 }
 0x570   : > { %v2293_v34 = vsub.f32 1.0, %v2292_v53  ;;  %v2317_v31 = vand.u32 2147483648, %v6623_v0  ;;  %v2244_v33 = vsel %vm2241_vm2, %v2243_v46, %v2239_v3  ;;  %vm2311_vm7 = vweird.f32 %v6623_v0  ;;  %vm2253_vm12 = vmor %vm2251_vm8, %vm2252_vm10  ;;  %v8094_v53 = vld [vmem:[#allocation14_spill] sm:$0xff] }
 0x571   : > { %v6626_v58 = vpop.f32.mrf.mxu1  ;;  %v2248_v5 = vsub.f32 1.0, %v2247_v4  ;;  %v2315_v2 = vand.u32 2147483647, %v6623_v0  ;;  %v2258_v51 = vor.u32 1.1754944e-38, %v2257_v59  ;;  %vm2256_vm15 = vcmp.eq.f32.partialorder %v2255_v27, 8.507059e+37  ;;  %v8096_v4 = vld [vmem:[#allocation17_spill] sm:$0xff] }
 0x572   : > { %v2294_v24 = vmul.f32 %v4268_v43, %v2293_v34  ;;  %v2318_v21 = vor.u32 1.1754944e-38, %v2317_v31  ;;  %v2158_v52 = vadd.f32 %v6610_v62, %v8094_v53  ;;  %v2161_v20 = vadd.f32 %v6613_v32, %v8095_v57 }
 0x573   : > { %v2249_v56 = vmul.f32 %v6628_v30, %v2248_v5  ;;  %vm2316_vm14 = vcmp.eq.f32.partialorder %v2315_v2, 8.507059e+37 }
 0x574   : > { %v2295_v19 = vadd.f32 %v4268_v43, %v2294_v24 }
 0x575   : > { %v4272_v37 = vpop.eup %4271  ;;  %v2250_v38 = vadd.f32 %v6628_v30, %v2249_v56  ;;  %v8099_v56 = vld [vmem:[#allocation26_spill] sm:$0xff] }
 0x576   : > { %v2307_v8 = vmul.f32 %v4272_v37, %v6623_v0  ;;  %v2299_v39 = vsel %vm2298_vm3, %v4268_v43, %v2295_v19  ;;  %vm2312_vm9 = vweird.f32 %v4272_v37  ;;  %v3846_v19 = vmul.f32 -1.442695, %v2161_v20 }
 0x577   : > { %v2304_v35 = vsel %vm2301_vm11, %v2303_v36, %v2299_v39  ;;  %vm2313_vm13 = vmor %vm2311_vm7, %vm2312_vm9 }
 0x578   : > { %v2308_v6 = vsub.f32 1.0, %v2307_v8  ;;  %v2431_v7 = vmul.f32 %v2304_v35, %v6521_v11  ;;  %v2254_v11 = vsel %vm2253_vm12, %v6628_v30, %v2250_v38  ;;  %v2170_v8 = vadd.f32 %v6620_v1, %v8096_v4  ;;  %v8097_v30 = vld [vmem:[#allocation18_spill] sm:$0xff] }
 0x579   : > { %v2175_v16 = vpop.f32.mrf.mxu1  ;;  %v2259_v34 = vsel %vm2256_vm15, %v2258_v51, %v2254_v11  ;;  %v2173_v49 = vadd.f32 %v6626_v58, %v8097_v30 }
 0x57a   : > { %v2176_v47 = vadd.f32 %v2175_v16, %v8020_v9  ;;  %v2309_v13 = vmul.f32 %v4272_v37, %v2308_v6  ;;  %v3845_v16 = vmul.f32 -1.442695, %v2158_v52  ;;  %v3849_v5 = vmul.f32 -1.442695, %v2170_v8 }
 0x57b   : > { %v3850_v25 = vmul.f32 -1.442695, %v2173_v49 }
 0x57c   : > { %4273 = vtanh.f32 %v2176_v47  ;;  %v2310_v15 = vadd.f32 %v4272_v37, %v2309_v13 }
 0x57e   : > { %v2314_v18 = vsel %vm2313_vm13, %v4272_v37, %v2310_v15 }
 0x57f   : > { %v2319_v17 = vsel %vm2316_vm14, %v2318_v21, %v2314_v18 }
 0x580   : > { %v2432_v37 = vmul.f32 %v2319_v17, %v6503_v28 }
 0x581   : > { %v2178_v60 = vpop.f32.mrf.mxu1 }
 0x582   : > { %v4274_v42 = vpop.eup %4273  ;;  %v2179_v29 = vadd.f32 %v2178_v60, %v8008_v61 }
 0x583   : > { %v2435_v44 = vmul.f32 %v4274_v42, %v2244_v33 }
 0x584   : > { %4275 = vtanh.f32 %v2179_v29 }
 0x585   : > { %v6643_v63 = vadd.f32 %v2435_v44, %v2431_v7  ;;  %4277 = vpow2.f32 %v3845_v16  ;;  %v8100_v44 = vld [vmem:[#allocation22_spill] sm:$0xff] }
 0x586   : > { %4279 = vpow2.f32 %v3846_v19 }
 0x587   : > { %4281 = vpow2.f32 %v3849_v5 }
 0x588   : > { %4283 = vpow2.f32 %v3850_v25 }
 0x589   : > { %v2181_v43 = vpop.f32.mrf.mxu1 }
 0x58a   : > { %v4276_v0 = vpop.eup %4275 }
 0x58b   : > { %v2436_v24 = vmul.f32 %v4276_v0, %v2259_v34  ;;  %v4278_v32 = vpop.eup %4277  ;;  %v2182_v0 = vadd.f32 %v2181_v43, %v8009_v48 }
 0x58c   : > { %v4280_v28 = vpop.eup %4279  ;;  %v6661_v1 = vadd.f32 1.0, %v4278_v32 }
 0x58d   : > { %v6659_v6 = vadd.f32 %v2436_v24, %v2432_v37  ;;  %v4282_v55 = vpop.eup %4281  ;;  %v6663_v40 = vadd.f32 1.0, %v4280_v28 }
 0x58e   : > { %v4284_v14 = vpop.eup %4283  ;;  %v6665_v58 = vadd.f32 1.0, %v4282_v55  ;;  %4285 = vrcp.f32 %v6661_v1  ;;  %vm2266_vm0 = vweird.f32 %v6661_v1  ;;  %v2270_v24 = vand.u32 2147483647, %v6661_v1 }
 0x58f   : > { %v6667_v13 = vadd.f32 1.0, %v4284_v14  ;;  %4287 = vrcp.f32 %v6663_v40  ;;  %v2272_v25 = vand.u32 2147483648, %v6661_v1  ;;  %vm2281_vm3 = vweird.f32 %v6663_v40 }
 0x590   : > { %4289 = vrcp.f32 %v6665_v58  ;;  %v2287_v32 = vand.u32 2147483648, %v6663_v40  ;;  %vm2326_vm2 = vweird.f32 %v6665_v58  ;;  %vm2271_vm12 = vcmp.eq.f32.partialorder %v2270_v24, 8.507059e+37 }
 0x591   : > { %v2184_v62 = vpop.f32.mrf.mxu1  ;;  %4291 = vrcp.f32 %v6667_v13  ;;  %vm2341_vm13 = vweird.f32 %v6667_v13 }
 0x592   : > { %v2185_v34 = vadd.f32 %v2184_v62, %v8012_v45 }
 0x594   : > { %v6675_v60 = vpop.eup %4285 }
 0x595   : > { %v6677_v15 = vpop.eup %4287  ;;  %v2262_v33 = vmul.f32 %v6675_v60, %v6661_v1  ;;  %vm2267_vm1 = vweird.f32 %v6675_v60 }
 0x596   : > { %v6679_v42 = vpop.eup %4289  ;;  %v2277_v38 = vmul.f32 %v6677_v15, %v6663_v40  ;;  %vm2282_vm4 = vweird.f32 %v6677_v15  ;;  %vm6724_vm9 = vmor %vm2266_vm0, %vm2267_vm1 }
 0x597   : > { %v6681_v31 = vpop.eup %4291  ;;  %v2322_v7 = vmul.f32 %v6679_v42, %v6665_v58  ;;  %v2263_v21 = vsub.f32 1.0, %v2262_v33  ;;  %vm2327_vm6 = vweird.f32 %v6679_v42  ;;  %v2347_v33 = vand.u32 2147483648, %v6667_v13  ;;  %vm6737_vm10 = vmor %vm2281_vm3, %vm2282_vm4 }
 0x598   : > { %v2337_v59 = vmul.f32 %v6681_v31, %v6667_v13  ;;  %v2278_v51 = vsub.f32 1.0, %v2277_v38  ;;  %vm2342_vm11 = vweird.f32 %v6681_v31  ;;  %v2285_v38 = vand.u32 2147483647, %v6663_v40  ;;  %vm6744_vm7 = vmor %vm2326_vm2, %vm2327_vm6 }
 0x599   : > { %v2187_v47 = vpop.f32.mrf.mxu1  ;;  %v2323_v17 = vsub.f32 1.0, %v2322_v7  ;;  %v2264_v37 = vmul.f32 %v6675_v60, %v2263_v21  ;;  %vm6757_vm8 = vmor %vm2341_vm13, %vm2342_vm11 }
 0x59a   : > { %v2188_v39 = vadd.f32 %v2187_v47, %v8098_v41  ;;  %v2338_v52 = vsub.f32 1.0, %v2337_v59  ;;  %v2279_v43 = vmul.f32 %v6677_v15, %v2278_v51  ;;  %v2345_v59 = vand.u32 2147483647, %v6667_v13 }
 0x59b   : > { %v2324_v16 = vmul.f32 %v6679_v42, %v2323_v17  ;;  %v2265_v47 = vadd.f32 %v6675_v60, %v2264_v37  ;;  %v2288_v51 = vor.u32 1.1754944e-38, %v2287_v32  ;;  %vm2286_vm15 = vcmp.eq.f32.partialorder %v2285_v38, 8.507059e+37 }
 0x59c   : > { %v3851_v46 = vmul.f32 -1.442695, %v2188_v39  ;;  %v2339_v5 = vmul.f32 %v6681_v31, %v2338_v52  ;;  %v2280_v39 = vadd.f32 %v6677_v15, %v2279_v43  ;;  %v2348_v52 = vor.u32 1.1754944e-38, %v2347_v33 }
 0x59d   : > { %v2325_v14 = vadd.f32 %v6679_v42, %v2324_v16  ;;  %vm2346_vm0 = vcmp.eq.f32.partialorder %v2345_v59, 8.507059e+37 }
 0x59e   : > { %4293 = vpow2.f32 %v3851_v46  ;;  %v2340_v46 = vadd.f32 %v6681_v31, %v2339_v5 }
 0x59f   : > { %v2329_v21 = vsel %vm6744_vm7, %v6679_v42, %v2325_v14 }
 0x5a0   : > { %v2344_v17 = vsel %vm6757_vm8, %v6681_v31, %v2340_v46 }
 0x5a1   : > { %v2190_v36 = vpop.f32.mrf.mxu1  ;;  %v2349_v43 = vsel %vm2346_vm0, %v2348_v52, %v2344_v17 }
 0x5a2   : > { %v2191_v3 = vadd.f32 %v2190_v36, %v8099_v56  ;;  %v2332_v36 = vand.u32 2147483648, %v6665_v58  ;;  %v2434_v32 = vmul.f32 %v2349_v43, %v6513_v50 }
 0x5a4   : > { %v3852_v35 = vmul.f32 -1.442695, %v2191_v3  ;;  %v4294_v18 = vpop.eup %4293  ;;  %v2333_v13 = vor.u32 1.1754944e-38, %v2332_v36 }
 0x5a5   : > { %v6694_v20 = vadd.f32 1.0, %v4294_v18  ;;  %v2273_v18 = vor.u32 1.1754944e-38, %v2272_v25 }
 0x5a6   : > { %4295 = vpow2.f32 %v3852_v35 }
 0x5a7   : > { %vm2376_vm1 = vweird.f32 %v6694_v20 }
 0x5a9   : > { %v2193_v29 = vpop.f32.mrf.mxu1 }
 0x5aa   : > { %v2194_v2 = vadd.f32 %v2193_v29, %v8100_v44  ;;  %v2330_v29 = vand.u32 2147483647, %v6665_v58  ;;  %v2269_v58 = vsel %vm6724_vm9, %v6675_v60, %v2265_v47 }
 0x5ac   : > { %v3853_v27 = vmul.f32 -1.442695, %v2194_v2  ;;  %v4296_v11 = vpop.eup %4295  ;;  %vm2331_vm14 = vcmp.eq.f32.partialorder %v2330_v29, 8.507059e+37 }
 0x5ad   : > { %v6699_v8 = vadd.f32 1.0, %v4296_v11  ;;  %v2284_v11 = vsel %vm6737_vm10, %v6677_v15, %v2280_v39  ;;  %v2334_v42 = vsel %vm2331_vm14, %v2333_v13, %v2329_v21 }
 0x5ae   : > { %4297 = vpow2.f32 %v3853_v27  ;;  %v2433_v25 = vmul.f32 %v2334_v42, %v6511_v22  ;;  %v2382_v42 = vand.u32 2147483648, %v6694_v20 }
 0x5af   : > { %4299 = vtanh.f32 %v2182_v0  ;;  %vm2391_vm2 = vweird.f32 %v6699_v8  ;;  %v2397_v21 = vand.u32 2147483648, %v6699_v8 }
 0x5b0   : > { %4301 = vtanh.f32 %v2185_v34  ;;  %v2274_v34 = vsel %vm2271_vm12, %v2273_v18, %v2269_v58  ;;  %v2395_v18 = vand.u32 2147483647, %v6699_v8 }
 0x5b1   : > { %v2196_v49 = vpop.f32.mrf.mxu1  ;;  %4303 = vrcp.f32 %v6694_v20  ;;  %v2398_v43 = vor.u32 1.1754944e-38, %v2397_v21 }
 0x5b2   : > { %v2197_v19 = vadd.f32 %v2196_v49, %v8019_v23  ;;  %4305 = vrcp.f32 %v6699_v8  ;;  %v2289_v49 = vsel %vm2286_vm15, %v2288_v51, %v2284_v11  ;;  %vm2396_vm0 = vcmp.eq.f32.partialorder %v2395_v18, 8.507059e+37 }
 0x5b4   : > { %v4298_v62 = vpop.eup %4297  ;;  %v3854_v28 = vmul.f32 -1.442695, %v2197_v19 }
 0x5b5   : > { %v6713_v55 = vadd.f32 1.0, %v4298_v62  ;;  %v4300_v35 = vpop.eup %4299 }
 0x5b6   : > { %4307 = vpow2.f32 %v3854_v28  ;;  %v4302_v7 = vpop.eup %4301  ;;  %v2437_v16 = vmul.f32 %v4300_v35, %v2274_v34  ;;  %v2380_v34 = vand.u32 2147483647, %v6694_v20 }
 0x5b7   : > { %4309 = vrcp.f32 %v6713_v55  ;;  %v6753_v27 = vpop.eup %4303  ;;  %v2438_v31 = vmul.f32 %v4302_v7, %v2289_v49  ;;  %vm2406_vm6 = vweird.f32 %v6713_v55  ;;  %v2410_v1 = vand.u32 2147483647, %v6713_v55 }
 0x5b8   : > { %v6767_v60 = vpop.eup %4305  ;;  %v2372_v5 = vmul.f32 %v6753_v27, %v6694_v20  ;;  %v6782_v28 = vadd.f32 %v2437_v16, %v2433_v25  ;;  %v2412_v38 = vand.u32 2147483648, %v6713_v55  ;;  %vm2377_vm10 = vweird.f32 %v6753_v27 }
 0x5b9   : > { %v2387_v19 = vmul.f32 %v6767_v60, %v6699_v8  ;;  %v6784_v14 = vadd.f32 %v2438_v31, %v2434_v32  ;;  %vm2392_vm4 = vweird.f32 %v6767_v60  ;;  %vm2411_vm14 = vcmp.eq.f32.partialorder %v2410_v1, 8.507059e+37  ;;  %vm2378_vm15 = vmor %vm2376_vm1, %vm2377_vm10  ;;  %v6922_v1 = vld [vmem:[%s7846_s4 + $0x58] sm:$0xff] }
 0x5ba   : > { %v2373_v39 = vsub.f32 1.0, %v2372_v5  ;;  %vm6813_vm13 = vmor %vm2391_vm2, %vm2392_vm4  ;;  %v2413_v52 = vor.u32 1.1754944e-38, %v2412_v38  ;;  %v2383_v5 = vor.u32 1.1754944e-38, %v2382_v42  ;;  %v6929_v38 = vld [vmem:[%s7846_s4 + $0x60] sm:$0xff] }
 0x5bb   : > { %v2388_v47 = vsub.f32 1.0, %v2387_v19 }
 0x5bc   : > { %v4308_v0 = vpop.eup %4307  ;;  %v2374_v22 = vmul.f32 %v6753_v27, %v2373_v39  ;;  %v6859_v39 = vld [vmem:[%s7846_s4 + $0x10] sm:$0xff] }
 0x5bd   : > { %v6772_v37 = vpop.eup %4309  ;;  %v2370_v15 = vadd.f32 1.0, %v4308_v0  ;;  %v2389_v35 = vmul.f32 %v6767_v60, %v2388_v47  ;;  %v6852_v47 = vld [vmem:[%s7846_s4 + $0x8] sm:$0xff] }
 0x5be   : > { %v2402_v24 = vmul.f32 %v6772_v37, %v6713_v55  ;;  %vm2407_vm3 = vweird.f32 %v6772_v37  ;;  %v2375_v17 = vadd.f32 %v6753_v27, %v2374_v22  ;;  %v6894_v22 = vld [vmem:[%s7846_s4 + $0x38] sm:$0xff] }
 0x5bf   : > { %4311 = vrcp.f32 %v2370_v15  ;;  %v2427_v29 = vand.u32 2147483648, %v2370_v15  ;;  %v2425_v2 = vand.u32 2147483647, %v2370_v15  ;;  %v2390_v58 = vadd.f32 %v6767_v60, %v2389_v35  ;;  %vm6800_vm9 = vmor %vm2406_vm6, %vm2407_vm3  ;;  %v6887_v35 = vld [vmem:[%s7846_s4 + $0x30] sm:$0xff] }
 0x5c0   : > { %v2403_v62 = vsub.f32 1.0, %v2402_v24  ;;  %4313 = vtanh.f32 %v6659_v6  ;;  %vm2421_vm7 = vweird.f32 %v2370_v15  ;;  %v2379_v19 = vsel %vm2378_vm15, %v6753_v27, %v2375_v17  ;;  %v6845_v27 = vld [vmem:[%s7846_s4] sm:$0xff] }
 0x5c1   : > { %4315 = vtanh.f32 %v6782_v28  ;;  %v2428_v8 = vor.u32 1.1754944e-38, %v2427_v29  ;;  %vm2426_vm12 = vcmp.eq.f32.partialorder %v2425_v2, 8.507059e+37  ;;  %vm2381_vm3 = vcmp.eq.f32.partialorder %v2380_v34, 8.507059e+37  ;;  %v6915_v29 = vld [vmem:[%s7846_s4 + $0x50] sm:$0xff] }
 0x5c2   : > { %v2404_v36 = vmul.f32 %v6772_v37, %v2403_v62  ;;  %4317 = vtanh.f32 %v6784_v14  ;;  %v2384_v25 = vsel %vm2381_vm3, %v2383_v5, %v2379_v19  ;;  %v6943_v2 = vld [vmem:[%s7846_s4 + $0x70] sm:$0xff] }
 0x5c3   : > { %4319 = vtanh.f32 %v6643_v63 }
 0x5c4   : > { %v2405_v33 = vadd.f32 %v6772_v37, %v2404_v36  ;;  %v6866_v36 = vld [vmem:[%s7846_s4 + $0x18] sm:$0xff] }
 0x5c5   : > { %v4312_v3 = vpop.eup %4311 }
 0x5c6   : > { %v2417_v46 = vmul.f32 %v4312_v3, %v2370_v15  ;;  %vm2422_vm11 = vweird.f32 %v4312_v3  ;;  %v4314_v59 = vpop.eup %4313  ;;  %v2409_v13 = vsel %vm6800_vm9, %v6772_v37, %v2405_v33  ;;  %v2394_v37 = vsel %vm6813_vm13, %v6767_v60, %v2390_v58  ;;  %v6908_v33 = vld [vmem:[%s7846_s4 + $0x48] sm:$0xff]  ;;  %v6950_v58 = vld [vmem:[%s7846_s4 + $0x78] sm:$0xff] }
 0x5c7   : > { %v4316_v11 = vpop.eup %4315  ;;  %vm2423_vm8 = vmor %vm2421_vm7, %vm2422_vm11  ;;  %v2414_v16 = vsel %vm2411_vm14, %v2413_v52, %v2409_v13  ;;  %v2399_v31 = vsel %vm2396_vm0, %v2398_v43, %v2394_v37 }
 0x5c8   : > { %v2418_v50 = vsub.f32 1.0, %v2417_v46  ;;  %v4318_v0 = vpop.eup %4317  ;;  %v6833_v60 = vmul.f32 %v4316_v11, %v2414_v16  ;;  %v6836_v62 = vmul.f32 %v4314_v59, %v2399_v31  ;;  %v6880_v46 = vld [vmem:[%s7846_s4 + $0x28] sm:$0xff] }
 0x5c9   : > { %v4320_v20 = vpop.eup %4319 }
 0x5ca   : > { %v2419_v7 = vmul.f32 %v4312_v3, %v2418_v50  ;;  %8114 = vst [vmem:[#allocation10_spill] sm:$0xff] %v6833_v60  ;;  %v6839_v32 = vmul.f32 %v4320_v20, %v2384_v25  ;;  %v6901_v50 = vld [vmem:[%s7846_s4 + $0x40] sm:$0xff] }
 0x5cb   : > { %8115 = vst [vmem:[#allocation11_spill] sm:$0xff] %v6836_v62 }
 0x5cc   : > { %v2420_v55 = vadd.f32 %v4312_v3, %v2419_v7  ;;  %8116 = vst [vmem:[#allocation12_spill] sm:$0xff] %v6839_v32  ;;  %v6936_v7 = vld [vmem:[%s7846_s4 + $0x68] sm:$0xff] }
 0x5ce   : > { %v2424_v49 = vsel %vm2423_vm8, %v4312_v3, %v2420_v55  ;;  %v6873_v3 = vld [vmem:[%s7846_s4 + $0x20] sm:$0xff] }
 0x5cf   : > { %v2429_v15 = vsel %vm2426_vm12, %v2428_v8, %v2424_v49 }
 0x5d0   : > { %v6829_v24 = vmul.f32 %v4318_v0, %v2429_v15 }
 0x5d2   : > { %8113 = vst [vmem:[#allocation28_spill] sm:$0xff] %v6829_v24  ;;  %2467 = vmatpush.msrb.mxu2 %v6829_v24 }
 0x5d4   : > { %2468 = vmatpush.msrb.mxu2 %v6833_v60 }
 0x5d6   : > { %2469 = vmatpush.msrb.mxu2 %v6836_v62 }
 0x5d8   : > { %2470 = vmatpush.msrb.mxu2 %v6839_v32 }
 0x5d9   : > { %3855 = vmatmul.msk.f32.vlgmr.msrb.gmra.mxu2 %vm1122_vm5, %v6845_v27 }
 0x5e1   : > { %3856 = vmatmul.msk.f32.gmra.mxu2 %vm1122_vm5, %v6852_v47 }
 0x5e9   : > { %3857 = vmatmul.msk.f32.gmra.mxu2 %vm1122_vm5, %v6859_v39 }
 0x5f1   : > { %3858 = vmatmul.msk.f32.gmra.mxu2 %vm1122_vm5, %v6866_v36 }
 0x5f9   : > { %3859 = vmatmul.msk.f32.gmra.mxu2 %vm1122_vm5, %v6873_v3 }
 0x601   : > { %3860 = vmatmul.msk.f32.gmra.mxu2 %vm1122_vm5, %v6880_v46 }
 0x609   : > { %3861 = vmatmul.msk.f32.gmra.mxu2 %vm1122_vm5, %v6887_v35 }
 0x611   : > { %3862 = vmatmul.msk.f32.gmra.mxu2 %vm1122_vm5, %v6894_v22 }
 0x619   : > { %3863 = vmatmul.msk.f32.gmra.mxu2 %vm1122_vm5, %v6901_v50 }
 0x621   : > { %3864 = vmatmul.msk.f32.gmra.mxu2 %vm1122_vm5, %v6908_v33 }
 0x629   : > { %3865 = vmatmul.msk.f32.gmra.mxu2 %vm1122_vm5, %v6915_v29 }
 0x631   : > { %3866 = vmatmul.msk.f32.gmra.mxu2 %vm1122_vm5, %v6922_v1 }
 0x639   : > { %3867 = vmatmul.msk.f32.gmra.mxu2 %vm1122_vm5, %v6929_v38 }
 0x641   : > { %3868 = vmatmul.msk.f32.gmra.mxu2 %vm1122_vm5, %v6936_v7 }
 0x649   : > { %3869 = vmatmul.msk.f32.gmra.mxu2 %vm1122_vm5, %v6943_v2 }
 0x651   : > { %3870 = vmatmul.msk.f32.gmra.mxu2 %vm1122_vm5, %v6950_v58 }
 0x65c   : > { %v2472_v59 = vpop.f32.mrf.mxu2 }
 0x65d   : > { %v2473_v21 = vadd.f32 %v2472_v59, %v8090_v26 }
 0x65f   : > { %v3871_v55 = vmul.f32 -1.442695, %v2473_v21 }
 0x661   : > { %4321 = vpow2.f32 %v3871_v55 }
 0x664   : > { %v2475_v40 = vpop.f32.mrf.mxu2 }
 0x665   : > { %v2476_v13 = vadd.f32 %v2475_v40, %v8091_v54 }
 0x667   : > { %v3872_v0 = vmul.f32 -1.442695, %v2476_v13  ;;  %v4322_v52 = vpop.eup %4321 }
 0x668   : > { %v2544_v34 = vadd.f32 1.0, %v4322_v52 }
 0x66a   : > { %vm2557_vm9 = vweird.f32 %v2544_v34  ;;  %v2561_v24 = vand.u32 2147483647, %v2544_v34 }
 0x66c   : > { %v6954_v18 = vpop.f32.mrf.mxu2  ;;  %vm2562_vm13 = vcmp.eq.f32.partialorder %v2561_v24, 8.507059e+37 }
 0x674   : > { %v6957_v11 = vpop.f32.mrf.mxu2 }
 0x67c   : > { %v2484_v51 = vpop.f32.mrf.mxu2 }
 0x67d   : > { %v2485_v17 = vadd.f32 %v2484_v51, %v8092_v12 }
 0x67f   : > { %v3875_v8 = vmul.f32 -1.442695, %v2485_v17 }
 0x681   : > { %4323 = vpow2.f32 %v3875_v8 }
 0x682   : > { %4325 = vpow2.f32 %v3872_v0 }
 0x683   : > { %4327 = vrcp.f32 %v2544_v34 }
 0x684   : > { %v2487_v42 = vpop.f32.mrf.mxu2 }
 0x685   : > { %v2488_v49 = vadd.f32 %v2487_v42, %v8093_v10 }
 0x687   : > { %v4324_v37 = vpop.eup %4323  ;;  %v3876_v15 = vmul.f32 -1.442695, %v2488_v49 }
 0x688   : > { %v2548_v16 = vadd.f32 1.0, %v4324_v37  ;;  %v4326_v43 = vpop.eup %4325 }
 0x689   : > { %4329 = vpow2.f32 %v3876_v15  ;;  %v6962_v19 = vadd.f32 1.0, %v4326_v43  ;;  %v4328_v5 = vpop.eup %4327 }
 0x68a   : > { %4331 = vrcp.f32 %v2548_v16  ;;  %v2553_v21 = vmul.f32 %v4328_v5, %v2544_v34  ;;  %v2623_v32 = vand.u32 2147483648, %v2548_v16  ;;  %vm2617_vm4 = vweird.f32 %v2548_v16 }
 0x68b   : > { %4333 = vrcp.f32 %v6962_v19  ;;  %vm2558_vm6 = vweird.f32 %v4328_v5  ;;  %v2578_v24 = vand.u32 2147483648, %v6962_v19  ;;  %vm2572_vm15 = vweird.f32 %v6962_v19 }
 0x68c   : > { %v6964_v31 = vpop.f32.mrf.mxu2  ;;  %v2554_v17 = vsub.f32 1.0, %v2553_v21  ;;  %v2621_v21 = vand.u32 2147483647, %v2548_v16  ;;  %vm2559_vm2 = vmor %vm2557_vm9, %vm2558_vm6 }
 0x68e   : > { %v2555_v49 = vmul.f32 %v4328_v5, %v2554_v17  ;;  %v2624_v17 = vor.u32 1.1754944e-38, %v2623_v32  ;;  %vm2622_vm10 = vcmp.eq.f32.partialorder %v2621_v21, 8.507059e+37 }
 0x68f   : > { %v4330_v25 = vpop.eup %4329 }
 0x690   : > { %v4332_v20 = vpop.eup %4331  ;;  %v6967_v59 = vadd.f32 1.0, %v4330_v25  ;;  %v2556_v62 = vadd.f32 %v4328_v5, %v2555_v49 }
 0x691   : > { %v2613_v40 = vmul.f32 %v4332_v20, %v2548_v16  ;;  %v6972_v51 = vpop.eup %4333  ;;  %vm2618_vm1 = vweird.f32 %v4332_v20 }
 0x692   : > { %4335 = vrcp.f32 %v6967_v59  ;;  %v2568_v52 = vmul.f32 %v6972_v51, %v6962_v19  ;;  %vm2619_vm11 = vmor %vm2617_vm4, %vm2618_vm1  ;;  %vm2573_vm8 = vweird.f32 %v6972_v51  ;;  %vm2632_vm12 = vweird.f32 %v6967_v59 }
 0x693   : > { %v2614_v55 = vsub.f32 1.0, %v2613_v40  ;;  %vm2574_vm0 = vmor %vm2572_vm15, %vm2573_vm8 }
 0x694   : > { %v6970_v13 = vpop.f32.mrf.mxu2  ;;  %v2569_v25 = vsub.f32 1.0, %v2568_v52 }
 0x695   : > { %v2615_v8 = vmul.f32 %v4332_v20, %v2614_v55  ;;  %v2563_v55 = vand.u32 2147483648, %v2544_v34 }
 0x697   : > { %v2616_v43 = vadd.f32 %v4332_v20, %v2615_v8  ;;  %v2560_v8 = vsel %vm2559_vm2, %v4328_v5, %v2556_v62  ;;  %v2564_v52 = vor.u32 1.1754944e-38, %v2563_v55 }
 0x698   : > { %v4336_v0 = vpop.eup %4335 }
 0x699   : > { %v2628_v42 = vmul.f32 %v4336_v0, %v6967_v59  ;;  %v2620_v10 = vsel %vm2619_vm11, %v4332_v20, %v2616_v43  ;;  %vm2633_vm7 = vweird.f32 %v4336_v0  ;;  %v2576_v20 = vand.u32 2147483647, %v6962_v19 }
 0x69a   : > { %v2625_v12 = vsel %vm2622_vm10, %v2624_v17, %v2620_v10  ;;  %v2636_v10 = vand.u32 2147483647, %v6967_v59  ;;  %vm2634_vm14 = vmor %vm2632_vm12, %vm2633_vm7  ;;  %v2479_v17 = vadd.f32 %v6954_v18, %v8094_v53  ;;  %v2482_v19 = vadd.f32 %v6957_v11, %v8095_v57 }
 0x69b   : > { %v2629_v37 = vsub.f32 1.0, %v2628_v42  ;;  %v2570_v42 = vmul.f32 %v6972_v51, %v2569_v25  ;;  %v2752_v62 = vmul.f32 %v2625_v12, %v6643_v63  ;;  %v2579_v63 = vor.u32 1.1754944e-38, %v2578_v24 }
 0x69c   : > { %v2496_v15 = vpop.f32.mrf.mxu2  ;;  %vm2637_vm3 = vcmp.eq.f32.partialorder %v2636_v10, 8.507059e+37  ;;  %vm2577_vm1 = vcmp.eq.f32.partialorder %v2576_v20, 8.507059e+37 }
 0x69d   : > { %v2497_v40 = vadd.f32 %v2496_v15, %v8020_v9  ;;  %v2630_v60 = vmul.f32 %v4336_v0, %v2629_v37  ;;  %v2638_v37 = vand.u32 2147483648, %v6967_v59  ;;  %v2571_v32 = vadd.f32 %v6972_v51, %v2570_v42 }
 0x69f   : > { %4337 = vtanh.f32 %v2497_v40  ;;  %v2631_v16 = vadd.f32 %v4336_v0, %v2630_v60  ;;  %v2565_v40 = vsel %vm2562_vm13, %v2564_v52, %v2560_v8  ;;  %v2639_v25 = vor.u32 1.1754944e-38, %v2638_v37 }
 0x6a0   : > { %v2575_v12 = vsel %vm2574_vm0, %v6972_v51, %v2571_v32  ;;  %v2491_v52 = vadd.f32 %v6964_v31, %v8096_v4  ;;  %v2494_v51 = vadd.f32 %v6970_v13, %v8097_v30 }
 0x6a1   : > { %v2635_v43 = vsel %vm2634_vm14, %v4336_v0, %v2631_v16  ;;  %v2580_v42 = vsel %vm2577_vm1, %v2579_v63, %v2575_v12  ;;  %v3873_v16 = vmul.f32 -1.442695, %v2479_v17 }
 0x6a2   : > { %v2640_v59 = vsel %vm2637_vm3, %v2639_v25, %v2635_v43  ;;  %v3877_v37 = vmul.f32 -1.442695, %v2491_v52 }
 0x6a3   : > { %v2753_v0 = vmul.f32 %v2640_v59, %v6659_v6 }
 0x6a4   : > { %v2499_v49 = vpop.f32.mrf.mxu2 }
 0x6a5   : > { %v4338_v15 = vpop.eup %4337  ;;  %v2500_v34 = vadd.f32 %v2499_v49, %v8008_v61 }
 0x6a6   : > { %v2756_v5 = vmul.f32 %v4338_v15, %v2565_v40  ;;  %v3874_v15 = vmul.f32 -1.442695, %v2482_v19  ;;  %v3878_v40 = vmul.f32 -1.442695, %v2494_v51 }
 0x6a7   : > { %4339 = vtanh.f32 %v2500_v34 }
 0x6a8   : > { %v6987_v60 = vadd.f32 %v2756_v5, %v2752_v62  ;;  %4341 = vpow2.f32 %v3873_v16 }
 0x6a9   : > { %4343 = vpow2.f32 %v3874_v15 }
 0x6aa   : > { %4345 = vpow2.f32 %v3877_v37 }
 0x6ab   : > { %4347 = vpow2.f32 %v3878_v40 }
 0x6ac   : > { %v2502_v21 = vpop.f32.mrf.mxu2 }
 0x6ad   : > { %v4340_v55 = vpop.eup %4339 }
 0x6ae   : > { %v2757_v8 = vmul.f32 %v4340_v55, %v2580_v42  ;;  %v4342_v11 = vpop.eup %4341 }
 0x6af   : > { %v4344_v6 = vpop.eup %4343  ;;  %v7005_v31 = vadd.f32 1.0, %v4342_v11 }
 0x6b0   : > { %v7003_v49 = vadd.f32 %v2757_v8, %v2753_v0  ;;  %v4346_v32 = vpop.eup %4345  ;;  %v7007_v5 = vadd.f32 1.0, %v4344_v6 }
 0x6b1   : > { %v4348_v62 = vpop.eup %4347  ;;  %v7009_v13 = vadd.f32 1.0, %v4346_v32  ;;  %4349 = vrcp.f32 %v7005_v31  ;;  %vm2587_vm4 = vweird.f32 %v7005_v31 }
 0x6b2   : > { %v7011_v10 = vadd.f32 1.0, %v4348_v62  ;;  %4351 = vrcp.f32 %v7007_v5  ;;  %vm2602_vm11 = vweird.f32 %v7007_v5 }
 0x6b3   : > { %4353 = vrcp.f32 %v7009_v13  ;;  %vm2647_vm13 = vweird.f32 %v7009_v13 }
 0x6b4   : > { %v2505_v18 = vpop.f32.mrf.mxu2  ;;  %4355 = vrcp.f32 %v7011_v10  ;;  %vm2662_vm14 = vweird.f32 %v7011_v10 }
 0x6b5   : > { %v2506_v62 = vadd.f32 %v2505_v18, %v8012_v45 }
 0x6b7   : > { %v7019_v63 = vpop.eup %4349 }
 0x6b8   : > { %v7021_v59 = vpop.eup %4351  ;;  %v2583_v42 = vmul.f32 %v7019_v63, %v7005_v31  ;;  %vm2588_vm6 = vweird.f32 %v7019_v63 }
 0x6b9   : > { %v7023_v55 = vpop.eup %4353  ;;  %v2598_v0 = vmul.f32 %v7021_v59, %v7007_v5  ;;  %vm2603_vm9 = vweird.f32 %v7021_v59  ;;  %vm7068_vm7 = vmor %vm2587_vm4, %vm2588_vm6 }
 0x6ba   : > { %v7025_v17 = vpop.eup %4355  ;;  %v2643_v8 = vmul.f32 %v7023_v55, %v7009_v13  ;;  %v2584_v37 = vsub.f32 1.0, %v2583_v42  ;;  %vm2648_vm2 = vweird.f32 %v7023_v55  ;;  %vm7081_vm8 = vmor %vm2602_vm11, %vm2603_vm9 }
 0x6bb   : > { %v2658_v51 = vmul.f32 %v7025_v17, %v7011_v10  ;;  %v2599_v11 = vsub.f32 1.0, %v2598_v0  ;;  %v2593_v0 = vand.u32 2147483648, %v7005_v31  ;;  %vm2663_vm10 = vweird.f32 %v7025_v17  ;;  %vm7088_vm12 = vmor %vm2647_vm13, %vm2648_vm2 }
 0x6bc   : > { %v2508_v34 = vpop.f32.mrf.mxu2  ;;  %v2644_v6 = vsub.f32 1.0, %v2643_v8  ;;  %vm7101_vm15 = vmor %vm2662_vm14, %vm2663_vm10 }
 0x6bd   : > { %v2509_v24 = vadd.f32 %v2508_v34, %v8098_v41  ;;  %v2503_v34 = vadd.f32 %v2502_v21, %v8009_v48  ;;  %v2659_v32 = vsub.f32 1.0, %v2658_v51  ;;  %v2600_v21 = vmul.f32 %v7021_v59, %v2599_v11 }
 0x6be   : > { %v2645_v42 = vmul.f32 %v7023_v55, %v2644_v6  ;;  %v2653_v11 = vand.u32 2147483648, %v7009_v13 }
 0x6bf   : > { %v3879_v25 = vmul.f32 -1.442695, %v2509_v24  ;;  %v2660_v18 = vmul.f32 %v7025_v17, %v2659_v32 }
 0x6c1   : > { %4357 = vpow2.f32 %v3879_v25 }
 0x6c4   : > { %v2511_v20 = vpop.f32.mrf.mxu2 }
 0x6c5   : > { %v2512_v43 = vadd.f32 %v2511_v20, %v8099_v56  ;;  %v2585_v20 = vmul.f32 %v7019_v63, %v2584_v37  ;;  %v2646_v37 = vadd.f32 %v7023_v55, %v2645_v42 }
 0x6c7   : > { %v3880_v12 = vmul.f32 -1.442695, %v2512_v43  ;;  %v4358_v15 = vpop.eup %4357  ;;  %v2591_v43 = vand.u32 2147483647, %v7005_v31 }
 0x6c8   : > { %v7038_v24 = vadd.f32 1.0, %v4358_v15 }
 0x6c9   : > { %4359 = vpow2.f32 %v3880_v12  ;;  %vm2592_vm0 = vcmp.eq.f32.partialorder %v2591_v43, 8.507059e+37 }
 0x6ca   : > { %vm2697_vm6 = vweird.f32 %v7038_v24 }
 0x6cc   : > { %v2514_v19 = vpop.f32.mrf.mxu2 }
 0x6cd   : > { %v2515_v52 = vadd.f32 %v2514_v19, %v8100_v44 }
 0x6cf   : > { %v3881_v16 = vmul.f32 -1.442695, %v2515_v52  ;;  %v4360_v40 = vpop.eup %4359  ;;  %v2608_v52 = vand.u32 2147483648, %v7007_v5 }
 0x6d0   : > { %v7043_v25 = vadd.f32 1.0, %v4360_v40  ;;  %v2601_v40 = vadd.f32 %v7021_v59, %v2600_v21 }
 0x6d1   : > { %4361 = vpow2.f32 %v3881_v16  ;;  %v2586_v16 = vadd.f32 %v7019_v63, %v2585_v20  ;;  %v2651_v20 = vand.u32 2147483647, %v7009_v13 }
 0x6d2   : > { %4363 = vtanh.f32 %v2503_v34  ;;  %v2661_v34 = vadd.f32 %v7025_v17, %v2660_v18  ;;  %v2605_v6 = vsel %vm7081_vm8, %v7021_v59, %v2601_v40  ;;  %vm2712_vm13 = vweird.f32 %v7043_v25 }
 0x6d3   : > { %4365 = vtanh.f32 %v2506_v62  ;;  %v2668_v62 = vand.u32 2147483648, %v7011_v10  ;;  %v2590_v13 = vsel %vm7068_vm7, %v7019_v63, %v2586_v16  ;;  %v2609_v16 = vor.u32 1.1754944e-38, %v2608_v52 }
 0x6d4   : > { %v2517_v12 = vpop.f32.mrf.mxu2  ;;  %4367 = vrcp.f32 %v7038_v24  ;;  %vm2652_vm3 = vcmp.eq.f32.partialorder %v2651_v20, 8.507059e+37 }
 0x6d5   : > { %v2518_v19 = vadd.f32 %v2517_v12, %v8019_v23  ;;  %4369 = vrcp.f32 %v7043_v25  ;;  %v2606_v12 = vand.u32 2147483647, %v7007_v5  ;;  %v2665_v23 = vsel %vm7101_vm15, %v7025_v17, %v2661_v34 }
 0x6d6   : > { %v2669_v48 = vor.u32 1.1754944e-38, %v2668_v62 }
 0x6d7   : > { %v4362_v8 = vpop.eup %4361  ;;  %v3882_v51 = vmul.f32 -1.442695, %v2518_v19  ;;  %v2666_v19 = vand.u32 2147483647, %v7011_v10  ;;  %v2654_v10 = vor.u32 1.1754944e-38, %v2653_v11  ;;  %vm2607_vm1 = vcmp.eq.f32.partialorder %v2606_v12, 8.507059e+37 }
 0x6d8   : > { %v7057_v15 = vadd.f32 1.0, %v4362_v8  ;;  %v4364_v32 = vpop.eup %4363  ;;  %v2594_v8 = vor.u32 1.1754944e-38, %v2593_v0 }
 0x6d9   : > { %4371 = vpow2.f32 %v3882_v51  ;;  %v4366_v42 = vpop.eup %4365  ;;  %v2650_v51 = vsel %vm7088_vm12, %v7023_v55, %v2646_v37  ;;  %v2610_v37 = vsel %vm2607_vm1, %v2609_v16, %v2605_v6  ;;  %vm2667_vm4 = vcmp.eq.f32.partialorder %v2666_v19, 8.507059e+37 }
 0x6da   : > { %4373 = vrcp.f32 %v7057_v15  ;;  %v7097_v18 = vpop.eup %4367  ;;  %v2595_v0 = vsel %vm2592_vm0, %v2594_v8, %v2590_v13  ;;  %v2655_v55 = vsel %vm2652_vm3, %v2654_v10, %v2650_v51  ;;  %v2670_v31 = vsel %vm2667_vm4, %v2669_v48, %v2665_v23 }
 0x6db   : > { %v7111_v63 = vpop.eup %4369  ;;  %v2758_v40 = vmul.f32 %v4364_v32, %v2595_v0  ;;  %v2759_v17 = vmul.f32 %v4366_v42, %v2610_v37  ;;  %v2693_v11 = vmul.f32 %v7097_v18, %v7038_v24  ;;  %v2754_v34 = vmul.f32 %v2655_v55, %v6782_v28 }
 0x6dc   : > { %v2708_v43 = vmul.f32 %v7111_v63, %v7043_v25  ;;  %v2755_v20 = vmul.f32 %v2670_v31, %v6784_v14  ;;  %vm2713_vm9 = vweird.f32 %v7111_v63  ;;  %vm2727_vm2 = vweird.f32 %v7057_v15 }
 0x6dd   : > { %v7126_v12 = vadd.f32 %v2758_v40, %v2754_v34  ;;  %v2694_v23 = vsub.f32 1.0, %v2693_v11  ;;  %v2731_v51 = vand.u32 2147483647, %v7057_v15  ;;  %v2733_v6 = vand.u32 2147483648, %v7057_v15  ;;  %vm7157_vm14 = vmor %vm2712_vm13, %vm2713_vm9 }
 0x6de   : > { %v7128_v48 = vadd.f32 %v2759_v17, %v2755_v20  ;;  %v2716_v40 = vand.u32 2147483647, %v7043_v25  ;;  %v2718_v31 = vand.u32 2147483648, %v7043_v25  ;;  %vm2698_vm8 = vweird.f32 %v7097_v18 }
 0x6df   : > { %v4372_v45 = vpop.eup %4371  ;;  %v2695_v28 = vmul.f32 %v7097_v18, %v2694_v23  ;;  %v2701_v20 = vand.u32 2147483647, %v7038_v24  ;;  %vm2732_vm3 = vcmp.eq.f32.partialorder %v2731_v51, 8.507059e+37  ;;  %vm2699_vm1 = vmor %vm2697_vm6, %vm2698_vm8 }
 0x6e0   : > { %v7116_v21 = vpop.eup %4373  ;;  %v2691_v59 = vadd.f32 1.0, %v4372_v45  ;;  %v2709_v45 = vsub.f32 1.0, %v2708_v43  ;;  %vm2717_vm4 = vcmp.eq.f32.partialorder %v2716_v40, 8.507059e+37 }
 0x6e1   : > { %v2723_v52 = vmul.f32 %v7116_v21, %v7057_v15  ;;  %vm2728_vm11 = vweird.f32 %v7116_v21  ;;  %v2696_v11 = vadd.f32 %v7097_v18, %v2695_v28 }
 0x6e2   : > { %4375 = vrcp.f32 %v2691_v59  ;;  %v2710_v19 = vmul.f32 %v7111_v63, %v2709_v45  ;;  %v2748_v8 = vand.u32 2147483648, %v2691_v59  ;;  %v2746_v16 = vand.u32 2147483647, %v2691_v59  ;;  %vm7144_vm7 = vmor %vm2727_vm2, %vm2728_vm11 }
 0x6e3   : > { %v2724_v62 = vsub.f32 1.0, %v2723_v52  ;;  %4377 = vtanh.f32 %v7003_v49  ;;  %vm2742_vm12 = vweird.f32 %v2691_v59  ;;  %vm2702_vm11 = vcmp.eq.f32.partialorder %v2701_v20, 8.507059e+37 }
 0x6e4   : > { %4379 = vtanh.f32 %v7126_v12  ;;  %v2711_v0 = vadd.f32 %v7111_v63, %v2710_v19  ;;  %v2749_v25 = vor.u32 1.1754944e-38, %v2748_v8  ;;  %vm2747_vm0 = vcmp.eq.f32.partialorder %v2746_v16, 8.507059e+37 }
 0x6e5   : > { %v2725_v32 = vmul.f32 %v7116_v21, %v2724_v62  ;;  %4381 = vtanh.f32 %v7128_v48  ;;  %v2734_v62 = vor.u32 1.1754944e-38, %v2733_v6 }
 0x6e6   : > { %4383 = vtanh.f32 %v6987_v60 }
 0x6e7   : > { %v2726_v5 = vadd.f32 %v7116_v21, %v2725_v32 }
 0x6e8   : > { %v4376_v13 = vpop.eup %4375 }
 0x6e9   : > { %v2738_v42 = vmul.f32 %v4376_v13, %v2691_v59  ;;  %vm2743_vm10 = vweird.f32 %v4376_v13  ;;  %v4378_v55 = vpop.eup %4377  ;;  %v2730_v52 = vsel %vm7144_vm7, %v7116_v21, %v2726_v5  ;;  %v2703_v59 = vand.u32 2147483648, %v7038_v24 }
 0x6ea   : > { %v4380_v43 = vpop.eup %4379  ;;  %vm2744_vm15 = vmor %vm2742_vm12, %vm2743_vm10  ;;  %v2715_v21 = vsel %vm7157_vm14, %v7111_v63, %v2711_v0  ;;  %v2735_v32 = vsel %vm2732_vm3, %v2734_v62, %v2730_v52 }
 0x6eb   : > { %v2739_v14 = vsub.f32 1.0, %v2738_v42  ;;  %v4382_v34 = vpop.eup %4381  ;;  %v2719_v42 = vor.u32 1.1754944e-38, %v2718_v31  ;;  %v7177_v63 = vmul.f32 %v4380_v43, %v2735_v32 }
 0x6ec   : > { %v4384_v24 = vpop.eup %4383 }
 0x6ed   : > { %v2740_v10 = vmul.f32 %v4376_v13, %v2739_v14  ;;  %v2720_v28 = vsel %vm2717_vm4, %v2719_v42, %v2715_v21  ;;  %v2704_v14 = vor.u32 1.1754944e-38, %v2703_v59 }
 0x6ee   : > { %v7180_v8 = vmul.f32 %v4378_v55, %v2720_v28 }
 0x6ef   : > { %v2741_v15 = vadd.f32 %v4376_v13, %v2740_v10 }
 0x6f1   : > { %v2745_v45 = vsel %vm2744_vm15, %v4376_v13, %v2741_v15  ;;  %v2700_v13 = vsel %vm2699_vm1, %v7097_v18, %v2696_v11 }
 0x6f2   : > { %v2750_v23 = vsel %vm2747_vm0, %v2749_v25, %v2745_v45  ;;  %v2705_v5 = vsel %vm2702_vm11, %v2704_v14, %v2700_v13 }
 0x6f3   : > { %v7173_v19 = vmul.f32 %v4382_v34, %v2750_v23  ;;  %v7183_v51 = vmul.f32 %v4384_v24, %v2705_v5 }
 0x6f5   : > { %2788 = vmatpush.msra.mxu3 %v7173_v19 }
 0x6f7   : > { %2789 = vmatpush.msra.mxu3 %v7177_v63 }
 0x6f9   : > { %2790 = vmatpush.msra.mxu3 %v7180_v8 }
 0x6fb   : > { %2791 = vmatpush.msra.mxu3 %v7183_v51 }
 0x6fc   : > { %3883 = vmatmul.msk.f32.vlgmr.msra.gmra.mxu3 %vm1122_vm5, %v6845_v27 }
 0x704   : > { %3884 = vmatmul.msk.f32.gmra.mxu3 %vm1122_vm5, %v6852_v47 }
 0x70c   : > { %3885 = vmatmul.msk.f32.gmra.mxu3 %vm1122_vm5, %v6859_v39 }
 0x714   : > { %3886 = vmatmul.msk.f32.gmra.mxu3 %vm1122_vm5, %v6866_v36 }
 0x71c   : > { %3887 = vmatmul.msk.f32.gmra.mxu3 %vm1122_vm5, %v6873_v3 }
 0x724   : > { %3888 = vmatmul.msk.f32.gmra.mxu3 %vm1122_vm5, %v6880_v46 }
 0x72c   : > { %3889 = vmatmul.msk.f32.gmra.mxu3 %vm1122_vm5, %v6887_v35 }
 0x734   : > { %3890 = vmatmul.msk.f32.gmra.mxu3 %vm1122_vm5, %v6894_v22 }
 0x73c   : > { %3891 = vmatmul.msk.f32.gmra.mxu3 %vm1122_vm5, %v6901_v50  ;;  %v8129_v50 = vld [vmem:[#allocation23_spill] sm:$0xff] }
 0x744   : > { %3892 = vmatmul.msk.f32.gmra.mxu3 %vm1122_vm5, %v6908_v33 }
 0x74c   : > { %3893 = vmatmul.msk.f32.gmra.mxu3 %vm1122_vm5, %v6915_v29 }
 0x754   : > { %3894 = vmatmul.msk.f32.gmra.mxu3 %vm1122_vm5, %v6922_v1 }
 0x75c   : > { %3895 = vmatmul.msk.f32.gmra.mxu3 %vm1122_vm5, %v6929_v38 }
 0x764   : > { %3896 = vmatmul.msk.f32.gmra.mxu3 %vm1122_vm5, %v6936_v7 }
 0x76c   : > { %3897 = vmatmul.msk.f32.gmra.mxu3 %vm1122_vm5, %v6943_v2 }
 0x774   : > { %3898 = vmatmul.msk.f32.gmra.mxu3 %vm1122_vm5, %v6950_v58  ;;  %v8130_v58 = vld [vmem:[#allocation16_spill] sm:$0xff] }
 0x77f   : > { %v2793_v27 = vpop.f32.mrf.mxu3 }
 0x780   : > { %v2794_v36 = vadd.f32 %v2793_v27, %v8090_v26 }
 0x782   : > { %v3899_v46 = vmul.f32 -1.442695, %v2794_v36 }
 0x784   : > { %4385 = vpow2.f32 %v3899_v46 }
 0x787   : > { %v2796_v47 = vpop.f32.mrf.mxu3 }
 0x788   : > { %v2797_v35 = vadd.f32 %v2796_v47, %v8091_v54 }
 0x78a   : > { %v3900_v29 = vmul.f32 -1.442695, %v2797_v35  ;;  %v4386_v38 = vpop.eup %4385 }
 0x78b   : > { %v2865_v7 = vadd.f32 1.0, %v4386_v38 }
 0x78d   : > { %v2884_v47 = vand.u32 2147483648, %v2865_v7  ;;  %vm2878_vm7 = vweird.f32 %v2865_v7  ;;  %v2882_v46 = vand.u32 2147483647, %v2865_v7 }
 0x78f   : > { %v7218_v39 = vpop.f32.mrf.mxu3  ;;  %vm2883_vm14 = vcmp.eq.f32.partialorder %v2882_v46, 8.507059e+37 }
 0x797   : > { %v7221_v3 = vpop.f32.mrf.mxu3 }
 0x79f   : > { %v2805_v22 = vpop.f32.mrf.mxu3 }
 0x7a0   : > { %v2806_v33 = vadd.f32 %v2805_v22, %v8129_v50 }
 0x7a2   : > { %v3903_v1 = vmul.f32 -1.442695, %v2806_v33 }
 0x7a4   : > { %4387 = vpow2.f32 %v3903_v1  ;;  %v2885_v1 = vor.u32 1.1754944e-38, %v2884_v47 }
 0x7a5   : > { %4389 = vpow2.f32 %v3900_v29 }
 0x7a6   : > { %4391 = vrcp.f32 %v2865_v7 }
 0x7a7   : > { %v2808_v2 = vpop.f32.mrf.mxu3 }
 0x7a8   : > { %v2809_v18 = vadd.f32 %v2808_v2, %v8130_v58 }
 0x7aa   : > { %v4388_v6 = vpop.eup %4387  ;;  %v3904_v10 = vmul.f32 -1.442695, %v2809_v18 }
 0x7ab   : > { %v2869_v16 = vadd.f32 1.0, %v4388_v6  ;;  %v4390_v0 = vpop.eup %4389 }
 0x7ac   : > { %4393 = vpow2.f32 %v3904_v10  ;;  %v7226_v55 = vadd.f32 1.0, %v4390_v0  ;;  %v4392_v40 = vpop.eup %4391 }
 0x7ad   : > { %4395 = vrcp.f32 %v2869_v16  ;;  %v2874_v17 = vmul.f32 %v4392_v40, %v2865_v7  ;;  %v2944_v14 = vand.u32 2147483648, %v2869_v16  ;;  %vm2938_vm9 = vweird.f32 %v2869_v16 }
 0x7ae   : > { %4397 = vrcp.f32 %v7226_v55  ;;  %vm2879_vm2 = vweird.f32 %v4392_v40  ;;  %v2942_v27 = vand.u32 2147483647, %v2869_v16  ;;  %vm2893_vm1 = vweird.f32 %v7226_v55 }
 0x7af   : > { %v7228_v37 = vpop.f32.mrf.mxu3  ;;  %v2875_v62 = vsub.f32 1.0, %v2874_v17  ;;  %v2945_v22 = vor.u32 1.1754944e-38, %v2944_v14  ;;  %vm2880_vm13 = vmor %vm2878_vm7, %vm2879_vm2 }
 0x7b0   : > { %vm2943_vm8 = vcmp.eq.f32.partialorder %v2942_v27, 8.507059e+37 }
 0x7b1   : > { %v2876_v23 = vmul.f32 %v4392_v40, %v2875_v62 }
 0x7b2   : > { %v4394_v31 = vpop.eup %4393 }
 0x7b3   : > { %v4396_v43 = vpop.eup %4395  ;;  %v7231_v15 = vadd.f32 1.0, %v4394_v31  ;;  %v2877_v24 = vadd.f32 %v4392_v40, %v2876_v23 }
 0x7b4   : > { %v2934_v52 = vmul.f32 %v4396_v43, %v2869_v16  ;;  %v7236_v25 = vpop.eup %4397  ;;  %vm2939_vm6 = vweird.f32 %v4396_v43 }
 0x7b5   : > { %4399 = vrcp.f32 %v7231_v15  ;;  %v2889_v45 = vmul.f32 %v7236_v25, %v7226_v55  ;;  %vm2940_vm10 = vmor %vm2938_vm9, %vm2939_vm6  ;;  %v2881_v29 = vsel %vm2880_vm13, %v4392_v40, %v2877_v24  ;;  %vm2894_vm15 = vweird.f32 %v7236_v25 }
 0x7b6   : > { %v2935_v11 = vsub.f32 1.0, %v2934_v52  ;;  %v2959_v10 = vand.u32 2147483648, %v7231_v15  ;;  %v2886_v16 = vsel %vm2883_vm14, %v2885_v1, %v2881_v29  ;;  %vm2953_vm0 = vweird.f32 %v7231_v15  ;;  %vm2895_vm4 = vmor %vm2893_vm1, %vm2894_vm15 }
 0x7b7   : > { %v7234_v34 = vpop.f32.mrf.mxu3  ;;  %v2890_v28 = vsub.f32 1.0, %v2889_v45  ;;  %v2899_v52 = vand.u32 2147483648, %v7226_v55 }
 0x7b8   : > { %v2936_v59 = vmul.f32 %v4396_v43, %v2935_v11  ;;  %v2897_v11 = vand.u32 2147483647, %v7226_v55  ;;  %v2803_v55 = vadd.f32 %v7221_v3, %v8095_v57 }
 0x7b9   : > { %v2891_v33 = vmul.f32 %v7236_v25, %v2890_v28  ;;  %v2900_v45 = vor.u32 1.1754944e-38, %v2899_v52  ;;  %v2812_v28 = vadd.f32 %v7228_v37, %v8096_v4 }
 0x7ba   : > { %v2937_v13 = vadd.f32 %v4396_v43, %v2936_v59  ;;  %v2960_v59 = vor.u32 1.1754944e-38, %v2959_v10  ;;  %vm2898_vm6 = vcmp.eq.f32.partialorder %v2897_v11, 8.507059e+37  ;;  %v3902_v24 = vmul.f32 -1.442695, %v2803_v55 }
 0x7bb   : > { %v4400_v20 = vpop.eup %4399  ;;  %v2892_v0 = vadd.f32 %v7236_v25, %v2891_v33  ;;  %v3905_v27 = vmul.f32 -1.442695, %v2812_v28 }
 0x7bc   : > { %v2949_v21 = vmul.f32 %v4400_v20, %v7231_v15  ;;  %v2941_v35 = vsel %vm2940_vm10, %v4396_v43, %v2937_v13  ;;  %vm2954_vm12 = vweird.f32 %v4400_v20  ;;  %v2957_v43 = vand.u32 2147483647, %v7231_v15 }
 0x7bd   : > { %v2946_v38 = vsel %vm2943_vm8, %v2945_v22, %v2941_v35  ;;  %vm2955_vm3 = vmor %vm2953_vm0, %vm2954_vm12 }
 0x7be   : > { %v2950_v32 = vsub.f32 1.0, %v2949_v21  ;;  %v3073_v40 = vmul.f32 %v2946_v38, %v6987_v60  ;;  %v2896_v60 = vsel %vm2895_vm4, %v7236_v25, %v2892_v0  ;;  %vm2958_vm11 = vcmp.eq.f32.partialorder %v2957_v43, 8.507059e+37 }
 0x7bf   : > { %v2817_v42 = vpop.f32.mrf.mxu3  ;;  %v2815_v25 = vadd.f32 %v7234_v34, %v8097_v30 }
 0x7c0   : > { %v2818_v5 = vadd.f32 %v2817_v42, %v8020_v9  ;;  %v2951_v36 = vmul.f32 %v4400_v20, %v2950_v32  ;;  %v2800_v32 = vadd.f32 %v7218_v39, %v8094_v53  ;;  %v2901_v42 = vsel %vm2898_vm6, %v2900_v45, %v2896_v60 }
 0x7c1   : > { %v3906_v47 = vmul.f32 -1.442695, %v2815_v25 }
 0x7c2   : > { %4401 = vtanh.f32 %v2818_v5  ;;  %v2952_v18 = vadd.f32 %v4400_v20, %v2951_v36  ;;  %v3901_v5 = vmul.f32 -1.442695, %v2800_v32  ;;  %v8131_v32 = vld [vmem:[#allocation29_spill] sm:$0xff] }
 0x7c4   : > { %v2956_v62 = vsel %vm2955_vm3, %v4400_v20, %v2952_v18 }
 0x7c5   : > { %v2961_v15 = vsel %vm2958_vm11, %v2960_v59, %v2956_v62 }
 0x7c6   : > { %v3074_v20 = vmul.f32 %v2961_v15, %v7003_v49 }
 0x7c7   : > { %v2820_v2 = vpop.f32.mrf.mxu3 }
 0x7c8   : > { %v4402_v6 = vpop.eup %4401  ;;  %v2821_v7 = vadd.f32 %v2820_v2, %v8008_v61 }
 0x7c9   : > { %v3077_v31 = vmul.f32 %v4402_v6, %v2886_v16 }
 0x7ca   : > { %4403 = vtanh.f32 %v2821_v7 }
 0x7cb   : > { %v7251_v17 = vadd.f32 %v3077_v31, %v3073_v40  ;;  %4405 = vpow2.f32 %v3901_v5 }
 0x7cc   : > { %4407 = vpow2.f32 %v3902_v24 }
 0x7cd   : > { %4409 = vpow2.f32 %v3905_v27 }
 0x7ce   : > { %4411 = vpow2.f32 %v3906_v47 }
 0x7cf   : > { %v2823_v21 = vpop.f32.mrf.mxu3 }
 0x7d0   : > { %v4404_v23 = vpop.eup %4403 }
 0x7d1   : > { %v3078_v13 = vmul.f32 %v4404_v23, %v2901_v42  ;;  %v4406_v3 = vpop.eup %4405  ;;  %v2824_v42 = vadd.f32 %v2823_v21, %v8131_v32 }
 0x7d2   : > { %v4408_v49 = vpop.eup %4407  ;;  %v7269_v37 = vadd.f32 1.0, %v4406_v3  ;;  %v8133_v3 = vld [vmem:[#allocation19_spill] sm:$0xff] }
 0x7d3   : > { %v7267_v14 = vadd.f32 %v3078_v13, %v3074_v20  ;;  %v4410_v46 = vpop.eup %4409  ;;  %v7271_v22 = vadd.f32 1.0, %v4408_v49  ;;  %v8132_v20 = vld [vmem:[#allocation24_spill] sm:$0xff] }
 0x7d4   : > { %v4412_v35 = vpop.eup %4411  ;;  %v7273_v34 = vadd.f32 1.0, %v4410_v46  ;;  %4413 = vrcp.f32 %v7269_v37  ;;  %vm2908_vm9 = vweird.f32 %v7269_v37  ;;  %v2912_v5 = vand.u32 2147483647, %v7269_v37 }
 0x7d5   : > { %v7275_v33 = vadd.f32 1.0, %v4412_v35  ;;  %4415 = vrcp.f32 %v7271_v22  ;;  %vm2923_vm10 = vweird.f32 %v7271_v22  ;;  %v2929_v35 = vand.u32 2147483648, %v7271_v22 }
 0x7d6   : > { %4417 = vrcp.f32 %v7273_v34  ;;  %vm2968_vm14 = vweird.f32 %v7273_v34  ;;  %vm2913_vm4 = vcmp.eq.f32.partialorder %v2912_v5, 8.507059e+37 }
 0x7d7   : > { %v2826_v39 = vpop.f32.mrf.mxu3  ;;  %4419 = vrcp.f32 %v7275_v33  ;;  %vm2983_vm3 = vweird.f32 %v7275_v33 }
 0x7d8   : > { %v2827_v13 = vadd.f32 %v2826_v39, %v8132_v20 }
 0x7da   : > { %v7283_v6 = vpop.eup %4413 }
 0x7db   : > { %v7285_v10 = vpop.eup %4415  ;;  %v2904_v0 = vmul.f32 %v7283_v6, %v7269_v37  ;;  %vm2909_vm2 = vweird.f32 %v7283_v6 }
 0x7dc   : > { %v7287_v16 = vpop.eup %4417  ;;  %v2919_v31 = vmul.f32 %v7285_v10, %v7271_v22  ;;  %vm2924_vm7 = vweird.f32 %v7285_v10  ;;  %vm7332_vm12 = vmor %vm2908_vm9, %vm2909_vm2 }
 0x7dd   : > { %v7289_v7 = vpop.eup %4419  ;;  %v2964_v43 = vmul.f32 %v7287_v16, %v7273_v34  ;;  %v2905_v60 = vsub.f32 1.0, %v2904_v0  ;;  %vm2969_vm13 = vweird.f32 %v7287_v16  ;;  %v2974_v0 = vand.u32 2147483648, %v7273_v34  ;;  %vm7345_vm15 = vmor %vm2923_vm10, %vm2924_vm7 }
 0x7de   : > { %v2979_v11 = vmul.f32 %v7289_v7, %v7275_v33  ;;  %v2920_v15 = vsub.f32 1.0, %v2919_v31  ;;  %vm2984_vm8 = vweird.f32 %v7289_v7  ;;  %vm7352_vm0 = vmor %vm2968_vm14, %vm2969_vm13 }
 0x7df   : > { %v2829_v36 = vpop.f32.mrf.mxu3  ;;  %v2965_v23 = vsub.f32 1.0, %v2964_v43  ;;  %v2906_v25 = vmul.f32 %v7283_v6, %v2905_v60  ;;  %vm7365_vm1 = vmor %vm2983_vm3, %vm2984_vm8 }
 0x7e0   : > { %v2830_v29 = vadd.f32 %v2829_v36, %v8098_v41  ;;  %v2980_v55 = vsub.f32 1.0, %v2979_v11  ;;  %v2921_v21 = vmul.f32 %v7285_v10, %v2920_v15  ;;  %v2914_v36 = vand.u32 2147483648, %v7269_v37 }
 0x7e1   : > { %v2966_v47 = vmul.f32 %v7287_v16, %v2965_v23  ;;  %v2972_v11 = vand.u32 2147483647, %v7273_v34 }
 0x7e2   : > { %v3907_v2 = vmul.f32 -1.442695, %v2830_v29  ;;  %v2981_v39 = vmul.f32 %v7289_v7, %v2980_v55  ;;  %v2915_v23 = vor.u32 1.1754944e-38, %v2914_v36 }
 0x7e3   : > { %vm2973_vm11 = vcmp.eq.f32.partialorder %v2972_v11, 8.507059e+37 }
 0x7e4   : > { %4421 = vpow2.f32 %v3907_v2  ;;  %v2967_v2 = vadd.f32 %v7287_v16, %v2966_v47  ;;  %v2982_v31 = vadd.f32 %v7289_v7, %v2981_v39 }
 0x7e7   : > { %v2832_v1 = vpop.f32.mrf.mxu3 }
 0x7e8   : > { %v2833_v38 = vadd.f32 %v2832_v1, %v8099_v56  ;;  %v2907_v1 = vadd.f32 %v7283_v6, %v2906_v25  ;;  %v2986_v25 = vsel %vm7365_vm1, %v7289_v7, %v2982_v31 }
 0x7ea   : > { %v3908_v18 = vmul.f32 -1.442695, %v2833_v38  ;;  %v4422_v59 = vpop.eup %4421  ;;  %v2911_v34 = vsel %vm7332_vm12, %v7283_v6, %v2907_v1 }
 0x7eb   : > { %v7302_v28 = vadd.f32 1.0, %v4422_v59 }
 0x7ec   : > { %4423 = vpow2.f32 %v3908_v18  ;;  %v2922_v18 = vadd.f32 %v7285_v10, %v2921_v21  ;;  %v2916_v21 = vsel %vm2913_vm4, %v2915_v23, %v2911_v34 }
 0x7ed   : > { %vm3018_vm2 = vweird.f32 %v7302_v28 }
 0x7ee   : > { %v2926_v55 = vsel %vm7345_vm15, %v7285_v10, %v2922_v18 }
 0x7ef   : > { %v2835_v40 = vpop.f32.mrf.mxu3 }
 0x7f0   : > { %v2836_v52 = vadd.f32 %v2835_v40, %v8100_v44 }
 0x7f2   : > { %v3909_v62 = vmul.f32 -1.442695, %v2836_v52  ;;  %v4424_v45 = vpop.eup %4423  ;;  %v2989_v52 = vand.u32 2147483648, %v7275_v33 }
 0x7f3   : > { %v7307_v24 = vadd.f32 1.0, %v4424_v45  ;;  %v2987_v45 = vand.u32 2147483647, %v7275_v33  ;;  %v2975_v33 = vor.u32 1.1754944e-38, %v2974_v0 }
 0x7f4   : > { %4425 = vpow2.f32 %v3909_v62  ;;  %v2927_v62 = vand.u32 2147483647, %v7271_v22  ;;  %v2990_v47 = vor.u32 1.1754944e-38, %v2989_v52 }
 0x7f5   : > { %4427 = vtanh.f32 %v2824_v42  ;;  %v2971_v42 = vsel %vm7352_vm0, %v7287_v16, %v2967_v2  ;;  %vm2988_vm9 = vcmp.eq.f32.partialorder %v2987_v45, 8.507059e+37  ;;  %vm3033_vm14 = vweird.f32 %v7307_v24 }
 0x7f6   : > { %4429 = vtanh.f32 %v2827_v13  ;;  %v2930_v13 = vor.u32 1.1754944e-38, %v2929_v35  ;;  %vm2928_vm6 = vcmp.eq.f32.partialorder %v2927_v62, 8.507059e+37  ;;  %v2976_v16 = vsel %vm2973_vm11, %v2975_v33, %v2971_v42  ;;  %v4558_v33 = vld [vmem:[%s7846_s4 + $0x68] sm:$0xff] }
 0x7f7   : > { %v2838_v27 = vpop.f32.mrf.mxu3  ;;  %4431 = vrcp.f32 %v7302_v28  ;;  %v3075_v1 = vmul.f32 %v2976_v16, %v7126_v12 }
 0x7f8   : > { %v2839_v49 = vadd.f32 %v2838_v27, %v8133_v3  ;;  %4433 = vrcp.f32 %v7307_v24  ;;  %v2931_v39 = vsel %vm2928_vm6, %v2930_v13, %v2926_v55  ;;  %v3037_v13 = vand.u32 2147483647, %v7307_v24 }
 0x7fa   : > { %v4426_v46 = vpop.eup %4425  ;;  %v3910_v29 = vmul.f32 -1.442695, %v2839_v49 }
 0x7fb   : > { %v7321_v38 = vadd.f32 1.0, %v4426_v46  ;;  %v4428_v43 = vpop.eup %4427  ;;  %v2991_v46 = vsel %vm2988_vm9, %v2990_v47, %v2986_v25  ;;  %v3039_v25 = vand.u32 2147483648, %v7307_v24  ;;  %vm3038_vm9 = vcmp.eq.f32.partialorder %v3037_v13, 8.507059e+37  ;;  %v4559_v13 = vld [vmem:[%s7846_s4 + $0x70] sm:$0xff] }
 0x7fc   : > { %4435 = vpow2.f32 %v3910_v29  ;;  %v4430_v59 = vpop.eup %4429  ;;  %v3079_v36 = vmul.f32 %v4428_v43, %v2916_v21  ;;  %v3076_v18 = vmul.f32 %v2991_v46, %v7128_v48  ;;  %v3022_v46 = vand.u32 2147483647, %v7302_v28 }
 0x7fd   : > { %4437 = vrcp.f32 %v7321_v38  ;;  %v7361_v15 = vpop.eup %4431  ;;  %v3080_v7 = vmul.f32 %v4430_v59, %v2931_v39  ;;  %vm3048_vm13 = vweird.f32 %v7321_v38  ;;  %v3052_v34 = vand.u32 2147483647, %v7321_v38 }
 0x7fe   : > { %v7375_v6 = vpop.eup %4433  ;;  %v3014_v29 = vmul.f32 %v7361_v15, %v7302_v28  ;;  %v7390_v0 = vadd.f32 %v3079_v36, %v3075_v1  ;;  %v3054_v45 = vand.u32 2147483648, %v7321_v38  ;;  %vm3019_vm15 = vweird.f32 %v7361_v15 }
 0x7ff   : > { %v3029_v5 = vmul.f32 %v7375_v6, %v7307_v24  ;;  %v7392_v31 = vadd.f32 %v3080_v7, %v3076_v18  ;;  %vm3034_vm7 = vweird.f32 %v7375_v6  ;;  %vm3053_vm11 = vcmp.eq.f32.partialorder %v3052_v34, 8.507059e+37  ;;  %vm3020_vm6 = vmor %vm3018_vm2, %vm3019_vm15  ;;  %v4552_v34 = vld [vmem:[%s7846_s4 + $0x38] sm:$0xff] }
 0x800   : > { %v3015_v43 = vsub.f32 1.0, %v3014_v29  ;;  %vm7421_vm3 = vmor %vm3033_vm14, %vm3034_vm7  ;;  %v3055_v36 = vor.u32 1.1754944e-38, %v3054_v45  ;;  %v3040_v29 = vor.u32 1.1754944e-38, %v3039_v25  ;;  %v4553_v45 = vld [vmem:[%s7846_s4 + $0x40] sm:$0xff]  ;;  %v4560_v25 = vld [vmem:[%s7846_s4 + $0x78] sm:$0xff] }
 0x801   : > { %v3030_v40 = vsub.f32 1.0, %v3029_v5 }
 0x802   : > { %v4436_v27 = vpop.eup %4435  ;;  %v3016_v12 = vmul.f32 %v7361_v15, %v3015_v43 }
 0x803   : > { %v7380_v49 = vpop.eup %4437  ;;  %v3012_v10 = vadd.f32 1.0, %v4436_v27  ;;  %v3031_v62 = vmul.f32 %v7375_v6, %v3030_v40 }
 0x804   : > { %v3044_v35 = vmul.f32 %v7380_v49, %v7321_v38  ;;  %vm3049_vm10 = vweird.f32 %v7380_v49  ;;  %v3017_v16 = vadd.f32 %v7361_v15, %v3016_v12  ;;  %v4548_v12 = vld [vmem:[%s7846_s4 + $0x18] sm:$0xff] }
 0x805   : > { %4439 = vrcp.f32 %v3012_v10  ;;  %v3069_v60 = vand.u32 2147483648, %v3012_v10  ;;  %v3067_v23 = vand.u32 2147483647, %v3012_v10  ;;  %v3032_v42 = vadd.f32 %v7375_v6, %v3031_v62  ;;  %vm7408_vm12 = vmor %vm3048_vm13, %vm3049_vm10  ;;  %v4547_v62 = vld [vmem:[%s7846_s4 + $0x10] sm:$0xff] }
 0x806   : > { %v3045_v2 = vsub.f32 1.0, %v3044_v35  ;;  %4441 = vtanh.f32 %v7267_v14  ;;  %vm3063_vm0 = vweird.f32 %v3012_v10  ;;  %vm3023_vm10 = vcmp.eq.f32.partialorder %v3022_v46, 8.507059e+37 }
 0x807   : > { %4443 = vtanh.f32 %v7390_v0  ;;  %v3070_v24 = vor.u32 1.1754944e-38, %v3069_v60  ;;  %vm3068_vm4 = vcmp.eq.f32.partialorder %v3067_v23, 8.507059e+37  ;;  %v4551_v60 = vld [vmem:[%s7846_s4 + $0x30] sm:$0xff] }
 0x808   : > { %v3046_v52 = vmul.f32 %v7380_v49, %v3045_v2  ;;  %4445 = vtanh.f32 %v7392_v31  ;;  %v3021_v2 = vsel %vm3020_vm6, %v7361_v15, %v3017_v16  ;;  %v4545_v15 = vld [vmem:[%s7846_s4] sm:$0xff]  ;;  %v4555_v23 = vld [vmem:[%s7846_s4 + $0x50] sm:$0xff] }
 0x809   : > { %4447 = vtanh.f32 %v7251_v17 }
 0x80a   : > { %v3047_v59 = vadd.f32 %v7380_v49, %v3046_v52 }
 0x80b   : > { %v4440_v11 = vpop.eup %4439 }
 0x80c   : > { %v3059_v37 = vmul.f32 %v4440_v11, %v3012_v10  ;;  %vm3064_vm8 = vweird.f32 %v4440_v11  ;;  %v4442_v55 = vpop.eup %4441  ;;  %v3051_v47 = vsel %vm7408_vm12, %v7380_v49, %v3047_v59  ;;  %v3024_v10 = vand.u32 2147483648, %v7302_v28  ;;  %v4550_v59 = vld [vmem:[%s7846_s4 + $0x28] sm:$0xff] }
 0x80d   : > { %v4444_v27 = vpop.eup %4443  ;;  %vm3065_vm1 = vmor %vm3063_vm0, %vm3064_vm8  ;;  %v3036_v49 = vsel %vm7421_vm3, %v7375_v6, %v3032_v42  ;;  %v3056_v7 = vsel %vm3053_vm11, %v3055_v36, %v3051_v47  ;;  %v4556_v42 = vld [vmem:[%s7846_s4 + $0x58] sm:$0xff] }
 0x80e   : > { %v3060_v48 = vsub.f32 1.0, %v3059_v37  ;;  %v4446_v39 = vpop.eup %4445  ;;  %v3041_v18 = vsel %vm3038_vm9, %v3040_v29, %v3036_v49  ;;  %v3025_v40 = vor.u32 1.1754944e-38, %v3024_v10  ;;  %v7441_v6 = vmul.f32 %v4444_v27, %v3056_v7  ;;  %v4546_v37 = vld [vmem:[%s7846_s4 + $0x8] sm:$0xff] }
 0x80f   : > { %v7444_v52 = vmul.f32 %v4442_v55, %v3041_v18  ;;  %v4448_v28 = vpop.eup %4447  ;;  %v4557_v55 = vld [vmem:[%s7846_s4 + $0x60] sm:$0xff] }
 0x810   : > { %v3061_v22 = vmul.f32 %v4440_v11, %v3060_v48  ;;  %v3026_v43 = vsel %vm3023_vm10, %v3025_v40, %v3021_v2  ;;  %v4549_v48 = vld [vmem:[%s7846_s4 + $0x20] sm:$0xff] }
 0x812   : > { %v3062_v38 = vadd.f32 %v4440_v11, %v3061_v22  ;;  %v4554_v22 = vld [vmem:[%s7846_s4 + $0x48] sm:$0xff] }
 0x814   : > { %v3066_v5 = vsel %vm3065_vm1, %v4440_v11, %v3062_v38  ;;  %v7447_v11 = vmul.f32 %v4448_v28, %v3026_v43 }
 0x815   : > { %v3071_v35 = vsel %vm3068_vm4, %v3070_v24, %v3066_v5 }
 0x816   : > { %v7437_v1 = vmul.f32 %v4446_v39, %v3071_v35 }
 0x818   : > { %3109 = vmatpush.msra.mxu0 %v7437_v1 }
 0x81a   : > { %3110 = vmatpush.msra.mxu0 %v7441_v6 }
 0x81c   : > { %3111 = vmatpush.msra.mxu0 %v7444_v52 }
 0x81e   : > { %3112 = vmatpush.msra.mxu0 %v7447_v11 }
 0x81f   : > { %3911 = vmatmul.msk.f32.vlgmr.msra.gmra.mxu0 %vm1122_vm5, %v4545_v15 }
 0x827   : > { %3912 = vmatmul.msk.f32.gmra.mxu0 %vm1122_vm5, %v4546_v37 }
 0x82f   : > { %3913 = vmatmul.msk.f32.gmra.mxu0 %vm1122_vm5, %v4547_v62 }
 0x837   : > { %3914 = vmatmul.msk.f32.gmra.mxu0 %vm1122_vm5, %v4548_v12 }
 0x83f   : > { %3915 = vmatmul.msk.f32.gmra.mxu0 %vm1122_vm5, %v4549_v48 }
 0x847   : > { %3916 = vmatmul.msk.f32.gmra.mxu0 %vm1122_vm5, %v4550_v59 }
 0x84f   : > { %3917 = vmatmul.msk.f32.gmra.mxu0 %vm1122_vm5, %v4551_v60 }
 0x857   : > { %3918 = vmatmul.msk.f32.gmra.mxu0 %vm1122_vm5, %v4552_v34 }
 0x85f   : > { %3919 = vmatmul.msk.f32.gmra.mxu0 %vm1122_vm5, %v4553_v45 }
 0x867   : > { %3920 = vmatmul.msk.f32.gmra.mxu0 %vm1122_vm5, %v4554_v22 }
 0x86f   : > { %3921 = vmatmul.msk.f32.gmra.mxu0 %vm1122_vm5, %v4555_v23 }
 0x877   : > { %3922 = vmatmul.msk.f32.gmra.mxu0 %vm1122_vm5, %v4556_v42 }
 0x87f   : > { %3923 = vmatmul.msk.f32.gmra.mxu0 %vm1122_vm5, %v4557_v55 }
 0x887   : > { %3924 = vmatmul.msk.f32.gmra.mxu0 %vm1122_vm5, %v4558_v33 }
 0x88f   : > { %3925 = vmatmul.msk.f32.gmra.mxu0 %vm1122_vm5, %v4559_v13 }
 0x897   : > { %3926 = vmatmul.msk.f32.gmra.mxu0 %vm1122_vm5, %v4560_v25 }
 0x89c   : > { %v3114_v27 = vpop.f32.mrf.mxu0 }
 0x89d   : > { %v3115_v36 = vadd.f32 %v3114_v27, %v8090_v26 }
 0x89f   : > { %v3927_v46 = vmul.f32 -1.442695, %v3115_v36 }
 0x8a1   : > { %4449 = vpow2.f32 %v3927_v46 }
 0x8a4   : > { %v3117_v38 = vpop.f32.mrf.mxu0 }
 0x8a5   : > { %v3118_v49 = vadd.f32 %v3117_v38, %v8091_v54 }
 0x8a7   : > { %v4450_v7 = vpop.eup %4449  ;;  %v3928_v18 = vmul.f32 -1.442695, %v3118_v49 }
 0x8a8   : > { %v7520_v40 = vadd.f32 1.0, %v4450_v7 }
 0x8aa   : > { %vm3199_vm2 = vweird.f32 %v7520_v40  ;;  %v3205_v49 = vand.u32 2147483648, %v7520_v40 }
 0x8ac   : > { %v3120_v47 = vpop.f32.mrf.mxu0 }
 0x8ad   : > { %v3121_v29 = vadd.f32 %v3120_v47, %v8094_v53 }
 0x8af   : > { %v3929_v28 = vmul.f32 -1.442695, %v3121_v29 }
 0x8b4   : > { %v3123_v21 = vpop.f32.mrf.mxu0 }
 0x8b5   : > { %v3124_v54 = vadd.f32 %v3123_v21, %v8095_v57 }
 0x8b7   : > { %v3930_v53 = vmul.f32 -1.442695, %v3124_v54 }
 0x8bc   : > { %v3126_v16 = vpop.f32.mrf.mxu0 }
 0x8bd   : > { %v3127_v5 = vadd.f32 %v3126_v16, %v8129_v50 }
 0x8bf   : > { %v3931_v2 = vmul.f32 -1.442695, %v3127_v5 }
 0x8c1   : > { %4451 = vpow2.f32 %v3931_v2 }
 0x8c2   : > { %4453 = vpow2.f32 %v3928_v18  ;;  %v3203_v18 = vand.u32 2147483647, %v7520_v40 }
 0x8c3   : > { %4455 = vrcp.f32 %v7520_v40 }
 0x8c4   : > { %v3129_v39 = vpop.f32.mrf.mxu0  ;;  %4457 = vpow2.f32 %v3929_v28  ;;  %vm3204_vm13 = vcmp.eq.f32.partialorder %v3203_v18, 8.507059e+37 }
 0x8c5   : > { %v3130_v43 = vadd.f32 %v3129_v39, %v8130_v58 }
 0x8c7   : > { %v3932_v50 = vmul.f32 -1.442695, %v3130_v43  ;;  %v4452_v15 = vpop.eup %4451 }
 0x8c8   : > { %v4454_v37 = vpop.eup %4453  ;;  %v7528_v48 = vadd.f32 1.0, %v4452_v15 }
 0x8c9   : > { %4459 = vpow2.f32 %v3932_v50  ;;  %v4456_v12 = vpop.eup %4455  ;;  %v7530_v59 = vadd.f32 1.0, %v4454_v37 }
 0x8ca   : > { %v4458_v58 = vpop.eup %4457  ;;  %v3195_v34 = vmul.f32 %v4456_v12, %v7520_v40  ;;  %4461 = vpow2.f32 %v3930_v53  ;;  %vm3200_vm5 = vweird.f32 %v4456_v12  ;;  %vm3259_vm3 = vweird.f32 %v7528_v48 }
 0x8cb   : > { %v7535_v57 = vadd.f32 1.0, %v4458_v58  ;;  %4463 = vrcp.f32 %v7528_v48  ;;  %vm7567_vm7 = vmor %vm3199_vm2, %vm3200_vm5  ;;  %v3218_v50 = vand.u32 2147483647, %v7530_v59  ;;  %v3220_v54 = vand.u32 2147483648, %v7530_v59 }
 0x8cc   : > { %v3132_v24 = vpop.f32.mrf.mxu0  ;;  %4465 = vrcp.f32 %v7530_v59  ;;  %v3206_v58 = vor.u32 1.1754944e-38, %v3205_v49  ;;  %vm3214_vm8 = vweird.f32 %v7530_v59 }
 0x8cd   : > { %v3133_v62 = vadd.f32 %v3132_v24, %v8096_v4  ;;  %v3196_v4 = vsub.f32 1.0, %v3195_v34  ;;  %vm7590_vm14 = vcmp.eq.f32.partialorder %v3218_v50, 8.507059e+37  ;;  %vm3229_vm15 = vweird.f32 %v7535_v57 }
 0x8ce   : > { %v3235_v49 = vand.u32 2147483648, %v7535_v57 }
 0x8cf   : > { %v3933_v45 = vmul.f32 -1.442695, %v3133_v62  ;;  %v4460_v22 = vpop.eup %4459  ;;  %v3197_v38 = vmul.f32 %v4456_v12, %v3196_v4 }
 0x8d0   : > { %v7539_v23 = vadd.f32 1.0, %v4460_v22  ;;  %v4462_v55 = vpop.eup %4461  ;;  %v3221_v22 = vor.u32 1.1754944e-38, %v3220_v54 }
 0x8d1   : > { %4467 = vpow2.f32 %v3933_v45  ;;  %v7545_v13 = vpop.eup %4463  ;;  %v7550_v21 = vadd.f32 1.0, %v4462_v55  ;;  %v3198_v24 = vadd.f32 %v4456_v12, %v3197_v38 }
 0x8d2   : > { %4469 = vrcp.f32 %v7535_v57  ;;  %v7547_v25 = vpop.eup %4465  ;;  %v3255_v16 = vmul.f32 %v7545_v13, %v7528_v48  ;;  %vm3260_vm0 = vweird.f32 %v7545_v13  ;;  %vm3274_vm2 = vweird.f32 %v7539_v23 }
 0x8d3   : > { %4471 = vrcp.f32 %v7539_v23  ;;  %v3210_v39 = vmul.f32 %v7547_v25, %v7530_v59  ;;  %v3202_v28 = vsel %vm7567_vm7, %v4456_v12, %v3198_v24  ;;  %vm3215_vm12 = vweird.f32 %v7547_v25  ;;  %vm7612_vm4 = vmor %vm3259_vm3, %vm3260_vm0 }
 0x8d4   : > { %v3135_v10 = vpop.f32.mrf.mxu0  ;;  %v3256_v5 = vsub.f32 1.0, %v3255_v16  ;;  %v3207_v45 = vsel %vm3204_vm13, %v3206_v58, %v3202_v28  ;;  %vm7629_vm11 = vmor %vm3214_vm8, %vm3215_vm12  ;;  %v3236_v59 = vor.u32 1.1754944e-38, %v3235_v49 }
 0x8d5   : > { %v3136_v42 = vadd.f32 %v3135_v10, %v8097_v30  ;;  %v3211_v29 = vsub.f32 1.0, %v3210_v39  ;;  %v3265_v39 = vand.u32 2147483648, %v7528_v48 }
 0x8d7   : > { %v3934_v27 = vmul.f32 -1.442695, %v3136_v42  ;;  %v4468_v47 = vpop.eup %4467  ;;  %v3212_v12 = vmul.f32 %v7547_v25, %v3211_v29 }
 0x8d8   : > { %v7554_v30 = vpop.eup %4469  ;;  %v7558_v36 = vadd.f32 1.0, %v4468_v47 }
 0x8d9   : > { %4473 = vpow2.f32 %v3934_v27  ;;  %v7561_v46 = vpop.eup %4471  ;;  %v3225_v10 = vmul.f32 %v7554_v30, %v7535_v57  ;;  %v3233_v27 = vand.u32 2147483647, %v7535_v57  ;;  %v3213_v24 = vadd.f32 %v7547_v25, %v3212_v12 }
 0x8da   : > { %4475 = vrcp.f32 %v7550_v21  ;;  %v3270_v15 = vmul.f32 %v7561_v46, %v7539_v23  ;;  %vm3230_vm1 = vweird.f32 %v7554_v30  ;;  %vm3275_vm10 = vweird.f32 %v7561_v46 }
 0x8db   : > { %4477 = vrcp.f32 %v7558_v36  ;;  %v3226_v40 = vsub.f32 1.0, %v3225_v10  ;;  %vm7639_vm9 = vcmp.eq.f32.partialorder %v3233_v27, 8.507059e+37  ;;  %vm7650_vm5 = vmor %vm3229_vm15, %vm3230_vm1  ;;  %v3280_v57 = vand.u32 2147483648, %v7539_v23 }
 0x8dc   : > { %v7517_v35 = vpop.f32.mrf.mxu0  ;;  %v3271_v4 = vsub.f32 1.0, %v3270_v15  ;;  %v3266_v15 = vor.u32 1.1754944e-38, %v3265_v39  ;;  %vm7667_vm7 = vmor %vm3274_vm2, %vm3275_vm10  ;;  %vm3289_vm13 = vweird.f32 %v7558_v36  ;;  %vm3244_vm15 = vweird.f32 %v7550_v21 }
 0x8dd   : > { %v3139_v37 = vadd.f32 %v7517_v35, %v8020_v9  ;;  %v3227_v55 = vmul.f32 %v7554_v30, %v3226_v40  ;;  %v3248_v35 = vand.u32 2147483647, %v7550_v21 }
 0x8de   : > { %v3272_v2 = vmul.f32 %v7561_v46, %v3271_v4 }
 0x8df   : > { %v4474_v62 = vpop.eup %4473  ;;  %v3228_v50 = vadd.f32 %v7554_v30, %v3227_v55 }
 0x8e0   : > { %v7584_v34 = vpop.eup %4475  ;;  %v7588_v9 = vadd.f32 1.0, %v4474_v62  ;;  %v3273_v62 = vadd.f32 %v7561_v46, %v3272_v2  ;;  %v3281_v2 = vor.u32 1.1754944e-38, %v3280_v57 }
 0x8e1   : > { %v7599_v47 = vpop.eup %4477  ;;  %v3240_v16 = vmul.f32 %v7584_v34, %v7550_v21  ;;  %v3232_v12 = vsel %vm7650_vm5, %v7554_v30, %v3228_v50  ;;  %v3278_v30 = vand.u32 2147483647, %v7539_v23 }
 0x8e2   : > { %v3277_v39 = vsel %vm7667_vm7, %v7561_v46, %v3273_v62  ;;  %vm3290_vm12 = vweird.f32 %v7599_v47  ;;  %vm3304_vm5 = vweird.f32 %v7588_v9 }
 0x8e3   : > { %vm3279_vm8 = vcmp.eq.f32.partialorder %v3278_v30, 8.507059e+37  ;;  %vm7707_vm3 = vmor %vm3289_vm13, %vm3290_vm12  ;;  %vm3249_vm12 = vcmp.eq.f32.partialorder %v3248_v35, 8.507059e+37 }
 0x8e4   : > { %v7523_v26 = vpop.f32.mrf.mxu0 }
 0x8ec   : > { %v7532_v60 = vpop.f32.mrf.mxu0 }
 0x8f4   : > { %v7543_v33 = vpop.f32.mrf.mxu0 }
 0x8fc   : > { %v3150_v7 = vpop.f32.mrf.mxu0 }
 0x8fd   : > { %v3151_v43 = vadd.f32 %v3150_v7, %v8098_v41  ;;  %v3257_v41 = vmul.f32 %v7545_v13, %v3256_v5  ;;  %v3263_v5 = vand.u32 2147483647, %v7528_v48  ;;  %v3285_v48 = vmul.f32 %v7599_v47, %v7558_v36 }
 0x8ff   : > { %v3935_v53 = vmul.f32 -1.442695, %v3151_v43  ;;  %v3258_v42 = vadd.f32 %v7545_v13, %v3257_v41  ;;  %vm3264_vm6 = vcmp.eq.f32.partialorder %v3263_v5, 8.507059e+37  ;;  %v3286_v40 = vsub.f32 1.0, %v3285_v48 }
 0x901   : > { %4479 = vpow2.f32 %v3935_v53  ;;  %v3262_v43 = vsel %vm7612_vm4, %v7545_v13, %v3258_v42 }
 0x902   : > { %4481 = vtanh.f32 %v3139_v37  ;;  %v3217_v37 = vsel %vm7629_vm11, %v7547_v25, %v3213_v24  ;;  %v3267_v53 = vsel %vm3264_vm6, %v3266_v15, %v3262_v43  ;;  %v3237_v24 = vsel %vm7639_vm9, %v3236_v59, %v3232_v12 }
 0x903   : > { %4483 = vrcp.f32 %v7588_v9  ;;  %v3222_v58 = vsel %vm7590_vm14, %v3221_v22, %v3217_v37  ;;  %v3394_v22 = vmul.f32 %v3267_v53, %v7251_v17  ;;  %v3287_v17 = vmul.f32 %v7599_v47, %v3286_v40 }
 0x904   : > { %v3153_v38 = vpop.f32.mrf.mxu0  ;;  %vm3245_vm14 = vweird.f32 %v7584_v34  ;;  %v3293_v59 = vand.u32 2147483647, %v7558_v36 }
 0x905   : > { %v3154_v10 = vadd.f32 %v3153_v38, %v8099_v56  ;;  %v3142_v56 = vadd.f32 %v7523_v26, %v8008_v61  ;;  %v3241_v26 = vsub.f32 1.0, %v3240_v16  ;;  %v3250_v38 = vand.u32 2147483648, %v7550_v21  ;;  %vm7735_vm2 = vmor %vm3244_vm15, %vm3245_vm14 }
 0x906   : > { %v3288_v28 = vadd.f32 %v7599_v47, %v3287_v17  ;;  %vm3294_vm11 = vcmp.eq.f32.partialorder %v3293_v59, 8.507059e+37 }
 0x907   : > { %v4480_v7 = vpop.eup %4479  ;;  %v3936_v18 = vmul.f32 -1.442695, %v3154_v10  ;;  %v3242_v55 = vmul.f32 %v7584_v34, %v3241_v26 }
 0x908   : > { %v7634_v54 = vadd.f32 1.0, %v4480_v7  ;;  %v4482_v61 = vpop.eup %4481 }
 0x909   : > { %4485 = vpow2.f32 %v3936_v18  ;;  %v3398_v41 = vmul.f32 %v4482_v61, %v3207_v45  ;;  %v7659_v42 = vpop.eup %4483  ;;  %v7688_v46 = vadd.f32 %v7584_v34, %v3242_v55 }
 0x90a   : > { %4487 = vrcp.f32 %v7634_v54  ;;  %v3300_v23 = vmul.f32 %v7659_v42, %v7588_v9  ;;  %v3345_v15 = vand.u32 2147483648, %v7634_v54  ;;  %v3343_v53 = vand.u32 2147483647, %v7634_v54 }
 0x90b   : > { %4489 = vtanh.f32 %v3142_v56  ;;  %v3402_v49 = vadd.f32 %v3398_v41, %v3394_v22  ;;  %v3282_v56 = vsel %vm3279_vm8, %v3281_v2, %v3277_v39  ;;  %vm3339_vm1 = vweird.f32 %v7634_v54 }
 0x90c   : > { %v3156_v4 = vpop.f32.mrf.mxu0  ;;  %v3301_v48 = vsub.f32 1.0, %v3300_v23  ;;  %v3395_v13 = vmul.f32 %v3282_v56, %v7267_v14  ;;  %vm3344_vm6 = vcmp.eq.f32.partialorder %v3343_v53, 8.507059e+37  ;;  %vm3305_vm9 = vweird.f32 %v7659_v42 }
 0x90d   : > { %v3157_v27 = vadd.f32 %v3156_v4, %v8100_v44  ;;  %v3145_v44 = vadd.f32 %v7532_v60, %v8131_v32  ;;  %v3295_v60 = vand.u32 2147483648, %v7558_v36  ;;  %v3292_v4 = vsel %vm7707_vm3, %v7599_v47, %v3288_v28  ;;  %vm7749_vm7 = vmor %vm3304_vm5, %vm3305_vm9 }
 0x90f   : > { %v4486_v16 = vpop.eup %4485  ;;  %v3937_v10 = vmul.f32 -1.442695, %v3157_v27  ;;  %v3296_v37 = vor.u32 1.1754944e-38, %v3295_v60  ;;  %v3247_v60 = vsel %vm7735_vm2, %v7584_v34, %v7688_v46 }
 0x910   : > { %v4488_v5 = vpop.eup %4487  ;;  %v7685_v7 = vadd.f32 1.0, %v4486_v16 }
 0x911   : > { %v4490_v29 = vpop.eup %4489  ;;  %v3335_v32 = vmul.f32 %v4488_v5, %v7634_v54  ;;  %4491 = vpow2.f32 %v3937_v10  ;;  %vm3340_vm0 = vweird.f32 %v4488_v5  ;;  %v3310_v54 = vand.u32 2147483648, %v7588_v9 }
 0x912   : > { %4493 = vrcp.f32 %v7685_v7  ;;  %v3399_v43 = vmul.f32 %v4490_v29, %v3222_v58  ;;  %v3302_v58 = vmul.f32 %v7659_v42, %v3301_v48  ;;  %vm3341_vm4 = vmor %vm3339_vm1, %vm3340_vm0  ;;  %v3297_v45 = vsel %vm3294_vm11, %v3296_v37, %v3292_v4 }
 0x913   : > { %4495 = vtanh.f32 %v3145_v44  ;;  %v3336_v18 = vsub.f32 1.0, %v3335_v32  ;;  %v3360_v10 = vand.u32 2147483648, %v7685_v7  ;;  %v3358_v23 = vand.u32 2147483647, %v7685_v7 }
 0x914   : > { %4497 = vtanh.f32 %v3402_v49  ;;  %v3159_v50 = vpop.f32.mrf.mxu0  ;;  %v3403_v12 = vadd.f32 %v3399_v43, %v3395_v13  ;;  %v3303_v16 = vadd.f32 %v7659_v42, %v3302_v58  ;;  %v3251_v29 = vor.u32 1.1754944e-38, %v3250_v38 }
 0x915   : > { %v3160_v61 = vadd.f32 %v3159_v50, %v8133_v3  ;;  %v3337_v26 = vmul.f32 %v4488_v5, %v3336_v18  ;;  %v3148_v3 = vadd.f32 %v7543_v33, %v8132_v20  ;;  %v3346_v33 = vor.u32 1.1754944e-38, %v3345_v15 }
 0x916   : > { %vm3354_vm13 = vweird.f32 %v7685_v7  ;;  %v3307_v56 = vsel %vm7749_vm7, %v7659_v42, %v3303_v16  ;;  %v3311_v43 = vor.u32 1.1754944e-38, %v3310_v54  ;;  %vm3359_vm15 = vcmp.eq.f32.partialorder %v3358_v23, 8.507059e+37 }
 0x917   : > { %v4492_v62 = vpop.eup %4491  ;;  %v3938_v40 = vmul.f32 -1.442695, %v3160_v61  ;;  %v3338_v41 = vadd.f32 %v4488_v5, %v3337_v26  ;;  %v3252_v46 = vsel %vm3249_vm12, %v3251_v29, %v3247_v60 }
 0x918   : > { %v4494_v14 = vpop.eup %4493  ;;  %v7718_v36 = vadd.f32 1.0, %v4492_v62 }
 0x919   : > { %v4496_v57 = vpop.eup %4495  ;;  %v3350_v55 = vmul.f32 %v4494_v14, %v7685_v7  ;;  %4499 = vpow2.f32 %v3938_v40  ;;  %v3342_v20 = vsel %vm3341_vm4, %v4488_v5, %v3338_v41  ;;  %vm3355_vm10 = vweird.f32 %v4494_v14 }
 0x91a   : > { %v4498_v27 = vpop.eup %4497  ;;  %4501 = vrcp.f32 %v7718_v36  ;;  %v3347_v22 = vsel %vm3344_vm6, %v3346_v33, %v3342_v20  ;;  %v3400_v30 = vmul.f32 %v4496_v57, %v3237_v24  ;;  %v3396_v5 = vmul.f32 %v3297_v45, %v7390_v0  ;;  %vm3356_vm8 = vmor %vm3354_vm13, %vm3355_vm10  ;;  %v3422_v45 = vld [vmem:[%s7848_s6] sm:$0xff] }
 0x91b   : > { %4503 = vtanh.f32 %v3148_v3  ;;  %v3351_v47 = vsub.f32 1.0, %v3350_v55  ;;  %v7726_v39 = vmul.f32 %v4498_v27, %v3347_v22  ;;  %v3308_v24 = vand.u32 2147483647, %v7588_v9  ;;  %3476 = vmatmul.f32.vlgmr.msra.gmra.mxu1 %v3422_v45  ;;  %v8166_v22 = vld [vmem:[#allocation28_spill] sm:$0xff] }
 0x91c   : > { %4505 = vtanh.f32 %v3403_v12  ;;  %v3404_v32 = vadd.f32 %v3400_v30, %v3396_v5  ;;  %v3361_v7 = vor.u32 1.1754944e-38, %v3360_v10  ;;  %v3375_v15 = vand.u32 2147483648, %v7718_v36  ;;  %v8167_v30 = vld [vmem:[#allocation10_spill] sm:$0xff] }
 0x91d   : > { %v3352_v44 = vmul.f32 %v4494_v14, %v3351_v47  ;;  %3418 = vst [vmem:[%s7743_s14] sm:$0xff] %v7726_v39  ;;  %vm3309_vm14 = vcmp.eq.f32.partialorder %v3308_v24, 8.507059e+37  ;;  %v3373_v59 = vand.u32 2147483647, %v7718_v36  ;;  %vm3369_vm3 = vweird.f32 %v7718_v36  ;;  %v3424_v47 = vld [vmem:[%s7848_s6 + $0x10] sm:$0xff] }
 0x91e   : > { %v3312_v50 = vsel %vm3309_vm14, %v3311_v43, %v3307_v56  ;;  %v3376_v25 = vor.u32 1.1754944e-38, %v3375_v15 }
 0x91f   : > { %v4500_v49 = vpop.eup %4499  ;;  %v3353_v2 = vadd.f32 %v4494_v14, %v3352_v44  ;;  %v3397_v21 = vmul.f32 %v3312_v50, %v7392_v31  ;;  %vm3374_vm4 = vcmp.eq.f32.partialorder %v3373_v59, 8.507059e+37 }
 0x920   : > { %v4502_v9 = vpop.eup %4501  ;;  %v3333_v18 = vadd.f32 1.0, %v4500_v49 }
 0x921   : > { %v4504_v48 = vpop.eup %4503  ;;  %v3365_v38 = vmul.f32 %v4502_v9, %v7718_v36  ;;  %v3357_v28 = vsel %vm3356_vm8, %v4494_v14, %v3353_v2  ;;  %vm3370_vm0 = vweird.f32 %v4502_v9 }
 0x922   : > { %4507 = vrcp.f32 %v3333_v18  ;;  %v4506_v34 = vpop.eup %4505  ;;  %v3362_v61 = vsel %vm3359_vm15, %v3361_v7, %v3357_v28  ;;  %v3401_v26 = vmul.f32 %v4504_v48, %v3252_v46  ;;  %vm3371_vm1 = vmor %vm3369_vm3, %vm3370_vm0  ;;  %v3390_v4 = vand.u32 2147483648, %v3333_v18 }
 0x923   : > { %v3366_v42 = vsub.f32 1.0, %v3365_v38  ;;  %4509 = vtanh.f32 %v3404_v32  ;;  %v3411_v37 = vmul.f32 %v4506_v34, %v3362_v61  ;;  %v3388_v57 = vand.u32 2147483647, %v3333_v18  ;;  %3479 = vmatmul.f32.gmra.mxu1 %v3424_v47 }
 0x924   : > { %v3405_v62 = vadd.f32 %v3401_v26, %v3397_v21  ;;  %vm3384_vm6 = vweird.f32 %v3333_v18  ;;  %v3391_v55 = vor.u32 1.1754944e-38, %v3390_v4 }
 0x925   : > { %v3367_v13 = vmul.f32 %v4502_v9, %v3366_v42  ;;  %3419 = vst [vmem:[%s7743_s14 + $0x8] sm:$0xff] %v3411_v37  ;;  %vm3389_vm10 = vcmp.eq.f32.partialorder %v3388_v57, 8.507059e+37 }
 0x926   : > { %4511 = vtanh.f32 %v3405_v62 }
 0x927   : > { %v3368_v35 = vadd.f32 %v4502_v9, %v3367_v13 }
 0x928   : > { %v4508_v53 = vpop.eup %4507 }
 0x929   : > { %v3380_v3 = vmul.f32 %v4508_v53, %v3333_v18  ;;  %v3372_v40 = vsel %vm3371_vm1, %v4502_v9, %v3368_v35  ;;  %v4510_v41 = vpop.eup %4509  ;;  %vm3385_vm11 = vweird.f32 %v4508_v53 }
 0x92a   : > { %v3377_v14 = vsel %vm3374_vm4, %v3376_v25, %v3372_v40  ;;  %vm3386_vm9 = vmor %vm3384_vm6, %vm3385_vm11 }
 0x92b   : > { %v3381_v58 = vsub.f32 1.0, %v3380_v3  ;;  %v3412_v12 = vmul.f32 %v4510_v41, %v3377_v14 }
 0x92c   : > { %v4512_v33 = vpop.eup %4511 }
 0x92d   : > { %v3382_v31 = vmul.f32 %v4508_v53, %v3381_v58  ;;  %3420 = vst [vmem:[%s7743_s14 + $0x10] sm:$0xff] %v3412_v12 }
 0x92f   : > { %v3383_v36 = vadd.f32 %v4508_v53, %v3382_v31 }
 0x931   : > { %v3387_v20 = vsel %vm3386_vm9, %v4508_v53, %v3383_v36 }
 0x932   : > { %v3392_v27 = vsel %vm3389_vm10, %v3391_v55, %v3387_v20 }
 0x933   : > { %v3413_v54 = vmul.f32 %v4512_v33, %v3392_v27 }
 0x935   : > { %3421 = vst [vmem:[%s7743_s14 + $0x18] sm:$0xff] %v3413_v54  ;;  %3483 = vmatpush.msra.mxu2 %v3413_v54 }
 0x937   : > { %3484 = vmatpush.msra.mxu2 %v3412_v12 }
 0x939   : > { %3485 = vmatpush.msra.mxu2 %v3411_v37 }
 0x93b   : > { %3486 = vmatpush.msra.mxu2 %v7726_v39  ;;  %v3459_v39 = vld [vmem:[%s470_s29 + $0x8] sm:$0xff] }
 0x93d   : > { %3487 = vmatpush.msra.mxu2 %v7437_v1  ;;  %v8168_v1 = vld [vmem:[#allocation11_spill] sm:$0xff] }
 0x93f   : > { %3488 = vmatpush.msra.mxu2 %v7441_v6  ;;  %v3423_v6 = vld [vmem:[%s7848_s6 + $0x8] sm:$0xff] }
 0x941   : > { %3489 = vmatpush.msra.mxu2 %v7444_v52  ;;  %v8169_v52 = vld [vmem:[#allocation12_spill] sm:$0xff] }
 0x943   : > { %3490 = vmatpush.msra.mxu2 %v7447_v11 }
 0x945   : > { %3491 = vmatpush.msra.mxu2 %v7173_v19  ;;  %v3425_v19 = vld [vmem:[%s7848_s6 + $0x18] sm:$0xff] }
 0x947   : > { %3492 = vmatpush.msra.mxu2 %v7177_v63 }
 0x949   : > { %3493 = vmatpush.msra.mxu2 %v7180_v8  ;;  %v3458_v8 = vld [vmem:[%s470_s29] sm:$0xff] }
 0x94b   : > { %3494 = vmatpush.msra.mxu2 %v7183_v51 }
 0x94d   : > { %3495 = vmatpush.msra.mxu2 %v8166_v22 }
 0x94f   : > { %3496 = vmatpush.msra.mxu2 %v8167_v30 }
 0x951   : > { %3497 = vmatpush.msra.mxu2 %v8168_v1 }
 0x953   : > { %3498 = vmatpush.msra.mxu2 %v8169_v52 }
 0x954   : > { %3499 = vmatmul.f32.vlgmr.msra.gmra.mxu2 %v3423_v6 }
 0x95c   : > { %3502 = vmatmul.f32.gmra.mxu2 %v3425_v19 }
 0x998   : > { %v3477_v63 = vpop.f32.mrf.mxu1 }
 0x999   : > { %v3478_v51 = vadd.f32 %v3477_v63, %v3458_v8 }
 0x9a0   : > { %v3480_v44 = vpop.f32.mrf.mxu1 }
 0x9a1   : > { %v3481_v10 = vadd.f32 %v3480_v44, %v3459_v39 }
 0x9d7   : > { %v3500_v11 = vpop.f32.mrf.mxu2 }
 0x9d8   : > { %v3501_v16 = vadd.f32 %v3500_v11, %v3478_v51 }
 0x9da   : > { %3506 = vst [vmem:[%s507_s16] sm:$0xff] %v3501_v16 }
 0x9de   : > { %3519 = sbr.rel (!%p4722_p6) target bundleno = 2539 (0x9eb), region = 170 }
 0x9df   : > { %v3503_v5 = vpop.f32.mrf.mxu2 }
 0x9e0   : > { %v3504_v17 = vadd.f32 %v3503_v5, %v3481_v10 }
 0x9e1   : > { %v3552_v24 = vld [vmem:[%s507_s16] sm:$0xff] (%p4722_p6) }
 0x9e2   : > { %3507 = vst [vmem:[%s507_s16 + $0x8] sm:$0xff] %v3504_v17 }
 0x9e3   : > { %3553 = vst [vmem:[%s3521_s25] sm:$0xff] %v3552_v24 }
 0x9e9   : > { %v3554_v23 = vld [vmem:[%s507_s16 + $0x8] sm:$0xff] }
 0x9ea   : > { %3555 = vst [vmem:[%s3521_s25 + $0x10] sm:$0xff] %v3554_v23 }
 0x9eb PF: > { %s3942_s26 = sshll.u32 %s4700_s13, 3  ;;  %s3566_s27 = sshll.u32 %s7743_s14, 4  ;;  %s3567_s27 = int_to_ptr.vmem [resolvable:$true] %s3566_s27 }
 0x9ec   : > { %s3565_s17 = scalar_lea.hbm %s7851_s9, %s3942_s26  ;;  %s4581_s24 = scalar_lea.hbm %s7851_s9, 64 }
 0x9ed   : > { %s3568_s0 = sshll.u32 %s3565_s17, 4  ;;  %s3569_s0 = int_to_ptr.hbm [resolvable:$true] %s3568_s0 }
 0x9ee   : > { %s4575_s16 = sshra.s32 %s3569_s0, 4  ;;  %s4576_s16 = int_to_ptr.hbm [resolvable:$true] %s4575_s16 }
 0x9ef   : > { %s4577_s1 = scalar_lea.hbm %s4576_s16, 32  ;;  %p4582_p2 = scmp.lt.s32.totalorder %s4576_s16, %s7851_s9 }
 0x9f0   : > { %p4578_p13 = scmp.ne.s32.totalorder %s4576_s16, %s4577_s1  ;;  %p4583_p3 = scmp.lt.s32.totalorder %s4581_s24, %s4577_s1 }
 0x9f2   : > { %p4579_p0 = pnand %p4578_p13, %p4722_p6  ;;  %p4584_p4 = por %p4583_p3, %p4582_p2 }
 0x9f4   : > { %p4580_p1 = pneg %p4579_p0 }
 0x9f6   : > { %p4585_p5 = pnand %p4584_p4, %p4580_p1 }
 0x9f8   : > { %4588 = shalt.err (!%p4585_p5)
}
 0x9f9   : > { %s4626_s17 = smov 128   ;;  %s4627_s25 = smov 256  }
 0x9fa   : > { %s4628_s26 = smov 8   ;;  %s8170_s28 = scalar_lea.sflag [#allocation8], %s4757_s19 }
 0x9fb   : > { %3955 = dma.vmem_to_hbm [thread:$0]  (%p4722_p6), %s3567_s27, 512, %s3569_s0, %s8170_s28, %s4626_s17, %s4627_s25, %s4628_s26  }
 0x9fc PF: > { %s3590_s29 = sand.u32 1, %s4611_s30   ;;  %p3958_p7 = pnand %p3703_p9, %p4726_p8 }
 0x9fd   : > { %s3591_s1 = scalar_lea.sflag [#allocation8], %s3590_s29 }
 0x9fe   : > { %p3959_p10 = pneg %p3958_p7 }
 0xa00   : > { %4606 = dma.done.wait (%p3959_p10), %s3591_s1, 512  }
 0xa01   : > { %4608 = vsyncadd (%p3959_p10), %s3591_s1, 4294966784  ;;  %p20_p11 = scmp.ge.s32.totalorder %s4704_s15, 4   ;;  %s8171_s30 = smov %s4615_s10 }
 0xa02   : > { %s8172_s10 = smov %s4619_s11  ;;  %s8173_s11 = smov %s4716_s18 }
 0xa03   : > { %s8174_s12 = smov %s4704_s15  ;;  %22 = sbr.rel (!%p20_p11) target bundleno = 6 (0x6), region = 272 }
 0xa08   :  { %3597 = vsyncpa [#allocation8], 1 }
 0xa09   :  { %3599 = vsyncpa [#allocation8 + $0x1], 1 }

</bundles_post_ra>
